<compile_context>
chip_gen: v7x
topology: tpu7x:2x2x1
jax: 0.10.0
libtpu: 0.0.40
codegen_flags: <defaults>
</compile_context>

<pallas_src>
import jax
import jax.numpy as jnp
from jax import lax
from jax.experimental import pallas as pl
from jax.experimental.pallas import tpu as pltpu


def _convlstm_kernel(xp_ref, w_ref, b_ref, c_ref, h_out_ref, c_out_ref,
                     conv_scr):
    # xp_ref   : (1, D+2p, H+2p, W+2p, cin)  padded concat([x, h_cur]), bf16
    # w_ref    : (k, k, k*cin, 4*hd)         kw folded into contraction, bf16
    # b_ref    : (1, 4*hd)                   f32
    # c_ref    : (1, tD, H, W, hd)           f32
    # h_out_ref, c_out_ref : (1, tD, H, W, hd)
    # conv_scr : (tD*H*W, 4*hd)              f32 VMEM scratch (pre-activations)
    k = w_ref.shape[0]
    _, tD, H, W, hd = c_ref.shape
    TS = tD * H * W

    # Start (in padded D coordinates) of this grid step's output-D chunk.
    d0 = pl.multiple_of(pl.program_id(1) * tD, tD)

    # 3-D 'same' conv as k*k matmuls with the kw taps folded into the
    # contraction (K = k*cin): per (kd, kh) the LHS is the k kw-shifted
    # windows, read straight off the Ref, concatenated on the channel axis.
    acc = jnp.zeros((TS, 4 * hd), jnp.float32)
    for kd in range(k):
        for kh in range(k):
            win = jnp.concatenate(
                [xp_ref[0, pl.ds(d0 + kd, tD), kh:kh + H, kw:kw + W, :]
                 for kw in range(k)],
                axis=-1)                                # (tD, H, W, k*cin) bf16
            acc = acc + jnp.dot(win.reshape(TS, -1), w_ref[kd, kh],
                                preferred_element_type=jnp.float32)

    # Single bias add; park pre-activations in VMEM so the per-gate splits
    # below are ref-level loads rather than value-level lane sub-slices.
    conv_scr[...] = acc + b_ref[...]

    i = jax.nn.sigmoid(conv_scr[:, 0 * hd:1 * hd])
    f = jax.nn.sigmoid(conv_scr[:, 1 * hd:2 * hd])
    o = jax.nn.sigmoid(conv_scr[:, 2 * hd:3 * hd])
    g = jnp.tanh(conv_scr[:, 3 * hd:4 * hd])

    c_cur = c_ref[0].reshape(TS, hd)
    c_next = f * c_cur + i * g
    h_next = o * jnp.tanh(c_next)

    h_out_ref[0] = h_next.reshape(tD, H, W, hd).astype(h_out_ref.dtype)
    c_out_ref[0] = c_next.reshape(tD, H, W, hd).astype(c_out_ref.dtype)


def convlstm_cell_3d(x, h_cur, c_cur, weight, bias, kernel_size, d_tile=None):
    """ConvLSTMCell3D forward.

    x      : (N, D, H, W, input_dim)
    h_cur  : (N, D, H, W, hidden_dim)
    c_cur  : (N, D, H, W, hidden_dim)
    weight : (k, k, k, input_dim + hidden_dim, 4 * hidden_dim)   (DHWIO)
    bias   : (4 * hidden_dim,)
    returns (h_next, c_next), each (N, D, H, W, hidden_dim)
    """
    N, D, H, W, in_dim = x.shape
    hd = h_cur.shape[-1]
    k = kernel_size
    p = k // 2
    cin = in_dim + hd

    # Spatial tile along D so one grid step handles ~128 output rows (keeps the
    # accumulator small and gives the pipeline more steps than just N).
    if d_tile is None:
        target = max(1, 128 // (H * W))
        d_tile = 1
        for cand in range(1, D + 1):
            if D % cand == 0 and cand <= target:
                d_tile = cand
    tD = d_tile
    assert D % tD == 0
    nD = D // tD

    # Concat input + hidden on channels, zero-pad spatial dims, cast to bf16
    # (MXU-native operand dtype; halves the HBM round-trip for this temp).
    combined = jnp.concatenate([x, h_cur], axis=-1).astype(jnp.bfloat16)
    combined_pad = jnp.pad(combined, ((0, 0), (p, p), (p, p), (p, p), (0, 0)))
    Dp, Hp, Wp = D + 2 * p, H + 2 * p, W + 2 * p

    # Fold the kw taps into the contraction dimension: (k, k, k*cin, 4*hd).
    w_folded = weight.reshape(k, k, k * cin, 4 * hd).astype(jnp.bfloat16)
    bias2d = bias.reshape(1, 4 * hd).astype(jnp.float32)
    c_cur = c_cur.astype(jnp.float32)

    grid_spec = pltpu.PrefetchScalarGridSpec(
        num_scalar_prefetch=0,
        grid=(N, nD),
        in_specs=[
            # Whole padded volume stays resident across the D-tile axis.
            pl.BlockSpec((1, Dp, Hp, Wp, cin), lambda n, j: (n, 0, 0, 0, 0)),
            pl.BlockSpec((k, k, k * cin, 4 * hd), lambda n, j: (0, 0, 0, 0)),
            pl.BlockSpec((1, 4 * hd), lambda n, j: (0, 0)),
            pl.BlockSpec((1, tD, H, W, hd), lambda n, j: (n, j, 0, 0, 0)),
        ],
        out_specs=[
            pl.BlockSpec((1, tD, H, W, hd), lambda n, j: (n, j, 0, 0, 0)),
            pl.BlockSpec((1, tD, H, W, hd), lambda n, j: (n, j, 0, 0, 0)),
        ],
        scratch_shapes=[pltpu.VMEM((tD * H * W, 4 * hd), jnp.float32)],
    )

    h_next, c_next = pl.pallas_call(
        _convlstm_kernel,
        out_shape=(
            jax.ShapeDtypeStruct((N, D, H, W, hd), x.dtype),
            jax.ShapeDtypeStruct((N, D, H, W, hd), x.dtype),
        ),
        grid_spec=grid_spec,
        compiler_params=pltpu.CompilerParams(
            dimension_semantics=("parallel", "parallel")),
    )(combined_pad, w_folded, bias2d, c_cur)
    return h_next, c_next


def _reference(x, h_cur, c_cur, weight, bias):
    """Pure-JAX f32 reference matching the PyTorch forward semantics."""
    combined = jnp.concatenate([x, h_cur], axis=-1)
    conv = lax.conv_general_dilated(
        combined, weight, window_strides=(1, 1, 1), padding="SAME",
        dimension_numbers=("NDHWC", "DHWIO", "NDHWC"))
    conv = conv + bias
    cc_i, cc_f, cc_o, cc_g = jnp.split(conv, 4, axis=-1)
    i = jax.nn.sigmoid(cc_i)
    f = jax.nn.sigmoid(cc_f)
    o = jax.nn.sigmoid(cc_o)
    g = jnp.tanh(cc_g)
    c_next = f * c_cur + i * g
    h_next = o * jnp.tanh(c_next)
    return h_next, c_next


if __name__ == "__main__":
    # Small shapes consistent with the module's forward.
    N, D, H, W = 2, 8, 8, 8
    input_dim, hidden_dim, kernel_size = 4, 32, 3
    cin = input_dim + hidden_dim

    key = jax.random.PRNGKey(0)
    kx, kh, kc, kw, kb = jax.random.split(key, 5)

    x = jax.random.normal(kx, (N, D, H, W, input_dim), jnp.float32)
    h0 = jax.random.normal(kh, (N, D, H, W, hidden_dim), jnp.float32)
    c0 = jax.random.normal(kc, (N, D, H, W, hidden_dim), jnp.float32)

    # Deterministic synthetic parameters (Conv3d: 4*hd out-ch, cin in-ch, k^3).
    weight = 0.1 * jax.random.normal(
        kw, (kernel_size, kernel_size, kernel_size, cin, 4 * hidden_dim),
        jnp.float32)
    bias = 0.01 * jax.random.normal(kb, (4 * hidden_dim,), jnp.float32)

    h_next, c_next = convlstm_cell_3d(x, h0, c0, weight, bias, kernel_size)
    jax.block_until_ready((h_next, c_next))

    h_ref, c_ref = _reference(x, h0, c0, weight, bias)
    # bf16 matmul operands (f32 accumulation) -> loosen tolerance accordingly.
    assert jnp.allclose(h_next, h_ref, atol=5e-2, rtol=5e-2), "h_next mismatch"
    assert jnp.allclose(c_next, c_ref, atol=5e-2, rtol=5e-2), "c_next mismatch"

    print("KERNEL_OK")
</pallas_src>

<mosaic_0001>
module attributes {stable_mosaic.version = 11 : i64} {
  func.func @_convlstm_kernel(%arg0: i32, %arg1: i32, %arg2: memref<1x10x10x10x36xbf16, #tpu.memory_space<vmem>>, %arg3: memref<3x3x108x128xbf16, #tpu.memory_space<vmem>>, %arg4: memref<1x128xf32, #tpu.memory_space<vmem>>, %arg5: memref<1x2x8x8x32xf32, #tpu.memory_space<vmem>>, %arg6: memref<1x2x8x8x32xf32, #tpu.memory_space<vmem>>, %arg7: memref<1x2x8x8x32xf32, #tpu.memory_space<vmem>>, %arg8: memref<128x128xf32, #tpu.memory_space<vmem>>) attributes {dimension_semantics = [#tpu.dimension_semantics<parallel>, #tpu.dimension_semantics<parallel>], iteration_bounds = array<i64: 2, 4>, scalar_prefetch = 0 : i64, scratch_operands = 1 : i64, tpu.core_type = #tpu.core_type<tc>, window_params = [{transform_indices = @transform_0, window_bounds = array<i64: 1, 10, 10, 10, 36>}, {pipeline_mode = #tpu.pipeline_mode<synchronous>, transform_indices = @transform_1, window_bounds = array<i64: 3, 3, 108, 128>}, {pipeline_mode = #tpu.pipeline_mode<synchronous>, transform_indices = @transform_2, window_bounds = array<i64: 1, 128>}, {transform_indices = @transform_3, window_bounds = array<i64: 1, 2, 8, 8, 32>}, {transform_indices = @transform_4, window_bounds = array<i64: 1, 2, 8, 8, 32>}, {transform_indices = @transform_5, window_bounds = array<i64: 1, 2, 8, 8, 32>}]} {
    %c2_i32 = arith.constant 2 : i32
    %0 = arith.muli %arg1, %c2_i32 : i32
    %1 = tpu.assume_multiple %0, 2 : i32
    %cst = arith.constant 0.000000e+00 : f32
    %2 = vector.broadcast %cst : f32 to vector<128x128xf32>
    %c0_i32 = arith.constant 0 : i32
    %3 = arith.addi %1, %c0_i32 : i32
    %c0 = arith.constant 0 : index
    %4 = arith.index_cast %3 : i32 to index
    %c0_0 = arith.constant 0 : index
    %c0_1 = arith.constant 0 : index
    %c0_2 = arith.constant 0 : index
    %5 = vector.load %arg2[%c0, %4, %c0_0, %c0_1, %c0_2] : memref<1x10x10x10x36xbf16, #tpu.memory_space<vmem>>, vector<1x2x8x8x36xbf16>
    %6 = vector.shape_cast %5 : vector<1x2x8x8x36xbf16> to vector<2x8x8x36xbf16>
    %c0_i32_3 = arith.constant 0 : i32
    %7 = arith.addi %1, %c0_i32_3 : i32
    %c0_4 = arith.constant 0 : index
    %8 = arith.index_cast %7 : i32 to index
    %c0_5 = arith.constant 0 : index
    %c1 = arith.constant 1 : index
    %c0_6 = arith.constant 0 : index
    %9 = vector.load %arg2[%c0_4, %8, %c0_5, %c1, %c0_6] : memref<1x10x10x10x36xbf16, #tpu.memory_space<vmem>>, vector<1x2x8x8x36xbf16>
    %10 = vector.shape_cast %9 : vector<1x2x8x8x36xbf16> to vector<2x8x8x36xbf16>
    %c0_i32_7 = arith.constant 0 : i32
    %11 = arith.addi %1, %c0_i32_7 : i32
    %c0_8 = arith.constant 0 : index
    %12 = arith.index_cast %11 : i32 to index
    %c0_9 = arith.constant 0 : index
    %c2 = arith.constant 2 : index
    %c0_10 = arith.constant 0 : index
    %13 = vector.load %arg2[%c0_8, %12, %c0_9, %c2, %c0_10] : memref<1x10x10x10x36xbf16, #tpu.memory_space<vmem>>, vector<1x2x8x8x36xbf16>
    %14 = vector.shape_cast %13 : vector<1x2x8x8x36xbf16> to vector<2x8x8x36xbf16>
    %15 = tpu.concatenate %6, %10, %14 in 3 : vector<2x8x8x36xbf16>, vector<2x8x8x36xbf16>, vector<2x8x8x36xbf16> -> vector<2x8x8x108xbf16>
    %16 = vector.shape_cast %15 : vector<2x8x8x108xbf16> to vector<128x108xbf16>
    %c0_11 = arith.constant 0 : index
    %c0_12 = arith.constant 0 : index
    %c0_13 = arith.constant 0 : index
    %c0_14 = arith.constant 0 : index
    %17 = vector.load %arg3[%c0_11, %c0_12, %c0_13, %c0_14] : memref<3x3x108x128xbf16, #tpu.memory_space<vmem>>, vector<1x1x108x128xbf16>
    %18 = vector.shape_cast %17 : vector<1x1x108x128xbf16> to vector<108x128xbf16>
    %cst_15 = arith.constant dense<0.000000e+00> : vector<128x128xf32>
    %19 = tpu.matmul %16, %18, %cst_15 {dimension_numbers = #tpu.dot_dimension_numbers<[1], [0], [0], [1], [0, 0, 1, 1], [], []>} : vector<128x108xbf16>, vector<108x128xbf16>, vector<128x128xf32> -> vector<128x128xf32>
    %20 = arith.addf %2, %19 : vector<128x128xf32>
    %c0_i32_16 = arith.constant 0 : i32
    %21 = arith.addi %1, %c0_i32_16 : i32
    %c0_17 = arith.constant 0 : index
    %22 = arith.index_cast %21 : i32 to index
    %c1_18 = arith.constant 1 : index
    %c0_19 = arith.constant 0 : index
    %c0_20 = arith.constant 0 : index
    %23 = vector.load %arg2[%c0_17, %22, %c1_18, %c0_19, %c0_20] : memref<1x10x10x10x36xbf16, #tpu.memory_space<vmem>>, vector<1x2x8x8x36xbf16>
    %24 = vector.shape_cast %23 : vector<1x2x8x8x36xbf16> to vector<2x8x8x36xbf16>
    %c0_i32_21 = arith.constant 0 : i32
    %25 = arith.addi %1, %c0_i32_21 : i32
    %c0_22 = arith.constant 0 : index
    %26 = arith.index_cast %25 : i32 to index
    %c1_23 = arith.constant 1 : index
    %c1_24 = arith.constant 1 : index
    %c0_25 = arith.constant 0 : index
    %27 = vector.load %arg2[%c0_22, %26, %c1_23, %c1_24, %c0_25] : memref<1x10x10x10x36xbf16, #tpu.memory_space<vmem>>, vector<1x2x8x8x36xbf16>
    %28 = vector.shape_cast %27 : vector<1x2x8x8x36xbf16> to vector<2x8x8x36xbf16>
    %c0_i32_26 = arith.constant 0 : i32
    %29 = arith.addi %1, %c0_i32_26 : i32
    %c0_27 = arith.constant 0 : index
    %30 = arith.index_cast %29 : i32 to index
    %c1_28 = arith.constant 1 : index
    %c2_29 = arith.constant 2 : index
    %c0_30 = arith.constant 0 : index
    %31 = vector.load %arg2[%c0_27, %30, %c1_28, %c2_29, %c0_30] : memref<1x10x10x10x36xbf16, #tpu.memory_space<vmem>>, vector<1x2x8x8x36xbf16>
    %32 = vector.shape_cast %31 : vector<1x2x8x8x36xbf16> to vector<2x8x8x36xbf16>
    %33 = tpu.concatenate %24, %28, %32 in 3 : vector<2x8x8x36xbf16>, vector<2x8x8x36xbf16>, vector<2x8x8x36xbf16> -> vector<2x8x8x108xbf16>
    %34 = vector.shape_cast %33 : vector<2x8x8x108xbf16> to vector<128x108xbf16>
    %c0_31 = arith.constant 0 : index
    %c1_32 = arith.constant 1 : index
    %c0_33 = arith.constant 0 : index
    %c0_34 = arith.constant 0 : index
    %35 = vector.load %arg3[%c0_31, %c1_32, %c0_33, %c0_34] : memref<3x3x108x128xbf16, #tpu.memory_space<vmem>>, vector<1x1x108x128xbf16>
    %36 = vector.shape_cast %35 : vector<1x1x108x128xbf16> to vector<108x128xbf16>
    %cst_35 = arith.constant dense<0.000000e+00> : vector<128x128xf32>
    %37 = tpu.matmul %34, %36, %cst_35 {dimension_numbers = #tpu.dot_dimension_numbers<[1], [0], [0], [1], [0, 0, 1, 1], [], []>} : vector<128x108xbf16>, vector<108x128xbf16>, vector<128x128xf32> -> vector<128x128xf32>
    %38 = arith.addf %20, %37 : vector<128x128xf32>
    %c0_i32_36 = arith.constant 0 : i32
    %39 = arith.addi %1, %c0_i32_36 : i32
    %c0_37 = arith.constant 0 : index
    %40 = arith.index_cast %39 : i32 to index
    %c2_38 = arith.constant 2 : index
    %c0_39 = arith.constant 0 : index
    %c0_40 = arith.constant 0 : index
    %41 = vector.load %arg2[%c0_37, %40, %c2_38, %c0_39, %c0_40] : memref<1x10x10x10x36xbf16, #tpu.memory_space<vmem>>, vector<1x2x8x8x36xbf16>
    %42 = vector.shape_cast %41 : vector<1x2x8x8x36xbf16> to vector<2x8x8x36xbf16>
    %c0_i32_41 = arith.constant 0 : i32
    %43 = arith.addi %1, %c0_i32_41 : i32
    %c0_42 = arith.constant 0 : index
    %44 = arith.index_cast %43 : i32 to index
    %c2_43 = arith.constant 2 : index
    %c1_44 = arith.constant 1 : index
    %c0_45 = arith.constant 0 : index
    %45 = vector.load %arg2[%c0_42, %44, %c2_43, %c1_44, %c0_45] : memref<1x10x10x10x36xbf16, #tpu.memory_space<vmem>>, vector<1x2x8x8x36xbf16>
    %46 = vector.shape_cast %45 : vector<1x2x8x8x36xbf16> to vector<2x8x8x36xbf16>
    %c0_i32_46 = arith.constant 0 : i32
    %47 = arith.addi %1, %c0_i32_46 : i32
    %c0_47 = arith.constant 0 : index
    %48 = arith.index_cast %47 : i32 to index
    %c2_48 = arith.constant 2 : index
    %c2_49 = arith.constant 2 : index
    %c0_50 = arith.constant 0 : index
    %49 = vector.load %arg2[%c0_47, %48, %c2_48, %c2_49, %c0_50] : memref<1x10x10x10x36xbf16, #tpu.memory_space<vmem>>, vector<1x2x8x8x36xbf16>
    %50 = vector.shape_cast %49 : vector<1x2x8x8x36xbf16> to vector<2x8x8x36xbf16>
    %51 = tpu.concatenate %42, %46, %50 in 3 : vector<2x8x8x36xbf16>, vector<2x8x8x36xbf16>, vector<2x8x8x36xbf16> -> vector<2x8x8x108xbf16>
    %52 = vector.shape_cast %51 : vector<2x8x8x108xbf16> to vector<128x108xbf16>
    %c0_51 = arith.constant 0 : index
    %c2_52 = arith.constant 2 : index
    %c0_53 = arith.constant 0 : index
    %c0_54 = arith.constant 0 : index
    %53 = vector.load %arg3[%c0_51, %c2_52, %c0_53, %c0_54] : memref<3x3x108x128xbf16, #tpu.memory_space<vmem>>, vector<1x1x108x128xbf16>
    %54 = vector.shape_cast %53 : vector<1x1x108x128xbf16> to vector<108x128xbf16>
    %cst_55 = arith.constant dense<0.000000e+00> : vector<128x128xf32>
    %55 = tpu.matmul %52, %54, %cst_55 {dimension_numbers = #tpu.dot_dimension_numbers<[1], [0], [0], [1], [0, 0, 1, 1], [], []>} : vector<128x108xbf16>, vector<108x128xbf16>, vector<128x128xf32> -> vector<128x128xf32>
    %56 = arith.addf %38, %55 : vector<128x128xf32>
    %c1_i32 = arith.constant 1 : i32
    %57 = arith.addi %1, %c1_i32 : i32
    %c0_56 = arith.constant 0 : index
    %58 = arith.index_cast %57 : i32 to index
    %c0_57 = arith.constant 0 : index
    %c0_58 = arith.constant 0 : index
    %c0_59 = arith.constant 0 : index
    %59 = vector.load %arg2[%c0_56, %58, %c0_57, %c0_58, %c0_59] : memref<1x10x10x10x36xbf16, #tpu.memory_space<vmem>>, vector<1x2x8x8x36xbf16>
    %60 = vector.shape_cast %59 : vector<1x2x8x8x36xbf16> to vector<2x8x8x36xbf16>
    %c1_i32_60 = arith.constant 1 : i32
    %61 = arith.addi %1, %c1_i32_60 : i32
    %c0_61 = arith.constant 0 : index
    %62 = arith.index_cast %61 : i32 to index
    %c0_62 = arith.constant 0 : index
    %c1_63 = arith.constant 1 : index
    %c0_64 = arith.constant 0 : index
    %63 = vector.load %arg2[%c0_61, %62, %c0_62, %c1_63, %c0_64] : memref<1x10x10x10x36xbf16, #tpu.memory_space<vmem>>, vector<1x2x8x8x36xbf16>
    %64 = vector.shape_cast %63 : vector<1x2x8x8x36xbf16> to vector<2x8x8x36xbf16>
    %c1_i32_65 = arith.constant 1 : i32
    %65 = arith.addi %1, %c1_i32_65 : i32
    %c0_66 = arith.constant 0 : index
    %66 = arith.index_cast %65 : i32 to index
    %c0_67 = arith.constant 0 : index
    %c2_68 = arith.constant 2 : index
    %c0_69 = arith.constant 0 : index
    %67 = vector.load %arg2[%c0_66, %66, %c0_67, %c2_68, %c0_69] : memref<1x10x10x10x36xbf16, #tpu.memory_space<vmem>>, vector<1x2x8x8x36xbf16>
    %68 = vector.shape_cast %67 : vector<1x2x8x8x36xbf16> to vector<2x8x8x36xbf16>
    %69 = tpu.concatenate %60, %64, %68 in 3 : vector<2x8x8x36xbf16>, vector<2x8x8x36xbf16>, vector<2x8x8x36xbf16> -> vector<2x8x8x108xbf16>
    %70 = vector.shape_cast %69 : vector<2x8x8x108xbf16> to vector<128x108xbf16>
    %c1_70 = arith.constant 1 : index
    %c0_71 = arith.constant 0 : index
    %c0_72 = arith.constant 0 : index
    %c0_73 = arith.constant 0 : index
    %71 = vector.load %arg3[%c1_70, %c0_71, %c0_72, %c0_73] : memref<3x3x108x128xbf16, #tpu.memory_space<vmem>>, vector<1x1x108x128xbf16>
    %72 = vector.shape_cast %71 : vector<1x1x108x128xbf16> to vector<108x128xbf16>
    %cst_74 = arith.constant dense<0.000000e+00> : vector<128x128xf32>
    %73 = tpu.matmul %70, %72, %cst_74 {dimension_numbers = #tpu.dot_dimension_numbers<[1], [0], [0], [1], [0, 0, 1, 1], [], []>} : vector<128x108xbf16>, vector<108x128xbf16>, vector<128x128xf32> -> vector<128x128xf32>
    %74 = arith.addf %56, %73 : vector<128x128xf32>
    %c1_i32_75 = arith.constant 1 : i32
    %75 = arith.addi %1, %c1_i32_75 : i32
    %c0_76 = arith.constant 0 : index
    %76 = arith.index_cast %75 : i32 to index
    %c1_77 = arith.constant 1 : index
    %c0_78 = arith.constant 0 : index
    %c0_79 = arith.constant 0 : index
    %77 = vector.load %arg2[%c0_76, %76, %c1_77, %c0_78, %c0_79] : memref<1x10x10x10x36xbf16, #tpu.memory_space<vmem>>, vector<1x2x8x8x36xbf16>
    %78 = vector.shape_cast %77 : vector<1x2x8x8x36xbf16> to vector<2x8x8x36xbf16>
    %c1_i32_80 = arith.constant 1 : i32
    %79 = arith.addi %1, %c1_i32_80 : i32
    %c0_81 = arith.constant 0 : index
    %80 = arith.index_cast %79 : i32 to index
    %c1_82 = arith.constant 1 : index
    %c1_83 = arith.constant 1 : index
    %c0_84 = arith.constant 0 : index
    %81 = vector.load %arg2[%c0_81, %80, %c1_82, %c1_83, %c0_84] : memref<1x10x10x10x36xbf16, #tpu.memory_space<vmem>>, vector<1x2x8x8x36xbf16>
    %82 = vector.shape_cast %81 : vector<1x2x8x8x36xbf16> to vector<2x8x8x36xbf16>
    %c1_i32_85 = arith.constant 1 : i32
    %83 = arith.addi %1, %c1_i32_85 : i32
    %c0_86 = arith.constant 0 : index
    %84 = arith.index_cast %83 : i32 to index
    %c1_87 = arith.constant 1 : index
    %c2_88 = arith.constant 2 : index
    %c0_89 = arith.constant 0 : index
    %85 = vector.load %arg2[%c0_86, %84, %c1_87, %c2_88, %c0_89] : memref<1x10x10x10x36xbf16, #tpu.memory_space<vmem>>, vector<1x2x8x8x36xbf16>
    %86 = vector.shape_cast %85 : vector<1x2x8x8x36xbf16> to vector<2x8x8x36xbf16>
    %87 = tpu.concatenate %78, %82, %86 in 3 : vector<2x8x8x36xbf16>, vector<2x8x8x36xbf16>, vector<2x8x8x36xbf16> -> vector<2x8x8x108xbf16>
    %88 = vector.shape_cast %87 : vector<2x8x8x108xbf16> to vector<128x108xbf16>
    %c1_90 = arith.constant 1 : index
    %c1_91 = arith.constant 1 : index
    %c0_92 = arith.constant 0 : index
    %c0_93 = arith.constant 0 : index
    %89 = vector.load %arg3[%c1_90, %c1_91, %c0_92, %c0_93] : memref<3x3x108x128xbf16, #tpu.memory_space<vmem>>, vector<1x1x108x128xbf16>
    %90 = vector.shape_cast %89 : vector<1x1x108x128xbf16> to vector<108x128xbf16>
    %cst_94 = arith.constant dense<0.000000e+00> : vector<128x128xf32>
    %91 = tpu.matmul %88, %90, %cst_94 {dimension_numbers = #tpu.dot_dimension_numbers<[1], [0], [0], [1], [0, 0, 1, 1], [], []>} : vector<128x108xbf16>, vector<108x128xbf16>, vector<128x128xf32> -> vector<128x128xf32>
    %92 = arith.addf %74, %91 : vector<128x128xf32>
    %c1_i32_95 = arith.constant 1 : i32
    %93 = arith.addi %1, %c1_i32_95 : i32
    %c0_96 = arith.constant 0 : index
    %94 = arith.index_cast %93 : i32 to index
    %c2_97 = arith.constant 2 : index
    %c0_98 = arith.constant 0 : index
    %c0_99 = arith.constant 0 : index
    %95 = vector.load %arg2[%c0_96, %94, %c2_97, %c0_98, %c0_99] : memref<1x10x10x10x36xbf16, #tpu.memory_space<vmem>>, vector<1x2x8x8x36xbf16>
    %96 = vector.shape_cast %95 : vector<1x2x8x8x36xbf16> to vector<2x8x8x36xbf16>
    %c1_i32_100 = arith.constant 1 : i32
    %97 = arith.addi %1, %c1_i32_100 : i32
    %c0_101 = arith.constant 0 : index
    %98 = arith.index_cast %97 : i32 to index
    %c2_102 = arith.constant 2 : index
    %c1_103 = arith.constant 1 : index
    %c0_104 = arith.constant 0 : index
    %99 = vector.load %arg2[%c0_101, %98, %c2_102, %c1_103, %c0_104] : memref<1x10x10x10x36xbf16, #tpu.memory_space<vmem>>, vector<1x2x8x8x36xbf16>
    %100 = vector.shape_cast %99 : vector<1x2x8x8x36xbf16> to vector<2x8x8x36xbf16>
    %c1_i32_105 = arith.constant 1 : i32
    %101 = arith.addi %1, %c1_i32_105 : i32
    %c0_106 = arith.constant 0 : index
    %102 = arith.index_cast %101 : i32 to index
    %c2_107 = arith.constant 2 : index
    %c2_108 = arith.constant 2 : index
    %c0_109 = arith.constant 0 : index
    %103 = vector.load %arg2[%c0_106, %102, %c2_107, %c2_108, %c0_109] : memref<1x10x10x10x36xbf16, #tpu.memory_space<vmem>>, vector<1x2x8x8x36xbf16>
    %104 = vector.shape_cast %103 : vector<1x2x8x8x36xbf16> to vector<2x8x8x36xbf16>
    %105 = tpu.concatenate %96, %100, %104 in 3 : vector<2x8x8x36xbf16>, vector<2x8x8x36xbf16>, vector<2x8x8x36xbf16> -> vector<2x8x8x108xbf16>
    %106 = vector.shape_cast %105 : vector<2x8x8x108xbf16> to vector<128x108xbf16>
    %c1_110 = arith.constant 1 : index
    %c2_111 = arith.constant 2 : index
    %c0_112 = arith.constant 0 : index
    %c0_113 = arith.constant 0 : index
    %107 = vector.load %arg3[%c1_110, %c2_111, %c0_112, %c0_113] : memref<3x3x108x128xbf16, #tpu.memory_space<vmem>>, vector<1x1x108x128xbf16>
    %108 = vector.shape_cast %107 : vector<1x1x108x128xbf16> to vector<108x128xbf16>
    %cst_114 = arith.constant dense<0.000000e+00> : vector<128x128xf32>
    %109 = tpu.matmul %106, %108, %cst_114 {dimension_numbers = #tpu.dot_dimension_numbers<[1], [0], [0], [1], [0, 0, 1, 1], [], []>} : vector<128x108xbf16>, vector<108x128xbf16>, vector<128x128xf32> -> vector<128x128xf32>
    %110 = arith.addf %92, %109 : vector<128x128xf32>
    %c2_i32_115 = arith.constant 2 : i32
    %111 = arith.addi %1, %c2_i32_115 : i32
    %c0_116 = arith.constant 0 : index
    %112 = arith.index_cast %111 : i32 to index
    %c0_117 = arith.constant 0 : index
    %c0_118 = arith.constant 0 : index
    %c0_119 = arith.constant 0 : index
    %113 = vector.load %arg2[%c0_116, %112, %c0_117, %c0_118, %c0_119] : memref<1x10x10x10x36xbf16, #tpu.memory_space<vmem>>, vector<1x2x8x8x36xbf16>
    %114 = vector.shape_cast %113 : vector<1x2x8x8x36xbf16> to vector<2x8x8x36xbf16>
    %c2_i32_120 = arith.constant 2 : i32
    %115 = arith.addi %1, %c2_i32_120 : i32
    %c0_121 = arith.constant 0 : index
    %116 = arith.index_cast %115 : i32 to index
    %c0_122 = arith.constant 0 : index
    %c1_123 = arith.constant 1 : index
    %c0_124 = arith.constant 0 : index
    %117 = vector.load %arg2[%c0_121, %116, %c0_122, %c1_123, %c0_124] : memref<1x10x10x10x36xbf16, #tpu.memory_space<vmem>>, vector<1x2x8x8x36xbf16>
    %118 = vector.shape_cast %117 : vector<1x2x8x8x36xbf16> to vector<2x8x8x36xbf16>
    %c2_i32_125 = arith.constant 2 : i32
    %119 = arith.addi %1, %c2_i32_125 : i32
    %c0_126 = arith.constant 0 : index
    %120 = arith.index_cast %119 : i32 to index
    %c0_127 = arith.constant 0 : index
    %c2_128 = arith.constant 2 : index
    %c0_129 = arith.constant 0 : index
    %121 = vector.load %arg2[%c0_126, %120, %c0_127, %c2_128, %c0_129] : memref<1x10x10x10x36xbf16, #tpu.memory_space<vmem>>, vector<1x2x8x8x36xbf16>
    %122 = vector.shape_cast %121 : vector<1x2x8x8x36xbf16> to vector<2x8x8x36xbf16>
    %123 = tpu.concatenate %114, %118, %122 in 3 : vector<2x8x8x36xbf16>, vector<2x8x8x36xbf16>, vector<2x8x8x36xbf16> -> vector<2x8x8x108xbf16>
    %124 = vector.shape_cast %123 : vector<2x8x8x108xbf16> to vector<128x108xbf16>
    %c2_130 = arith.constant 2 : index
    %c0_131 = arith.constant 0 : index
    %c0_132 = arith.constant 0 : index
    %c0_133 = arith.constant 0 : index
    %125 = vector.load %arg3[%c2_130, %c0_131, %c0_132, %c0_133] : memref<3x3x108x128xbf16, #tpu.memory_space<vmem>>, vector<1x1x108x128xbf16>
    %126 = vector.shape_cast %125 : vector<1x1x108x128xbf16> to vector<108x128xbf16>
    %cst_134 = arith.constant dense<0.000000e+00> : vector<128x128xf32>
    %127 = tpu.matmul %124, %126, %cst_134 {dimension_numbers = #tpu.dot_dimension_numbers<[1], [0], [0], [1], [0, 0, 1, 1], [], []>} : vector<128x108xbf16>, vector<108x128xbf16>, vector<128x128xf32> -> vector<128x128xf32>
    %128 = arith.addf %110, %127 : vector<128x128xf32>
    %c2_i32_135 = arith.constant 2 : i32
    %129 = arith.addi %1, %c2_i32_135 : i32
    %c0_136 = arith.constant 0 : index
    %130 = arith.index_cast %129 : i32 to index
    %c1_137 = arith.constant 1 : index
    %c0_138 = arith.constant 0 : index
    %c0_139 = arith.constant 0 : index
    %131 = vector.load %arg2[%c0_136, %130, %c1_137, %c0_138, %c0_139] : memref<1x10x10x10x36xbf16, #tpu.memory_space<vmem>>, vector<1x2x8x8x36xbf16>
    %132 = vector.shape_cast %131 : vector<1x2x8x8x36xbf16> to vector<2x8x8x36xbf16>
    %c2_i32_140 = arith.constant 2 : i32
    %133 = arith.addi %1, %c2_i32_140 : i32
    %c0_141 = arith.constant 0 : index
    %134 = arith.index_cast %133 : i32 to index
    %c1_142 = arith.constant 1 : index
    %c1_143 = arith.constant 1 : index
    %c0_144 = arith.constant 0 : index
    %135 = vector.load %arg2[%c0_141, %134, %c1_142, %c1_143, %c0_144] : memref<1x10x10x10x36xbf16, #tpu.memory_space<vmem>>, vector<1x2x8x8x36xbf16>
    %136 = vector.shape_cast %135 : vector<1x2x8x8x36xbf16> to vector<2x8x8x36xbf16>
    %c2_i32_145 = arith.constant 2 : i32
    %137 = arith.addi %1, %c2_i32_145 : i32
    %c0_146 = arith.constant 0 : index
    %138 = arith.index_cast %137 : i32 to index
    %c1_147 = arith.constant 1 : index
    %c2_148 = arith.constant 2 : index
    %c0_149 = arith.constant 0 : index
    %139 = vector.load %arg2[%c0_146, %138, %c1_147, %c2_148, %c0_149] : memref<1x10x10x10x36xbf16, #tpu.memory_space<vmem>>, vector<1x2x8x8x36xbf16>
    %140 = vector.shape_cast %139 : vector<1x2x8x8x36xbf16> to vector<2x8x8x36xbf16>
    %141 = tpu.concatenate %132, %136, %140 in 3 : vector<2x8x8x36xbf16>, vector<2x8x8x36xbf16>, vector<2x8x8x36xbf16> -> vector<2x8x8x108xbf16>
    %142 = vector.shape_cast %141 : vector<2x8x8x108xbf16> to vector<128x108xbf16>
    %c2_150 = arith.constant 2 : index
    %c1_151 = arith.constant 1 : index
    %c0_152 = arith.constant 0 : index
    %c0_153 = arith.constant 0 : index
    %143 = vector.load %arg3[%c2_150, %c1_151, %c0_152, %c0_153] : memref<3x3x108x128xbf16, #tpu.memory_space<vmem>>, vector<1x1x108x128xbf16>
    %144 = vector.shape_cast %143 : vector<1x1x108x128xbf16> to vector<108x128xbf16>
    %cst_154 = arith.constant dense<0.000000e+00> : vector<128x128xf32>
    %145 = tpu.matmul %142, %144, %cst_154 {dimension_numbers = #tpu.dot_dimension_numbers<[1], [0], [0], [1], [0, 0, 1, 1], [], []>} : vector<128x108xbf16>, vector<108x128xbf16>, vector<128x128xf32> -> vector<128x128xf32>
    %146 = arith.addf %128, %145 : vector<128x128xf32>
    %c2_i32_155 = arith.constant 2 : i32
    %147 = arith.addi %1, %c2_i32_155 : i32
    %c0_156 = arith.constant 0 : index
    %148 = arith.index_cast %147 : i32 to index
    %c2_157 = arith.constant 2 : index
    %c0_158 = arith.constant 0 : index
    %c0_159 = arith.constant 0 : index
    %149 = vector.load %arg2[%c0_156, %148, %c2_157, %c0_158, %c0_159] : memref<1x10x10x10x36xbf16, #tpu.memory_space<vmem>>, vector<1x2x8x8x36xbf16>
    %150 = vector.shape_cast %149 : vector<1x2x8x8x36xbf16> to vector<2x8x8x36xbf16>
    %c2_i32_160 = arith.constant 2 : i32
    %151 = arith.addi %1, %c2_i32_160 : i32
    %c0_161 = arith.constant 0 : index
    %152 = arith.index_cast %151 : i32 to index
    %c2_162 = arith.constant 2 : index
    %c1_163 = arith.constant 1 : index
    %c0_164 = arith.constant 0 : index
    %153 = vector.load %arg2[%c0_161, %152, %c2_162, %c1_163, %c0_164] : memref<1x10x10x10x36xbf16, #tpu.memory_space<vmem>>, vector<1x2x8x8x36xbf16>
    %154 = vector.shape_cast %153 : vector<1x2x8x8x36xbf16> to vector<2x8x8x36xbf16>
    %c2_i32_165 = arith.constant 2 : i32
    %155 = arith.addi %1, %c2_i32_165 : i32
    %c0_166 = arith.constant 0 : index
    %156 = arith.index_cast %155 : i32 to index
    %c2_167 = arith.constant 2 : index
    %c2_168 = arith.constant 2 : index
    %c0_169 = arith.constant 0 : index
    %157 = vector.load %arg2[%c0_166, %156, %c2_167, %c2_168, %c0_169] : memref<1x10x10x10x36xbf16, #tpu.memory_space<vmem>>, vector<1x2x8x8x36xbf16>
    %158 = vector.shape_cast %157 : vector<1x2x8x8x36xbf16> to vector<2x8x8x36xbf16>
    %159 = tpu.concatenate %150, %154, %158 in 3 : vector<2x8x8x36xbf16>, vector<2x8x8x36xbf16>, vector<2x8x8x36xbf16> -> vector<2x8x8x108xbf16>
    %160 = vector.shape_cast %159 : vector<2x8x8x108xbf16> to vector<128x108xbf16>
    %c2_170 = arith.constant 2 : index
    %c2_171 = arith.constant 2 : index
    %c0_172 = arith.constant 0 : index
    %c0_173 = arith.constant 0 : index
    %161 = vector.load %arg3[%c2_170, %c2_171, %c0_172, %c0_173] : memref<3x3x108x128xbf16, #tpu.memory_space<vmem>>, vector<1x1x108x128xbf16>
    %162 = vector.shape_cast %161 : vector<1x1x108x128xbf16> to vector<108x128xbf16>
    %cst_174 = arith.constant dense<0.000000e+00> : vector<128x128xf32>
    %163 = tpu.matmul %160, %162, %cst_174 {dimension_numbers = #tpu.dot_dimension_numbers<[1], [0], [0], [1], [0, 0, 1, 1], [], []>} : vector<128x108xbf16>, vector<108x128xbf16>, vector<128x128xf32> -> vector<128x128xf32>
    %164 = arith.addf %146, %163 : vector<128x128xf32>
    %c0_175 = arith.constant 0 : index
    %c0_176 = arith.constant 0 : index
    %165 = vector.load %arg4[%c0_175, %c0_176] : memref<1x128xf32, #tpu.memory_space<vmem>>, vector<1x128xf32>
    %166 = vector.broadcast %165 : vector<1x128xf32> to vector<128x128xf32>
    %167 = arith.addf %164, %166 : vector<128x128xf32>
    %c0_177 = arith.constant 0 : index
    %c0_178 = arith.constant 0 : index
    %168 = vector.load %arg8[%c0_177, %c0_178] : memref<128x128xf32, #tpu.memory_space<vmem>>, vector<128x128xf32>
    tpu.vector_store %arg8[%c0_177, %c0_178], %167 {strides = array<i32>} : memref<128x128xf32, #tpu.memory_space<vmem>>, vector<128x128xf32>,
    %c0_179 = arith.constant 0 : index
    %c0_180 = arith.constant 0 : index
    %169 = vector.load %arg8[%c0_179, %c0_180] : memref<128x128xf32, #tpu.memory_space<vmem>>, vector<128x32xf32>
    %170 = arith.negf %169 : vector<128x32xf32>
    %171 = math.exp %170 : vector<128x32xf32>
    %cst_181 = arith.constant 1.000000e+00 : f32
    %172 = vector.broadcast %cst_181 : f32 to vector<128x32xf32>
    %173 = arith.addf %172, %171 : vector<128x32xf32>
    %174 = arith.divf %172, %173 : vector<128x32xf32>
    %c0_182 = arith.constant 0 : index
    %c32 = arith.constant 32 : index
    %175 = vector.load %arg8[%c0_182, %c32] : memref<128x128xf32, #tpu.memory_space<vmem>>, vector<128x32xf32>
    %176 = arith.negf %175 : vector<128x32xf32>
    %177 = math.exp %176 : vector<128x32xf32>
    %cst_183 = arith.constant 1.000000e+00 : f32
    %178 = vector.broadcast %cst_183 : f32 to vector<128x32xf32>
    %179 = arith.addf %178, %177 : vector<128x32xf32>
    %180 = arith.divf %178, %179 : vector<128x32xf32>
    %c0_184 = arith.constant 0 : index
    %c64 = arith.constant 64 : index
    %181 = vector.load %arg8[%c0_184, %c64] : memref<128x128xf32, #tpu.memory_space<vmem>>, vector<128x32xf32>
    %182 = arith.negf %181 : vector<128x32xf32>
    %183 = math.exp %182 : vector<128x32xf32>
    %cst_185 = arith.constant 1.000000e+00 : f32
    %184 = vector.broadcast %cst_185 : f32 to vector<128x32xf32>
    %185 = arith.addf %184, %183 : vector<128x32xf32>
    %186 = arith.divf %184, %185 : vector<128x32xf32>
    %c0_186 = arith.constant 0 : index
    %c96 = arith.constant 96 : index
    %187 = vector.load %arg8[%c0_186, %c96] : memref<128x128xf32, #tpu.memory_space<vmem>>, vector<128x32xf32>
    %188 = math.tanh %187 : vector<128x32xf32>
    %c0_187 = arith.constant 0 : index
    %c0_188 = arith.constant 0 : index
    %c0_189 = arith.constant 0 : index
    %c0_190 = arith.constant 0 : index
    %c0_191 = arith.constant 0 : index
    %189 = vector.load %arg5[%c0_187, %c0_188, %c0_189, %c0_190, %c0_191] : memref<1x2x8x8x32xf32, #tpu.memory_space<vmem>>, vector<1x2x8x8x32xf32>
    %190 = vector.shape_cast %189 : vector<1x2x8x8x32xf32> to vector<2x8x8x32xf32>
    %191 = vector.shape_cast %190 : vector<2x8x8x32xf32> to vector<128x32xf32>
    %192 = arith.mulf %180, %191 : vector<128x32xf32>
    %193 = arith.mulf %174, %188 : vector<128x32xf32>
    %194 = arith.addf %192, %193 : vector<128x32xf32>
    %195 = math.tanh %194 : vector<128x32xf32>
    %196 = arith.mulf %186, %195 : vector<128x32xf32>
    %197 = vector.shape_cast %196 : vector<128x32xf32> to vector<2x8x8x32xf32>
    %c0_192 = arith.constant 0 : index
    %c0_193 = arith.constant 0 : index
    %c0_194 = arith.constant 0 : index
    %c0_195 = arith.constant 0 : index
    %c0_196 = arith.constant 0 : index
    %198 = vector.load %arg6[%c0_192, %c0_193, %c0_194, %c0_195, %c0_196] : memref<1x2x8x8x32xf32, #tpu.memory_space<vmem>>, vector<1x2x8x8x32xf32>
    %199 = vector.shape_cast %198 : vector<1x2x8x8x32xf32> to vector<2x8x8x32xf32>
    %200 = vector.shape_cast %197 : vector<2x8x8x32xf32> to vector<1x2x8x8x32xf32>
    tpu.vector_store %arg6[%c0_192, %c0_193, %c0_194, %c0_195, %c0_196], %200 {strides = array<i32>} : memref<1x2x8x8x32xf32, #tpu.memory_space<vmem>>, vector<1x2x8x8x32xf32>,
    %201 = vector.shape_cast %194 : vector<128x32xf32> to vector<2x8x8x32xf32>
    %c0_197 = arith.constant 0 : index
    %c0_198 = arith.constant 0 : index
    %c0_199 = arith.constant 0 : index
    %c0_200 = arith.constant 0 : index
    %c0_201 = arith.constant 0 : index
    %202 = vector.load %arg7[%c0_197, %c0_198, %c0_199, %c0_200, %c0_201] : memref<1x2x8x8x32xf32, #tpu.memory_space<vmem>>, vector<1x2x8x8x32xf32>
    %203 = vector.shape_cast %202 : vector<1x2x8x8x32xf32> to vector<2x8x8x32xf32>
    %204 = vector.shape_cast %201 : vector<2x8x8x32xf32> to vector<1x2x8x8x32xf32>
    tpu.vector_store %arg7[%c0_197, %c0_198, %c0_199, %c0_200, %c0_201], %204 {strides = array<i32>} : memref<1x2x8x8x32xf32, #tpu.memory_space<vmem>>, vector<1x2x8x8x32xf32>,
    return
  }
  func.func @transform_0(%arg0: i32, %arg1: i32) -> (i32, i32, i32, i32, i32) {
    %c0_i32 = arith.constant 0 : i32
    %c0_i32_0 = arith.constant 0 : i32
    %c0_i32_1 = arith.constant 0 : i32
    %c0_i32_2 = arith.constant 0 : i32
    %c0_i32_3 = arith.constant 0 : i32
    return %arg0, %c0_i32, %c0_i32_0, %c0_i32_1, %c0_i32_2 : i32, i32, i32, i32, i32
  }
  func.func @transform_1(%arg0: i32, %arg1: i32) -> (i32, i32, i32, i32) {
    %c0_i32 = arith.constant 0 : i32
    %c0_i32_0 = arith.constant 0 : i32
    %c0_i32_1 = arith.constant 0 : i32
    %c0_i32_2 = arith.constant 0 : i32
    %c0_i32_3 = arith.constant 0 : i32
    return %c0_i32, %c0_i32_0, %c0_i32_1, %c0_i32_2 : i32, i32, i32, i32
  }
  func.func @transform_2(%arg0: i32, %arg1: i32) -> (i32, i32) {
    %c0_i32 = arith.constant 0 : i32
    %c0_i32_0 = arith.constant 0 : i32
    %c0_i32_1 = arith.constant 0 : i32
    return %c0_i32, %c0_i32_0 : i32, i32
  }
  func.func @transform_3(%arg0: i32, %arg1: i32) -> (i32, i32, i32, i32, i32) {
    %c0_i32 = arith.constant 0 : i32
    %c0_i32_0 = arith.constant 0 : i32
    %c0_i32_1 = arith.constant 0 : i32
    %c0_i32_2 = arith.constant 0 : i32
    return %arg0, %arg1, %c0_i32, %c0_i32_0, %c0_i32_1 : i32, i32, i32, i32, i32
  }
  func.func @transform_4(%arg0: i32, %arg1: i32) -> (i32, i32, i32, i32, i32) {
    %c0_i32 = arith.constant 0 : i32
    %c0_i32_0 = arith.constant 0 : i32
    %c0_i32_1 = arith.constant 0 : i32
    %c0_i32_2 = arith.constant 0 : i32
    return %arg0, %arg1, %c0_i32, %c0_i32_0, %c0_i32_1 : i32, i32, i32, i32, i32
  }
  func.func @transform_5(%arg0: i32, %arg1: i32) -> (i32, i32, i32, i32, i32) {
    %c0_i32 = arith.constant 0 : i32
    %c0_i32_0 = arith.constant 0 : i32
    %c0_i32_1 = arith.constant 0 : i32
    %c0_i32_2 = arith.constant 0 : i32
    return %arg0, %arg1, %c0_i32, %c0_i32_0, %c0_i32_1 : i32, i32, i32, i32, i32
  }
}

</mosaic_0001>

<bundles_post_ra>
// kernel: tpu_custom_call.1
= control target key start
LH: loop header
LB: loop body
LE: loop exit
PB: predicated region body
PF: predicated region fallthrough
CT: control target
= control target key end

     0   :  { %s12899_s0 = inlined_call_operand.vmem [shape: bf16[2,10,10,10,36], index: 0, kind: input, shape index: {}]   ;;  %s12900_s1 = inlined_call_operand.vmem [shape: bf16[3,3,108,128], index: 1, kind: input, shape index: {}]   ;;  %s12901_s2 = inlined_call_operand.vmem [shape: f32[1,128], index: 2, kind: input, shape index: {}]   ;;  %s12902_s3 = inlined_call_operand.vmem [shape: f32[2,8,8,8,32], index: 3, kind: input, shape index: {}]   ;;  %s12903_s4 = inlined_call_operand.hbm [shape: f32[2,8,8,8,32], index: 4, kind: output, shape index: {0}]   ;;  %s12904_s5 = inlined_call_operand.hbm [shape: f32[2,8,8,8,32], index: 5, kind: output, shape index: {1}]  }
   0x1   :  { %12906 = sst [smem:[#allocation23_spill]] %s12899_s0 }
   0x2   :  { %11 = vsyncpa [#allocation4], 0 }
   0x3   :  { %13 = vsyncpa [#allocation4 + $0x1], 0 }
   0x4   :  { %14 = vsyncpa [#allocation6], 0 }
   0x5   :  { %16 = vsyncpa [#allocation6 + $0x1], 0  ;;  %s9807_s18 = smov 0   ;;  %s9809_s19 = smov 0  }
   0x6   :  { %s9811_s20 = smov 0   ;;  %s9813_s21 = smov 0  }
   0x7   :  { %s9815_s22 = smov 0   ;;  %s9817_s23 = smov 0  }
   0x8   :  { %s9819_s24 = smov 0   ;;  %s9821_s25 = smov 0  }
   0x9 LB: > { %s7340_s26 = sadd.s32 4294967295, %s9766_s25   ;;  %s7341_s27 = sadd.s32 4294967294, %s9766_s25   ;;  %s9766_s25 = sphi %s9821_s25, %s22_s25   ;;  %s9762_s24 = sphi %s9819_s24, %s12946_s24   ;;  %s9758_s23 = sphi %s9817_s23, %s12945_s23   ;;  %s9754_s22 = sphi %s9815_s22, %s12944_s22   ;;  %s9750_s21 = sphi %s9813_s21, %s12943_s21   ;;  %s9746_s20 = sphi %s9811_s20, %s12942_s20   ;;  %s9742_s19 = sphi %s9809_s19, %s12941_s19   ;;  %s9738_s18 = sphi %s9807_s18, %s12940_s18  }
   0xa   : > { %s31_s28 = sadd.s32 1, %s9758_s23  ;;  %s34_s29 = sadd.s32 1, %s9762_s24 }
   0xb   : > { %p32_p0 = scmp.ge.s32.totalorder %s31_s28, 4  ;;  %p149_p1 = scmp.ne.s32.totalorder %s9746_s20, %s9742_s19 }
   0xc   : > { %p150_p2 = scmp.eq.s32.totalorder %s7340_s26, 7  ;;  %p155_p5 = scmp.ne.s32.totalorder %s9742_s19, %s9738_s18 }
   0xd   : > { %s12948_s28 = smov (%p32_p0, %s31_s28), 0  ;;  %s12950_s29 = smov (!%p32_p0, %s34_s29), %s9762_s24 }
   0xe   : > { %s135_s30 = ssub.s32 %s9758_s23, %s12948_s28  ;;  %p9858_p3 = por %p150_p2, %p149_p1 }
   0xf   : > { %p36_p4 = scmp.ge.s32.totalorder %s12950_s29, 2  ;;  %p156_p6 = scmp.eq.s32.totalorder %s7341_s27, 7 }
  0x10   : > { %p7344_p7 = scmp.ge.s32.totalorder %s9766_s25, 1  ;;  %p230_p9 = scmp.lt.s32.totalorder %s9766_s25, 9 }
  0x11   : > { %s12952_s29 = smov (%p36_p4, %s12950_s29), 0  ;;  %p9867_p8 = por %p156_p6, %p155_p5 }
  0x12   : > { %s134_s8 = ssub.s32 %s9762_s24, %s12952_s29  ;;  %s139_s9 = sadd.s32 1, %s9746_s20 }
  0x13   : > { %s136_s10 = sor.u32 %s135_s30, %s134_s8  ;;  %p231_p10 = pnand %p7344_p7, %p230_p9 }
  0x14   : > { %p137_p11 = scmp.eq.s32.totalorder %s136_s10, 0 }
  0x15   : > { %234 = sbr.rel (%p231_p10) target bundleno = 1517 (0x5ed), region = 36 }
  0x16   : > { %s9876_s11 = scalar_select %p137_p11, %s9746_s20, %s139_s9  }
  0x1c   : > { %p273_p12 = scmp.lt.s32.totalorder %s9754_s22, 1  ;;  %s8393_s12 = smul.u32 160, %s9750_s21  ;;  %vm1332_vm0 = vcmask 1045504   ;;  %vm664_vm1 = vcmask 293888   ;;  %vm713_vm2 = vcmask 588800   ;;  %vm1307_vm3 = vcmask 883712  }
  0x1d   : > { %s12909_s0 = sld [smem:[#allocation23_spill]]  ;;  %s9768_s27 = smov 36   ;;  %vm7032_vm4 = vcmask 261120  }
  0x1e   : > { %s9881_s13 = scalar_select %p273_p12, %s9754_s22, 1 }
  0x1f   : > { %s9769_s30 = smov 72   ;;  %s7348_s16 = sshll.u32 %s9750_s21, 1 }
  0x20   : > { %s8953_s14 = smul.u32 800, %s9881_s13  ;;  %p281_p13 = scmp.lt.s32.totalorder %s7348_s16, 7 }
  0x21   : > { %s7350_s8 = sshll.u32 %s9881_s13, 6  ;;  %s9771_s15 = smov 96  }
  0x22   : > { %s12954_s16 = smov (!%p281_p13, %s7348_s16), 7 }
  0x23   : > { %s277_s17 = scalar_lea.vmem %s12909_s0, %s8953_s14 }
  0x24   : > { %s9887_s26 = scalar_lea.vmem %s277_s17, %s8393_s12  ;;  %s7349_s17 = sshll.u32 %s12954_s16, 3 }
  0x25   : > { %v298_v0 = vld [vmem:[%s9887_s26 + $0x10] sm:$0xf]  ;;  %v9891_v1 = vld [vmem:[%s9887_s26 + $0x14] sm:$0x1]  ;;  %v296_v2 = vld [vmem:[%s9887_s26] sm:$0xf]  ;;  %s285_s9 = sadd.s32 %s7350_s8, %s7349_s17 }
  0x26   : > { %v7357_v3 = vcombine.low %v298_v0, %v9891_v1  ;;  %v9896_v4 = vld [vmem:[%s9887_s26 + $0x4] sm:$0x1]  ;;  %v299_v5 = vld [vmem:[%s9887_s26 + $0x18] sm:$0xf]  ;;  %v9900_v6 = vld [vmem:[%s9887_s26 + $0x1c] sm:$0x1] }
  0x27   : > { %v7355_v7 = vcombine.low %v296_v2, %v9896_v4  ;;  %v7358_v8 = vcombine.low %v299_v5, %v9900_v6  ;;  %v297_v9 = vld [vmem:[%s9887_s26 + $0x8] sm:$0xf]  ;;  %v9906_v10 = vld [vmem:[%s9887_s26 + $0xc] sm:$0x1]  ;;  %v300_v16 = vld [vmem:[%s9887_s26 + $0x20] sm:$0xf] }
  0x28   : > { %v301_v11 = vld [vmem:[%s9887_s26 + $0x28] sm:$0xf]  ;;  %v439_v12 = vshrl.u32 %v7357_v3, 16  ;;  %v441_v13 = vshll.u32 %v7357_v3, 16  ;;  %v7356_v14 = vcombine.low %v297_v9, %v9906_v10  ;;  %v9911_v15 = vld [vmem:[%s9887_s26 + $0x2c] sm:$0x1] }
  0x29   : > { %v425_v17 = vshrl.u32 %v7355_v7, 16  ;;  %v427_v18 = vshll.u32 %v7355_v7, 16  ;;  %v446_v19 = vshrl.u32 %v7358_v8, 16  ;;  %v448_v20 = vshll.u32 %v7358_v8, 16  ;;  %v9915_v21 = vld [vmem:[%s9887_s26 + $0x24] sm:$0x1] }
  0x2a   : > { %v443_v22 = vrot.slane %v441_v13, 1  ;;  %v432_v23 = vshrl.u32 %v7356_v14, 16  ;;  %v434_v24 = vshll.u32 %v7356_v14, 16  ;;  %v7360_v25 = vcombine.low %v301_v11, %v9911_v15  ;;  %v303_v26 = vld [vmem:[%s9887_s26 + $0x38] sm:$0xf]  ;;  %s7351_s10 = sshll.u32 %s285_s9, 3 }
  0x2b   : > { %v429_v27 = vrot.slane %v427_v18, 1  ;;  %v450_v28 = vrot.slane %v448_v20, 1  ;;  %v7359_v29 = vcombine.low %v300_v16, %v9915_v21  ;;  %v9921_v30 = vld [vmem:[%s9887_s26 + $0x3c] sm:$0x1]  ;;  %v302_v31 = vld [vmem:[%s9887_s26 + $0x30] sm:$0xf]  ;;  %s12477_s14 = scalar_lea.vmem %s12902_s3, %s7351_s10 }
  0x2c   : > { %v444_v32 = vor.u32 %v443_v22, %v439_v12  ;;  %v436_v33 = vrot.slane %v434_v24, 1  ;;  %v462_v34 = vshll.u32 %v7360_v25, 16  ;;  %v9925_v35 = vld [vmem:[%s9887_s26 + $0x34] sm:$0x1]  ;;  %v460_v38 = vshrl.u32 %v7360_v25, 16  ;;  %s9772_s16 = smov 64  }
  0x2d   : > { %v430_v36 = vor.u32 %v429_v27, %v425_v17  ;;  %v451_v37 = vor.u32 %v450_v28, %v446_v19  ;;  %v455_v39 = vshll.u32 %v7359_v29, 16  ;;  %v305_v40 = vld [vmem:[%s9887_s26 + $0x58] sm:$0xf]  ;;  %v9929_v41 = vld [vmem:[%s9887_s26 + $0x5c] sm:$0x1]  ;;  %v453_v43 = vshrl.u32 %v7359_v29, 16 }
  0x2e   : > { %540 = vrot.lane.b32.xlu1 %v444_v32, %s9768_s27  ;;  %v464_v42 = vrot.slane %v462_v34, 1  ;;  %v7362_v44 = vcombine.low %v303_v26, %v9921_v30  ;;  %v7361_v45 = vcombine.low %v302_v31, %v9925_v35  ;;  %v304_v46 = vld [vmem:[%s9887_s26 + $0x50] sm:$0xf]  ;;  %v9936_v47 = vld [vmem:[%s9887_s26 + $0x54] sm:$0x1]  ;;  %v437_v48 = vor.u32 %v436_v33, %v432_v23  ;;  %s8394_s8 = sshll.u32 %s9750_s21, 4 }
  0x2f   : > { %536 = vrot.lane.b32.xlu0 %v430_v36, %s9768_s27  ;;  %v457_v49 = vrot.slane %v455_v39, 1  ;;  %v7364_v50 = vcombine.low %v305_v40, %v9929_v41  ;;  %v7363_v51 = vcombine.low %v304_v46, %v9936_v47  ;;  %v307_v52 = vld [vmem:[%s9887_s26 + $0x68] sm:$0xf]  ;;  %v9943_v53 = vld [vmem:[%s9887_s26 + $0x6c] sm:$0x1]  ;;  %s8385_s9 = sshll.u32 %s9754_s22, 6 }
  0x30   : > { %v476_v54 = vshll.u32 %v7362_v44, 16  ;;  %v306_v55 = vld [vmem:[%s9887_s26 + $0x60] sm:$0xf]  ;;  %v465_v56 = vor.u32 %v464_v42, %v460_v38  ;;  %v469_v57 = vshll.u32 %v7361_v45, 16  ;;  %v9947_v59 = vld [vmem:[%s9887_s26 + $0x64] sm:$0x1]  ;;  %v7366_v63 = vcombine.low %v307_v52, %v9943_v53  ;;  %s12780_s10 = sadd.s32 %s8394_s8, %s8385_s9 }
  0x31   : > { %v490_v58 = vshll.u32 %v7364_v50, 16  ;;  %v474_v60 = vshrl.u32 %v7362_v44, 16  ;;  %v467_v62 = vshrl.u32 %v7361_v45, 16  ;;  %v458_v0 = vor.u32 %v457_v49, %v453_v43  ;;  %v309_v7 = vld [vmem:[%s9887_s26 + $0x78] sm:$0xf]  ;;  %s12905_s21 = sshll.u32 %s12780_s10, 7 }
  0x32   : > { %542 = vrot.lane.b32.xlu1 %v451_v37, %s9768_s27  ;;  %v478_v61 = vrot.slane %v476_v54, 1  ;;  %v471_v2 = vrot.slane %v469_v57, 1  ;;  %v483_v3 = vshll.u32 %v7363_v51, 16  ;;  %v7365_v5 = vcombine.low %v306_v55, %v9947_v59  ;;  %v9955_v8 = vld [vmem:[%s9887_s26 + $0x7c] sm:$0x1]  ;;  %s9773_s8 = smov [#allocation3]  }
  0x33   : > { %538 = vrot.lane.b32.xlu0 %v437_v48, %s9768_s27  ;;  %v308_v9 = vld [vmem:[%s9887_s26 + $0x70] sm:$0xf]  ;;  %v9959_v11 = vld [vmem:[%s9887_s26 + $0x74] sm:$0x1]  ;;  %v488_v12 = vshrl.u32 %v7364_v50, 16  ;;  %v492_v13 = vrot.slane %v490_v58, 1  ;;  %v7368_v18 = vcombine.low %v309_v7, %v9955_v8 }
  0x34   : > { %v479_v14 = vor.u32 %v478_v61, %v474_v60  ;;  %v481_v16 = vshrl.u32 %v7363_v51, 16  ;;  %v504_v17 = vshll.u32 %v7366_v63, 16  ;;  %v472_v19 = vor.u32 %v471_v2, %v467_v62  ;;  %v311_v24 = vld [vmem:[%s9887_s26 + $0x88] sm:$0xf]  ;;  %v9967_v25 = vld [vmem:[%s9887_s26 + $0x8c] sm:$0x1] }
  0x35   : > { %v485_v20 = vrot.slane %v483_v3, 1  ;;  %v497_v22 = vshll.u32 %v7365_v5, 16  ;;  %v7367_v23 = vcombine.low %v308_v9, %v9959_v11  ;;  %v310_v26 = vld [vmem:[%s9887_s26 + $0x80] sm:$0xf]  ;;  %v9971_v27 = vld [vmem:[%s9887_s26 + $0x84] sm:$0x1]  ;;  %v493_v28 = vor.u32 %v492_v13, %v488_v12 }
  0x36   : > { %546 = vrot.lane.b32.xlu1 %v465_v56, %s9768_s27  ;;  %v502_v29 = vshrl.u32 %v7366_v63, 16  ;;  %v506_v31 = vrot.slane %v504_v17, 1  ;;  %v495_v32 = vshrl.u32 %v7365_v5, 16  ;;  %v518_v33 = vshll.u32 %v7368_v18, 16  ;;  %v329_v57 = vld [vmem:[%s9887_s26 + $0x8] sm:$0xe] }
  0x37   : > { %544 = vrot.lane.b32.xlu0 %v458_v0, %s9768_s27  ;;  %v7370_v34 = vcombine.low %v311_v24, %v9967_v25  ;;  %v486_v36 = vor.u32 %v485_v20, %v481_v16  ;;  %v499_v37 = vrot.slane %v497_v22, 1  ;;  %v511_v38 = vshll.u32 %v7367_v23, 16  ;;  %v328_v58 = vld [vmem:[%s9887_s26] sm:$0xe]  ;;  %v331_v0 = vld [vmem:[%s9887_s26 + $0x18] sm:$0xe] }
  0x38   : > { %v7369_v39 = vcombine.low %v310_v26, %v9971_v27  ;;  %v507_v40 = vor.u32 %v506_v31, %v502_v29  ;;  %v516_v42 = vshrl.u32 %v7368_v18, 16  ;;  %v520_v43 = vrot.slane %v518_v33, 1  ;;  %v330_v2 = vld [vmem:[%s9887_s26 + $0x10] sm:$0xe]  ;;  %v332_v12 = vld [vmem:[%s9887_s26 + $0x20] sm:$0xe] }
  0x39   : > { %v532_v44 = vshll.u32 %v7370_v34, 16  ;;  %v500_v45 = vor.u32 %v499_v37, %v495_v32  ;;  %v509_v46 = vshrl.u32 %v7367_v23, 16  ;;  %v513_v48 = vrot.slane %v511_v38, 1  ;;  %v335_v16 = vld [vmem:[%s9887_s26 + $0x38] sm:$0xe]  ;;  %s9644_s9 = sshll.u32 %s9773_s8, 4  ;;  %s9645_s9 = int_to_ptr.vmem [resolvable:$false] %s9644_s9 }
  0x3a   : > { %550 = vrot.lane.b32.xlu1 %v479_v14, %s9768_s27  ;;  %v525_v49 = vshll.u32 %v7369_v39, 16  ;;  %v521_v50 = vor.u32 %v520_v43, %v516_v42  ;;  %v530_v51 = vshrl.u32 %v7370_v34, 16  ;;  %v523_v55 = vshrl.u32 %v7369_v39, 16  ;;  %v334_v17 = vld [vmem:[%s9887_s26 + $0x30] sm:$0xe]  ;;  %s9646_s22 = scalar_lea.vmem %s9645_s9, 4096 }
  0x3b   : > { %548 = vrot.lane.b32.xlu0 %v472_v19, %s9768_s27  ;;  %v534_v52 = vrot.slane %v532_v44, 1  ;;  %v514_v54 = vor.u32 %v513_v48, %v509_v46  ;;  %v7372_v61 = vcombine.low %v329_v57, %v9906_v10  ;;  %v7371_v63 = vcombine.low %v328_v58, %v9896_v4  ;;  %v333_v10 = vld [vmem:[%s9887_s26 + $0x28] sm:$0xe]  ;;  %v337_v20 = vld [vmem:[%s9887_s26 + $0x58] sm:$0xe] }
  0x3c   : > { %v527_v56 = vrot.slane %v525_v49, 1  ;;  %v7374_v5 = vcombine.low %v331_v0, %v9900_v6  ;;  %v7373_v9 = vcombine.low %v330_v2, %v9891_v1  ;;  %v7376_v13 = vcombine.low %v333_v10, %v9911_v15  ;;  %v336_v22 = vld [vmem:[%s9887_s26 + $0x50] sm:$0xe]  ;;  %v338_v26 = vld [vmem:[%s9887_s26 + $0x60] sm:$0xe] }
  0x3d   : > { %v535_v60 = vor.u32 %v534_v52, %v530_v51  ;;  %v617_v3 = vrot.slane %v7372_v61, 1  ;;  %v616_v7 = vrot.slane %v7371_v63, 1  ;;  %v7375_v6 = vcombine.low %v332_v12, %v9915_v21  ;;  %v341_v31 = vld [vmem:[%s9887_s26 + $0x78] sm:$0xe]  ;;  %v7389_v33 = vld [vmem:[%s9887_s26 + $0x10] sm:$0xf] }
  0x3e   : > { %554 = vrot.lane.b32.xlu1 %v493_v28, %s9768_s27  ;;  %v528_v62 = vor.u32 %v527_v56, %v523_v55  ;;  %v619_v4 = vrot.slane %v7374_v5, 1  ;;  %v618_v14 = vrot.slane %v7373_v9, 1  ;;  %v621_v1 = vrot.slane %v7376_v13, 1  ;;  %v10020_v34 = vld [vmem:[%s9887_s26 + $0x14] sm:$0x1] }
  0x3f   : > { %552 = vrot.lane.b32.xlu0 %v486_v36, %s9768_s27  ;;  %v7378_v18 = vcombine.low %v335_v16, %v9921_v30  ;;  %v620_v19 = vrot.slane %v7375_v6, 1  ;;  %v7377_v15 = vcombine.low %v334_v17, %v9925_v35  ;;  %v7380_v23 = vcombine.low %v337_v20, %v9929_v41  ;;  %v339_v35 = vld [vmem:[%s9887_s26 + $0x68] sm:$0xe]  ;;  %v10025_v37 = vld [vmem:[%s9887_s26 + $0xc] sm:$0x1] }
  0x40   : > { %v7379_v24 = vcombine.low %v336_v22, %v9936_v47  ;;  %v7382_v29 = vcombine.low %v339_v35, %v9943_v53  ;;  %v7381_v32 = vcombine.low %v338_v26, %v9947_v59  ;;  %v340_v47 = vld [vmem:[%s9887_s26 + $0x70] sm:$0xe]  ;;  %v7388_v36 = vld [vmem:[%s9887_s26 + $0x8] sm:$0xf]  ;;  %v342_v39 = vld [vmem:[%s9887_s26 + $0x80] sm:$0xe]  ;;  %v7437_v42 = vcombine.low %v7389_v33, %v10020_v34 }
  0x41   : > { %v623_v21 = vrot.slane %v7378_v18, 1  ;;  %v622_v30 = vrot.slane %v7377_v15, 1  ;;  %v625_v28 = vrot.slane %v7380_v23, 1  ;;  %v343_v38 = vld [vmem:[%s9887_s26 + $0x88] sm:$0xe]  ;;  %v7436_v46 = vcombine.low %v7388_v36, %v10025_v37 }
  0x42   : > { %558 = vrot.lane.b32.xlu1 %v507_v40, %s9768_s27  ;;  %v624_v41 = vrot.slane %v7379_v24, 1  ;;  %v627_v53 = vrot.slane %v7382_v29, 1  ;;  %v7384_v40 = vcombine.low %v341_v31, %v9955_v8  ;;  %v7391_v59 = vld [vmem:[%s9887_s26 + $0x20] sm:$0xf]  ;;  %v10034_v43 = vld [vmem:[%s9887_s26 + $0x24] sm:$0x1]  ;;  %v7386_v8 = vcombine.low %v343_v38, %v9967_v25 }
  0x43   : > { %556 = vrot.lane.b32.xlu0 %v500_v45, %s9768_s27  ;;  %v626_v44 = vrot.slane %v7381_v32, 1  ;;  %v7383_v45 = vcombine.low %v340_v47, %v9959_v11  ;;  %v7390_v48 = vld [vmem:[%s9887_s26 + $0x18] sm:$0xf]  ;;  %v10041_v49 = vld [vmem:[%s9887_s26 + $0x1c] sm:$0x1]  ;;  %v7439_v51 = vcombine.low %v7391_v59, %v10034_v43  ;;  %v894_v58 = vshll.u32 %v7436_v46, 16 }
  0x44   : > { %v629_v52 = vrot.slane %v7384_v40, 1  ;;  %v7438_v55 = vcombine.low %v7390_v48, %v10041_v49  ;;  %v7393_v11 = vld [vmem:[%s9887_s26 + $0x30] sm:$0xf]  ;;  %v10050_v56 = vld [vmem:[%s9887_s26 + $0x34] sm:$0x1]  ;;  %v899_v0 = vshrl.u32 %v7437_v42, 16 }
  0x45   : > { %v628_v57 = vrot.slane %v7383_v45, 1  ;;  %v7392_v25 = vld [vmem:[%s9887_s26 + $0x28] sm:$0xf]  ;;  %v7441_v63 = vcombine.low %v7393_v11, %v10050_v56  ;;  %v896_v9 = vrot.slane %v894_v58, 1  ;;  %v7395_v10 = vld [vmem:[%s9887_s26 + $0x40] sm:$0xf] }
  0x46   : > { %562 = vrot.lane.b32.xlu1 %v521_v50, %s9768_s27  ;;  %v7385_v50 = vcombine.low %v342_v39, %v9971_v27  ;;  %v10055_v27 = vld [vmem:[%s9887_s26 + $0x2c] sm:$0x1]  ;;  %v10063_v12 = vld [vmem:[%s9887_s26 + $0x44] sm:$0x1]  ;;  %v10067_v13 = vld [vmem:[%s9887_s26 + $0x3c] sm:$0x1] }
  0x47   : > { %560 = vrot.lane.b32.xlu0 %v514_v54, %s9768_s27  ;;  %v901_v54 = vshll.u32 %v7437_v42, 16  ;;  %v7440_v5 = vcombine.low %v7392_v25, %v10055_v27  ;;  %v906_v16 = vshrl.u32 %v7438_v55, 16  ;;  %v929_v17 = vshll.u32 %v7441_v63, 16  ;;  %v7397_v20 = vld [vmem:[%s9887_s26 + $0x60] sm:$0xf]  ;;  %v9137_v11 = vld [vmem:[%s12900_s1 + $0x38] sm:$0xff]  }
  0x48   : > { %v630_v61 = vrot.slane %v7385_v50, 1  ;;  %v7443_v15 = vcombine.low %v7395_v10, %v10063_v12  ;;  %v10075_v23 = vld [vmem:[%s9887_s26 + $0x64] sm:$0x1]  ;;  %v10079_v24 = vld [vmem:[%s9887_s26 + $0x5c] sm:$0x1]  ;;  %v927_v26 = vshrl.u32 %v7441_v63, 16  ;;  %8531 = vmatprep.subr.bf16.mxu1 %v9137_v11 }
  0x49   : > { %v903_v2 = vrot.slane %v901_v54, 1  ;;  %v920_v29 = vshrl.u32 %v7440_v5, 16  ;;  %v7399_v38 = vld [vmem:[%s9887_s26 + $0x70] sm:$0xf]  ;;  %v10087_v39 = vld [vmem:[%s9887_s26 + $0x74] sm:$0x1]  ;;  %8532 = vmatpush3.bf16.msra.mxu1 %v9137_v11 }
  0x4a   : > { %566 = vrot.lane.b32.xlu1 %v535_v60, %s9768_s27  ;;  %v631_v60 = vrot.slane %v7386_v8, 1  ;;  %v943_v31 = vshll.u32 %v7443_v15, 16  ;;  %v10091_v40 = vld [vmem:[%s9887_s26 + $0x6c] sm:$0x1]  ;;  %v941_v59 = vshrl.u32 %v7443_v15, 16  ;;  %v7447_v8 = vcombine.low %v7399_v38, %v10087_v39 }
  0x4b   : > { %564 = vrot.lane.b32.xlu0 %v528_v62, %s9768_s27  ;;  %v915_v62 = vshll.u32 %v7439_v51, 16  ;;  %v7768_v54 = vld [vmem:[%s9887_s26 + $0x58] sm:$0xf]  ;;  %v10106_v58 = vld [vmem:[%s9887_s26 + $0x7c] sm:$0x1] }
  0x4c   : > { %v945_v45 = vrot.slane %v943_v31, 1  ;;  %v971_v63 = vshll.u32 %v7447_v8, 16  ;;  %v7769_v10 = vld [vmem:[%s9887_s26 + $0x60] sm:$0xf] }
  0x4d   : > { %v917_v6 = vrot.slane %v915_v62, 1 }
  0x4e   : > { %634 = vrot.lane.b32.xlu1 %v617_v3, %s9769_s30  ;;  %v908_v3 = vshll.u32 %v7438_v55, 16  ;;  %v10099_v55 = vld [vmem:[%s9887_s26 + $0x5c] sm:$0x1] }
  0x4f   : > { %632 = vrot.lane.b32.xlu0 %v616_v7, %s9769_s30  ;;  %v892_v7 = vshrl.u32 %v7436_v46, 16 }
  0x50   : > { %v910_v18 = vrot.slane %v908_v3, 1 }
  0x51   : > { %v897_v22 = vor.u32 %v896_v9, %v892_v7  ;;  %v9140_v9 = vld [vmem:[%s12900_s1 + $0x40] sm:$0xff]  }
  0x52   : > { %638 = vrot.lane.b32.xlu1 %v619_v4, %s9769_s30  ;;  %v7394_v4 = vld [vmem:[%s9887_s26 + $0x38] sm:$0xf]  ;;  %v911_v33 = vor.u32 %v910_v18, %v906_v16  ;;  %8533 = vmatprep.subr.bf16.mxu1 %v9140_v9 }
  0x53   : > { %636 = vrot.lane.b32.xlu0 %v618_v14, %s9769_s30  ;;  %v913_v14 = vshrl.u32 %v7439_v51, 16  ;;  %8534 = vmatpush3.bf16.msra.mxu1 %v9140_v9  ;;  %v7422_v9 = vld [vmem:[%s9887_s26 + $0x18] sm:$0xe] }
  0x55   : > { %v918_v35 = vor.u32 %v917_v6, %v913_v14  ;;  %v9141_v14 = vld [vmem:[%s12900_s1 + $0xe0] sm:$0xff]   ;;  %v969_v6 = vshrl.u32 %v7447_v8, 16 }
  0x56   : > { %642 = vrot.lane.b32.xlu1 %v621_v1, %s9769_s30  ;;  %v904_v1 = vor.u32 %v903_v2, %v899_v0  ;;  %v7816_v0 = vcombine.low %v7768_v54, %v10099_v55  ;;  %8651 = vmatprep.subr.bf16.mxu0 %v9141_v14  ;;  %v9149_v54 = vld [vmem:[%s12900_s1 + $0xf0] sm:$0xff]  }
  0x57   : > { %640 = vrot.lane.b32.xlu0 %v620_v19, %s9769_s30  ;;  %v922_v19 = vshll.u32 %v7440_v5, 16  ;;  %8652 = vmatpush3.bf16.msra.mxu0 %v9141_v14  ;;  %v7772_v14 = vld [vmem:[%s9887_s26 + $0x78] sm:$0xf] }
  0x58   : > { %v3147_v18 = vshll.u32 %v7816_v0, 16 }
  0x59   : > { %v924_v47 = vrot.slane %v922_v19, 1  ;;  %v7770_v19 = vld [vmem:[%s9887_s26 + $0x68] sm:$0xf] }
  0x5a   : > { %646 = vrot.lane.b32.xlu1 %v623_v21, %s9769_s30  ;;  %v7442_v21 = vcombine.low %v7394_v4, %v10067_v13  ;;  %v10117_v4 = vld [vmem:[%s9887_s26 + $0x64] sm:$0x1]  ;;  %v3149_v31 = vrot.slane %v3147_v18, 1 }
  0x5b   : > { %644 = vrot.lane.b32.xlu0 %v622_v30, %s9769_s30  ;;  %v7396_v30 = vld [vmem:[%s9887_s26 + $0x58] sm:$0xf]  ;;  %v925_v50 = vor.u32 %v924_v47, %v920_v29  ;;  %v3145_v29 = vshrl.u32 %v7816_v0, 16 }
  0x5c   : > { %v7444_v32 = vcombine.low %v7396_v30, %v10079_v24  ;;  %v936_v36 = vshll.u32 %v7442_v21, 16  ;;  %v10127_v30 = vld [vmem:[%s9887_s26 + $0x6c] sm:$0x1]  ;;  %v9153_v0 = vld [vmem:[%s12900_s1 + $0xf8] sm:$0xff]  }
  0x5e   : > { %650 = vrot.lane.b32.xlu1 %v625_v28, %s9769_s30  ;;  %v931_v28 = vrot.slane %v929_v17, 1  ;;  %v950_v48 = vshll.u32 %v7444_v32, 16  ;;  %v938_v51 = vrot.slane %v936_v36, 1  ;;  %v973_v17 = vrot.slane %v971_v63, 1  ;;  %v7420_v36 = vld [vmem:[%s9887_s26 + $0x8] sm:$0xe] }
  0x5f   : > { %648 = vrot.lane.b32.xlu0 %v624_v41, %s9769_s30  ;;  %v7445_v41 = vcombine.low %v7397_v20, %v10075_v23  ;;  %v9152_v63 = vld [vmem:[%s12900_s1 + $0x58] sm:$0xff]  }
  0x60   : > { %v932_v42 = vor.u32 %v931_v28, %v927_v26  ;;  %v952_v3 = vrot.slane %v950_v48, 1  ;;  %v9145_v26 = vld [vmem:[%s12900_s1 + $0xe8] sm:$0xff]   ;;  %v974_v28 = vor.u32 %v973_v17, %v969_v6  ;;  %v10173_v6 = vld [vmem:[%s9887_s26 + $0x7c] sm:$0x1]  ;;  %v7801_v17 = vld [vmem:[%s9887_s26 + $0x60] sm:$0xe] }
  0x61   : > { %v957_v46 = vshll.u32 %v7445_v41, 16  ;;  %v955_v25 = vshrl.u32 %v7445_v41, 16  ;;  %v7818_v41 = vcombine.low %v7770_v19, %v10127_v30  ;;  %8653 = vmatprep.subr.bf16.mxu0 %v9145_v26  ;;  %v7454_v19 = vcombine.low %v7422_v9, %v10041_v49 }
  0x62   : > { %654 = vrot.lane.b32.xlu1 %v627_v53, %s9769_s30  ;;  %v7398_v53 = vld [vmem:[%s9887_s26 + $0x68] sm:$0xf]  ;;  %8654 = vmatpush3.bf16.msra.mxu0 %v9145_v26  ;;  %v7773_v26 = vld [vmem:[%s9887_s26 + $0x80] sm:$0xf] }
  0x63   : > { %652 = vrot.lane.b32.xlu0 %v626_v44, %s9769_s30  ;;  %v934_v44 = vshrl.u32 %v7442_v21, 16  ;;  %v959_v62 = vrot.slane %v957_v46, 1  ;;  %v7817_v21 = vcombine.low %v7769_v10, %v10117_v4  ;;  %v3159_v11 = vshrl.u32 %v7818_v41, 16  ;;  %8655 = vmatprep.subr.bf16.mxu0 %v9149_v54 }
  0x65   : > { %v939_v2 = vor.u32 %v938_v51, %v934_v44  ;;  %v960_v16 = vor.u32 %v959_v62, %v955_v25  ;;  %v3154_v38 = vshll.u32 %v7817_v21, 16  ;;  %v7452_v44 = vcombine.low %v7420_v36, %v10025_v37  ;;  %v10208_v36 = vld [vmem:[%s9887_s26 + $0x8c] sm:$0x1] }
  0x66   : > { %658 = vrot.lane.b32.xlu1 %v629_v52, %s9769_s30  ;;  %v7446_v52 = vcombine.low %v7398_v53, %v10091_v40  ;;  %v7771_v53 = vld [vmem:[%s9887_s26 + $0x70] sm:$0xf]  ;;  %v3152_v48 = vshrl.u32 %v7817_v21, 16  ;;  %8656 = vmatpush3.bf16.msra.mxu0 %v9149_v54  ;;  %v9161_v21 = vld [vmem:[%s12900_s1 + $0x108] sm:$0xff]  }
  0x67   : > { %656 = vrot.lane.b32.xlu0 %v628_v57, %s9769_s30  ;;  %v7400_v57 = vld [vmem:[%s9887_s26 + $0x78] sm:$0xf]  ;;  %v3156_v8 = vrot.slane %v3154_v38, 1  ;;  %v1083_v37 = vrot.slane %v7452_v44, 1  ;;  %8657 = vmatprep.subr.bf16.mxu0 %v9153_v0  ;;  %v7803_v38 = vld [vmem:[%s9887_s26 + $0x70] sm:$0xe] }
  0x68   : > { %v964_v5 = vshll.u32 %v7446_v52, 16  ;;  %v7448_v7 = vcombine.low %v7400_v57, %v10106_v58 }
  0x6a   : > { %662 = vrot.lane.b32.xlu1 %v631_v60, %s9769_s30  ;;  %v948_v60 = vshrl.u32 %v7444_v32, 16  ;;  %v966_v20 = vrot.slane %v964_v5, 1  ;;  %8658 = vmatpush3.bf16.msra.mxu0 %v9153_v0 }
  0x6b   : > { %660 = vrot.lane.b32.xlu0 %v630_v61, %s9769_s30  ;;  %v946_v61 = vor.u32 %v945_v45, %v941_v59  ;;  %v3150_v59 = vor.u32 %v3149_v31, %v3145_v29  ;;  %v3161_v45 = vshll.u32 %v7818_v41, 16  ;;  %v9164_v41 = vld [vmem:[%s12900_s1 + $0x110] sm:$0x3f]  }
  0x6c   : > { %v953_v15 = vor.u32 %v952_v3, %v948_v60  ;;  %v3157_v60 = vor.u32 %v3156_v8, %v3152_v48 }
  0x6d   : > { %v3163_v57 = vrot.slane %v3161_v45, 1  ;;  %v7424_v45 = vld [vmem:[%s9887_s26 + $0x28] sm:$0xe] }
  0x6e   : > { %1005 = vrot.lane.b32.xlu1 %v904_v1, %s9768_s27  ;;  %v962_v1 = vshrl.u32 %v7446_v52, 16  ;;  %v9148_v52 = vld [vmem:[%s12900_s1 + $0x50] sm:$0xff]   ;;  %v7456_v54 = vcombine.low %v7424_v45, %v10055_v27 }
  0x6f   : > { %1003 = vrot.lane.b32.xlu0 %v897_v22, %s9768_s27  ;;  %v978_v22 = vshll.u32 %v7448_v7, 16 }
  0x70   : > { %v967_v32 = vor.u32 %v966_v20, %v962_v1  ;;  %v7802_v1 = vld [vmem:[%s9887_s26 + $0x68] sm:$0xe] }
  0x71   : > { %v980_v47 = vrot.slane %v978_v22, 1  ;;  %v7833_v22 = vcombine.low %v7801_v17, %v10117_v4  ;;  %v7834_v49 = vcombine.low %v7802_v1, %v10127_v30  ;;  %v1085_v4 = vrot.slane %v7454_v19, 1 }
  0x72   : > { %1009 = vrot.lane.b32.xlu1 %v918_v35, %s9768_s27  ;;  %v9144_v35 = vld [vmem:[%s12900_s1 + $0x48] sm:$0xff]  }
  0x73   : > { %1007 = vrot.lane.b32.xlu0 %v911_v33, %s9768_s27  ;;  %8535 = vmatprep.subr.bf16.mxu1 %v9144_v35  ;;  %v976_v33 = vshrl.u32 %v7448_v7, 16 }
  0x74   : > { %8536 = vmatpush3.bf16.msra.mxu1 %v9144_v35  ;;  %v7423_v35 = vld [vmem:[%s9887_s26 + $0x20] sm:$0xe] }
  0x75   : > { %v981_v46 = vor.u32 %v980_v47, %v976_v33  ;;  %8537 = vmatprep.subr.bf16.mxu1 %v9148_v52  ;;  %v7455_v30 = vcombine.low %v7423_v35, %v10034_v43  ;;  %v7774_v47 = vld [vmem:[%s9887_s26 + $0x88] sm:$0xf]  ;;  %v3585_v43 = vsel %vm1332_vm0, %v9164_v41, 0 }
  0x76   : > { %1013 = vrot.lane.b32.xlu1 %v932_v42, %s9768_s27  ;;  %v10141_v42 = vld [vmem:[%s9887_s26 + $0x74] sm:$0x1] }
  0x77   : > { %1011 = vrot.lane.b32.xlu0 %v925_v50, %s9768_s27  ;;  %v7421_v50 = vld [vmem:[%s9887_s26 + $0x10] sm:$0xe]  ;;  %v7819_v51 = vcombine.low %v7771_v53, %v10141_v42  ;;  %v3338_v53 = vrot.slane %v7834_v49, 1  ;;  %v1086_v48 = vrot.slane %v7455_v30, 1  ;;  %v7835_v8 = vcombine.low %v7803_v38, %v10141_v42  ;;  %v7427_v49 = vld [vmem:[%s9887_s26 + $0x40] sm:$0xe] }
  0x78   : > { %v7453_v25 = vcombine.low %v7421_v50, %v10020_v34  ;;  %8538 = vmatpush3.bf16.msra.mxu1 %v9148_v52  ;;  %v9156_v34 = vld [vmem:[%s12900_s1 + $0x60] sm:$0xff]   ;;  %v10220_v52 = vld [vmem:[%s9887_s26 + $0x94] sm:$0x1]  ;;  %v7459_v38 = vcombine.low %v7427_v49, %v10063_v12 }
  0x79   : > { %v3168_v62 = vshll.u32 %v7819_v51, 16  ;;  %8539 = vmatprep.subr.bf16.mxu1 %v9152_v63  ;;  %v3166_v7 = vshrl.u32 %v7819_v51, 16  ;;  %v7775_v51 = vld [vmem:[%s9887_s26 + $0x90] sm:$0xf] }
  0x7a   : > { %1017 = vrot.lane.b32.xlu1 %v946_v61, %s9768_s27  ;;  %v7800_v61 = vld [vmem:[%s9887_s26 + $0x58] sm:$0xe]  ;;  %v1084_v3 = vrot.slane %v7453_v25, 1  ;;  %v7823_v25 = vcombine.low %v7775_v51, %v10220_v52 }
  0x7b   : > { %1015 = vrot.lane.b32.xlu0 %v939_v2, %s9768_s27  ;;  %v3164_v2 = vor.u32 %v3163_v57, %v3159_v11  ;;  %v7832_v5 = vcombine.low %v7800_v61, %v10099_v55  ;;  %v3170_v10 = vrot.slane %v3168_v62, 1  ;;  %v9160_v55 = vld [vmem:[%s12900_s1 + $0x68] sm:$0x3f]  }
  0x7c   : > { %8540 = vmatpush3.bf16.msra.mxu1 %v9152_v63  ;;  %v1334_v29 = vsel %vm1332_vm0, %v9160_v55, 0  ;;  %v1087_v63 = vrot.slane %v7456_v54, 1  ;;  %v3194_v17 = vshrl.u32 %v7823_v25, 16  ;;  %v7429_v54 = vld [vmem:[%s9887_s26 + $0x60] sm:$0xe] }
  0x7d   : > { %8541 = vmatprep.subr.bf16.mxu1 %v9156_v34  ;;  %v3336_v18 = vrot.slane %v7832_v5, 1  ;;  %v3171_v20 = vor.u32 %v3170_v10, %v3166_v7  ;;  %v7426_v10 = vld [vmem:[%s9887_s26 + $0x38] sm:$0xe] }
  0x7e   : > { %1021 = vrot.lane.b32.xlu1 %v960_v16, %s9768_s27  ;;  %v9157_v16 = vld [vmem:[%s12900_s1 + $0x100] sm:$0xff]  }
  0x7f   : > { %1019 = vrot.lane.b32.xlu0 %v953_v15, %s9768_s27  ;;  %v7820_v15 = vcombine.low %v7772_v14, %v10173_v6  ;;  %8659 = vmatprep.subr.bf16.mxu0 %v9157_v16 }
  0x80   : > { %8542 = vmatpush3.bf16.msra.mxu1 %v9156_v34  ;;  %8660 = vmatpush3.bf16.msra.mxu0 %v9157_v16  ;;  %v3196_v34 = vshll.u32 %v7823_v25, 16 }
  0x81   : > { %8943 = vmatprep.subr.msk.bf16.mxu1 %vm1332_vm0, %v9160_v55  ;;  %v3175_v31 = vshll.u32 %v7820_v15, 16  ;;  %8661 = vmatprep.subr.bf16.mxu0 %v9161_v21  ;;  %v7805_v55 = vld [vmem:[%s9887_s26 + $0x80] sm:$0xe] }
  0x82   : > { %1025 = vrot.lane.b32.xlu1 %v974_v28, %s9768_s27  ;;  %v10194_v28 = vld [vmem:[%s9887_s26 + $0x84] sm:$0x1]  ;;  %v3198_v1 = vrot.slane %v3196_v34, 1 }
  0x83   : > { %1023 = vrot.lane.b32.xlu0 %v967_v32, %s9768_s27  ;;  %v3337_v32 = vrot.slane %v7833_v22, 1  ;;  %v7821_v33 = vcombine.low %v7773_v26, %v10194_v28  ;;  %v3177_v44 = vrot.slane %v3175_v31, 1  ;;  %v7806_v22 = vld [vmem:[%s9887_s26 + $0x88] sm:$0xe]  ;;  %v7837_v26 = vcombine.low %v7805_v55, %v10194_v28 }
  0x84   : > { %8544 = vmatpush3.bf16.msra.mxu1 %v1334_v29  ;;  %8662 = vmatpush3.bf16.msra.mxu0 %v9161_v21  ;;  %v3199_v35 = vor.u32 %v3198_v1, %v3194_v17  ;;  %v7777_v29 = vld [vmem:[%s9887_s26 + $0xb0] sm:$0xf] }
  0x85   : > { %8947 = vmatprep.subr.msk.bf16.mxu0 %vm1332_vm0, %v9164_v41  ;;  %v3182_v50 = vshll.u32 %v7821_v33, 16  ;;  %v3180_v42 = vshrl.u32 %v7821_v33, 16  ;;  %v7778_v33 = vld [vmem:[%s9887_s26 + $0xb8] sm:$0xf]  ;;  %v3341_v28 = vrot.slane %v7837_v26, 1 }
  0x86   : > { %3256 = vrot.lane.b32.xlu1 %v3150_v59, %s9768_s27  ;;  %v3173_v59 = vshrl.u32 %v7820_v15, 16 }
  0x87   : > { %1027 = vrot.lane.b32.xlu0 %v981_v46, %s9768_s27  ;;  %v7822_v46 = vcombine.low %v7774_v47, %v10208_v36  ;;  %v3184_v61 = vrot.slane %v3182_v50, 1  ;;  %v10267_v47 = vld [vmem:[%s9887_s26 + $0xbc] sm:$0x1]  ;;  %v7428_v50 = vld [vmem:[%s9887_s26 + $0x58] sm:$0xe] }
  0x88   : > { %8664 = vmatpush3.bf16.msra.mxu0 %v3585_v43  ;;  %v3178_v11 = vor.u32 %v3177_v44, %v3173_v59  ;;  %v7807_v44 = vld [vmem:[%s9887_s26 + $0x90] sm:$0xe] }
  0x89   : > { %v3189_v57 = vshll.u32 %v7822_v46, 16  ;;  %v3187_v27 = vshrl.u32 %v7822_v46, 16  ;;  %v7839_v12 = vcombine.low %v7807_v44, %v10220_v52  ;;  %v7461_v52 = vcombine.low %v7429_v54, %v10075_v23  ;;  %v7780_v44 = vld [vmem:[%s9887_s26 + $0xc8] sm:$0xf]  ;;  %v10343_v54 = vld [vmem:[%s9887_s26 + $0x94] sm:$0x1] }
  0x8a   : > { %1099 = vrot.lane.b32.xlu1 %v1083_v37, %s9769_s30  ;;  %v7425_v37 = vld [vmem:[%s9887_s26 + $0x30] sm:$0xe] }
  0x8b   : > { %3258 = vrot.lane.b32.xlu0 %v3157_v60, %s9768_s27  ;;  %v3339_v60 = vrot.slane %v7835_v8, 1  ;;  %v7457_v62 = vcombine.low %v7425_v37, %v10050_v56  ;;  %v3191_v0 = vrot.slane %v3189_v57, 1  ;;  %v7776_v56 = vld [vmem:[%s9887_s26 + $0xa8] sm:$0xf]  ;;  %v1090_v8 = vrot.slane %v7459_v38, 1 }
  0x8c   : > { %v10287_v57 = vld [vmem:[%s9887_s26 + $0xc4] sm:$0x1]  ;;  %v10326_v38 = vld [vmem:[%s9887_s26 + $0xd4] sm:$0x1] }
  0x8d   : > { %v1088_v7 = vrot.slane %v7457_v62, 1  ;;  %v3192_v14 = vor.u32 %v3191_v0, %v3187_v27  ;;  %v3343_v62 = vrot.slane %v7839_v12, 1  ;;  %v7808_v0 = vld [vmem:[%s9887_s26 + $0xa8] sm:$0xe] }
  0x8e   : > { %3260 = vrot.lane.b32.xlu1 %v3164_v2, %s9768_s27  ;;  %v3185_v2 = vor.u32 %v3184_v61, %v3180_v42  ;;  %v7460_v61 = vcombine.low %v7428_v50, %v10079_v24 }
  0x8f   : > { %1101 = vrot.lane.b32.xlu0 %v1084_v3, %s9769_s30  ;;  %v7804_v3 = vld [vmem:[%s9887_s26 + $0x78] sm:$0xe] }
  0x90   : > { %v7836_v16 = vcombine.low %v7804_v3, %v10173_v6  ;;  %v7458_v6 = vcombine.low %v7426_v10, %v10067_v13  ;;  %v1091_v24 = vrot.slane %v7460_v61, 1 }
  0x92   : > { %3352 = vrot.lane.b32.xlu1 %v3336_v18, %s9769_s30  ;;  %v10241_v18 = vld [vmem:[%s9887_s26 + $0xac] sm:$0x1]  ;;  %v1089_v13 = vrot.slane %v7458_v6, 1 }
  0x93   : > { %3262 = vrot.lane.b32.xlu0 %v3171_v20, %s9768_s27  ;;  %v3340_v20 = vrot.slane %v7836_v16, 1  ;;  %v7824_v21 = vcombine.low %v7776_v56, %v10241_v18  ;;  %v7840_v1 = vcombine.low %v7808_v0, %v10241_v18 }
  0x95   : > { %v3203_v30 = vshll.u32 %v7824_v21, 16  ;;  %v3201_v43 = vshrl.u32 %v7824_v21, 16 }
  0x96   : > { %1103 = vrot.lane.b32.xlu1 %v1085_v4, %s9769_s30  ;;  %v10257_v4 = vld [vmem:[%s9887_s26 + $0xb4] sm:$0x1] }
  0x97   : > { %3354 = vrot.lane.b32.xlu0 %v3337_v32, %s9769_s30  ;;  %v7838_v32 = vcombine.low %v7806_v22, %v10208_v36  ;;  %v7826_v36 = vcombine.low %v7778_v33, %v10267_v47  ;;  %v7401_v22 = vld [vmem:[%s9887_s26 + $0x80] sm:$0xf] }
  0x99   : > { %v3342_v46 = vrot.slane %v7838_v32, 1  ;;  %v3215_v23 = vshrl.u32 %v7826_v36, 16 }
  0x9a   : > { %3356 = vrot.lane.b32.xlu1 %v3338_v53, %s9769_s30  ;;  %v7825_v53 = vcombine.low %v7777_v29, %v10257_v4 }
  0x9b   : > { %1105 = vrot.lane.b32.xlu0 %v1086_v48, %s9769_s30  ;;  %v3205_v48 = vrot.slane %v3203_v30, 1 }
  0x9c   : > { %v3210_v51 = vshll.u32 %v7825_v53, 16 }
  0x9d   : > { %v3206_v42 = vor.u32 %v3205_v48, %v3201_v43 }
  0x9e   : > { %3264 = vrot.lane.b32.xlu1 %v3178_v11, %s9768_s27  ;;  %v7779_v11 = vld [vmem:[%s9887_s26 + $0xc0] sm:$0xf]  ;;  %v3212_v27 = vrot.slane %v3210_v51, 1  ;;  %v7403_v51 = vld [vmem:[%s9887_s26 + $0x90] sm:$0xf] }
  0x9f   : > { %3358 = vrot.lane.b32.xlu0 %v3339_v60, %s9769_s30  ;;  %v3217_v60 = vshll.u32 %v7826_v36, 16  ;;  %v7827_v34 = vcombine.low %v7779_v11, %v10287_v57  ;;  %v10332_v36 = vld [vmem:[%s9887_s26 + $0xcc] sm:$0x1] }
  0xa0   : > { %v10231_v5 = vpop.permute.xlu1 %540 }
  0xa1   : > { %v10233_v9 = vpop.permute.xlu0 %536  ;;  %v3219_v10 = vrot.slane %v3217_v60, 1  ;;  %v3224_v16 = vshll.u32 %v7827_v34, 16  ;;  %v3222_v26 = vshrl.u32 %v7827_v34, 16  ;;  %v7402_v60 = vld [vmem:[%s9887_s26 + $0x88] sm:$0xf] }
  0xa2   : > { %1107 = vrot.lane.b32.xlu1 %v1087_v63, %s9769_s30  ;;  %v3208_v63 = vshrl.u32 %v7825_v53, 16  ;;  %v7431_v53 = vld [vmem:[%s9887_s26 + $0x70] sm:$0xe] }
  0xa3   : > { %3266 = vrot.lane.b32.xlu0 %v3185_v2, %s9768_s27  ;;  %v3220_v21 = vor.u32 %v3219_v10, %v3215_v23  ;;  %v3226_v18 = vrot.slane %v3224_v16, 1  ;;  %v7463_v61 = vcombine.low %v7431_v53, %v10087_v39 }
  0xa4   : > { %v10244_v19 = vpop.permute.xlu1 %542  ;;  %v3213_v56 = vor.u32 %v3212_v27, %v3208_v63 }
  0xa5   : > { %v10246_v15 = vpop.permute.xlu0 %538  ;;  %v1094_v23 = vrot.slane %v7463_v61, 1  ;;  %v7432_v61 = vld [vmem:[%s9887_s26 + $0x78] sm:$0xe] }
  0xa6   : > { %3268 = vrot.lane.b32.xlu1 %v3192_v14, %s9768_s27  ;;  %v1092_v14 = vrot.slane %v7461_v52, 1  ;;  %v7828_v52 = vcombine.low %v7780_v44, %v10332_v36 }
  0xa7   : > { %1109 = vrot.lane.b32.xlu0 %v1088_v7, %s9769_s30  ;;  %v7430_v7 = vld [vmem:[%s9887_s26 + $0x68] sm:$0xe] }
  0xa8   : > { %v10259_v31 = vpop.permute.xlu1 %546  ;;  %v7462_v55 = vcombine.low %v7430_v7, %v10091_v40  ;;  %v3344_v40 = vrot.slane %v7840_v1, 1  ;;  %v3231_v39 = vshll.u32 %v7828_v52, 16 }
  0xa9   : > { %v10261_v41 = vpop.permute.xlu0 %544 }
  0xaa   : > { %3360 = vrot.lane.b32.xlu1 %v3340_v20, %s9769_s30  ;;  %v7809_v20 = vld [vmem:[%s9887_s26 + $0xb0] sm:$0xe]  ;;  %v1093_v29 = vrot.slane %v7462_v55, 1 }
  0xab   : > { %3270 = vrot.lane.b32.xlu0 %v3199_v35, %s9768_s27  ;;  %v10314_v35 = vld [vmem:[%s9887_s26 + $0x84] sm:$0x1]  ;;  %v7841_v30 = vcombine.low %v7809_v20, %v10257_v4  ;;  %v7811_v4 = vld [vmem:[%s9887_s26 + $0xc0] sm:$0xe] }
  0xac   : > { %v10272_v59 = vpop.permute.xlu1 %550  ;;  %v7449_v33 = vcombine.low %v7401_v22, %v10314_v35  ;;  %v7843_v27 = vcombine.low %v7811_v4, %v10287_v57  ;;  %v3229_v22 = vshrl.u32 %v7828_v52, 16 }
  0xad   : > { %v10275_v45 = vpop.permute.xlu0 %548 }
  0xae   : > { %1111 = vrot.lane.b32.xlu1 %v1089_v13, %s9769_s30  ;;  %v7810_v13 = vld [vmem:[%s9887_s26 + $0xb8] sm:$0xe]  ;;  %v985_v50 = vshll.u32 %v7449_v33, 16  ;;  %v983_v0 = vshrl.u32 %v7449_v33, 16  ;;  %v3347_v16 = vrot.slane %v7843_v27, 1 }
  0xaf   : > { %3362 = vrot.lane.b32.xlu0 %v3341_v28, %s9769_s30  ;;  %v7781_v28 = vld [vmem:[%s9887_s26 + $0xd0] sm:$0xf]  ;;  %v7842_v12 = vcombine.low %v7810_v13, %v10267_v47  ;;  %v10383_v33 = vld [vmem:[%s9887_s26 + $0xdc] sm:$0x1] }
  0xb0   : > { %v10283_v37 = vpop.permute.xlu1 %554  ;;  %v7829_v11 = vcombine.low %v7781_v28, %v10326_v38  ;;  %v987_v34 = vrot.slane %v985_v50, 1 }
  0xb1   : > { %v10289_v25 = vpop.permute.xlu0 %552  ;;  %v3346_v63 = vrot.slane %v7842_v12, 1 }
  0xb2   : > { %3364 = vrot.lane.b32.xlu1 %v3342_v46, %s9769_s30  ;;  %v3227_v46 = vor.u32 %v3226_v18, %v3222_v26  ;;  %v3238_v7 = vshll.u32 %v7829_v11, 16  ;;  %v3236_v1 = vshrl.u32 %v7829_v11, 16  ;;  %v988_v55 = vor.u32 %v987_v34, %v983_v0 }
  0xb3   : > { %1113 = vrot.lane.b32.xlu0 %v1090_v8, %s9769_s30  ;;  %v3345_v8 = vrot.slane %v7841_v30, 1  ;;  %v3233_v26 = vrot.slane %v3231_v39, 1  ;;  %v7782_v30 = vld [vmem:[%s9887_s26 + $0xd8] sm:$0xf] }
  0xb4   : > { %v10297_v2 = vpop.permute.xlu1 %558  ;;  %v3240_v20 = vrot.slane %v3238_v7, 1  ;;  %v7830_v11 = vcombine.low %v7782_v30, %v10383_v33  ;;  %v7464_v7 = vcombine.low %v7432_v61, %v10106_v58 }
  0xb5   : > { %12910 = vst [vmem:[#allocation9_spill] sm:$0xff] %v10297_v2  ;;  %v10299_v3 = vpop.permute.xlu0 %556  ;;  %v9516_v2 = vld [vmem:[%s9887_s26 + $0x10] sm:$0xf] }
  0xb6   : > { %12911 = vst [vmem:[#allocation10_spill] sm:$0xff] %v10299_v3  ;;  %3272 = vrot.lane.b32.xlu1 %v3206_v42, %s9768_s27  ;;  %v10349_v42 = vld [vmem:[%s9887_s26 + $0x8c] sm:$0x1]  ;;  %v3241_v53 = vor.u32 %v3240_v20, %v3236_v1  ;;  %v1095_v58 = vrot.slane %v7464_v7, 1  ;;  %v10553_v3 = vld [vmem:[%s9887_s26 + $0xc4] sm:$0x1] }
  0xb7   : > { %3366 = vrot.lane.b32.xlu0 %v3343_v62, %s9769_s30  ;;  %v7450_v10 = vcombine.low %v7402_v60, %v10349_v42 }
  0xb8   : > { %v10304_v17 = vpop.permute.xlu1 %562 }
  0xb9   : > { %12912 = vst [vmem:[#allocation11_spill] sm:$0xff] %v10304_v17  ;;  %v10309_v6 = vpop.permute.xlu0 %560  ;;  %v992_v18 = vshll.u32 %v7450_v10, 16  ;;  %v990_v12 = vshrl.u32 %v7450_v10, 16  ;;  %v7924_v17 = vld [vmem:[%s9887_s26 + $0x80] sm:$0xe] }
  0xba   : > { %12913 = vst [vmem:[#allocation12_spill] sm:$0xff] %v10309_v6  ;;  %1115 = vrot.lane.b32.xlu1 %v1091_v24, %s9769_s30  ;;  %v7451_v24 = vcombine.low %v7403_v51, %v10343_v54  ;;  %v7433_v51 = vld [vmem:[%s9887_s26 + $0x80] sm:$0xe] }
  0xbb   : > { %3274 = vrot.lane.b32.xlu0 %v3213_v56, %s9768_s27  ;;  %v10366_v56 = vld [vmem:[%s12900_s1] sm:$0xff]   ;;  %v994_v50 = vrot.slane %v992_v18, 1  ;;  %v7465_v27 = vcombine.low %v7433_v51, %v10314_v35 }
  0xbc   : > { %v10317_v49 = vpop.permute.xlu1 %566  ;;  %8561 = vmatprep.subr.bf16.mxu1 %v10366_v56  ;;  %v997_v44 = vshrl.u32 %v7451_v24, 16  ;;  %v7888_v51 = vld [vmem:[%s9887_s26 + $0x60] sm:$0xf] }
  0xbd   : > { %12914 = vst [vmem:[#allocation13_spill] sm:$0xff] %v10317_v49  ;;  %v10320_v32 = vpop.permute.xlu0 %564  ;;  %v995_v34 = vor.u32 %v994_v50, %v990_v12  ;;  %v1096_v35 = vrot.slane %v7465_v27, 1  ;;  %v7434_v50 = vld [vmem:[%s9887_s26 + $0x88] sm:$0xe] }
  0xbe   : > { %12915 = vst [vmem:[#allocation14_spill] sm:$0xff] %v10320_v32  ;;  %3276 = vrot.lane.b32.xlu1 %v3220_v21, %s9768_s27  ;;  %v999_v21 = vshll.u32 %v7451_v24, 16  ;;  %v3245_v24 = vshll.u32 %v7830_v11, 16  ;;  %v10498_v32 = vld [vmem:[%s9887_s26 + $0x9c] sm:$0x1] }
  0xbf   : > { %1117 = vrot.lane.b32.xlu0 %v1092_v14, %s9769_s30 }
  0xc0   : > { %v10335_v43 = vpop.permute.xlu1 %634  ;;  %v3247_v20 = vrot.slane %v3245_v24, 1  ;;  %v7891_v24 = vld [vmem:[%s9887_s26 + $0x78] sm:$0xf] }
  0xc1   : > { %v10338_v48 = vpop.permute.xlu0 %632 }
  0xc2   : > { %3368 = vrot.lane.b32.xlu1 %v3344_v40, %s9769_s30  ;;  %v7783_v40 = vld [vmem:[%s9887_s26 + $0xe0] sm:$0xf] }
  0xc3   : > { %3278 = vrot.lane.b32.xlu0 %v3227_v46, %s9768_s27  ;;  %v1001_v46 = vrot.slane %v999_v21, 1 }
  0xc4   : > { %v10354_v62 = vpop.permute.xlu1 %638 }
  0xc5   : > { %v10356_v47 = vpop.permute.xlu0 %636 }
  0xc6   : > { %1119 = vrot.lane.b32.xlu1 %v1093_v29, %s9769_s30  ;;  %v10377_v29 = vld [vmem:[%s9887_s26 + $0xe4] sm:$0x1] }
  0xc7   : > { %3370 = vrot.lane.b32.xlu0 %v3345_v8, %s9769_s30  ;;  %v7831_v4 = vcombine.low %v7783_v40, %v10377_v29  ;;  %v3234_v8 = vor.u32 %v3233_v26, %v3229_v22  ;;  %v7813_v22 = vld [vmem:[%s9887_s26 + $0xd0] sm:$0xe]  ;;  %v7812_v26 = vld [vmem:[%s9887_s26 + $0xc8] sm:$0xe] }
  0xc8   : > { %v10368_v57 = vpop.permute.xlu1 %642  ;;  %v7845_v30 = vcombine.low %v7813_v22, %v10326_v38 }
  0xc9   : > { %v10370_v14 = vpop.permute.xlu0 %640  ;;  %v3252_v0 = vshll.u32 %v7831_v4, 16 }
  0xca   : > { %3372 = vrot.lane.b32.xlu1 %v3346_v63, %s9769_s30  ;;  %v1002_v63 = vor.u32 %v1001_v46, %v997_v44  ;;  %v7844_v44 = vcombine.low %v7812_v26, %v10332_v36  ;;  %v7435_v46 = vld [vmem:[%s9887_s26 + $0x90] sm:$0xe]  ;;  %v3349_v36 = vrot.slane %v7845_v30, 1 }
  0xcb   : > { %1121 = vrot.lane.b32.xlu0 %v1094_v23, %s9769_s30  ;;  %v10404_v23 = vld [vmem:[%s12900_s1 + $0x118] sm:$0xff]   ;;  %v3254_v1 = vrot.slane %v3252_v0, 1  ;;  %v7467_v61 = vcombine.low %v7435_v46, %v10343_v54 }
  0xcc   : > { %v10379_v13 = vpop.permute.xlu1 %646  ;;  %8681 = vmatprep.subr.bf16.mxu0 %v10404_v23  ;;  %v3348_v0 = vrot.slane %v7844_v44, 1 }
  0xcd   : > { %v10385_v28 = vpop.permute.xlu0 %644 }
  0xce   : > { %1029 = vrot.lane.b32.xlu1 %v988_v55, %s9768_s27  ;;  %v3243_v55 = vshrl.u32 %v7830_v11, 16  ;;  %v10433_v11 = vld [vmem:[%s9887_s26 + $0x64] sm:$0x1] }
  0xcf   : > { %3374 = vrot.lane.b32.xlu0 %v3347_v16, %s9769_s30  ;;  %v3250_v16 = vshrl.u32 %v7831_v4, 16  ;;  %v7889_v4 = vld [vmem:[%s9887_s26 + $0x68] sm:$0xf]  ;;  %v7936_v7 = vcombine.low %v7888_v51, %v10433_v11 }
  0xd0   : > { %v10392_v60 = vpop.permute.xlu1 %650 }
  0xd1   : > { %12916 = vst [vmem:[#allocation15_spill] sm:$0xff] %v10392_v60  ;;  %v10395_v52 = vpop.permute.xlu0 %648  ;;  %v3255_v40 = vor.u32 %v3254_v1, %v3250_v16  ;;  %v7814_v1 = vld [vmem:[%s9887_s26 + $0xd8] sm:$0xe] }
  0xd2   : > { %12917 = vst [vmem:[#allocation16_spill] sm:$0xff] %v10395_v52  ;;  %3282 = vrot.lane.b32.xlu1 %v3241_v53, %s9768_s27  ;;  %v3248_v53 = vor.u32 %v3247_v20, %v3243_v55  ;;  %v10453_v55 = vld [vmem:[%s9887_s26 + $0x74] sm:$0x1]  ;;  %v1098_v20 = vrot.slane %v7467_v61, 1  ;;  %v7846_v30 = vcombine.low %v7814_v1, %v10383_v33  ;;  %v3832_v33 = vshrl.u32 %v7936_v7, 16 }
  0xd3   : > { %3280 = vrot.lane.b32.xlu0 %v3234_v8, %s9768_s27  ;;  %v10426_v8 = vld [vmem:[%s9887_s26 + $0x6c] sm:$0x1] }
  0xd4   : > { %v10406_v39 = vpop.permute.xlu1 %654  ;;  %v7937_v27 = vcombine.low %v7889_v4, %v10426_v8  ;;  %v3350_v61 = vrot.slane %v7846_v30, 1  ;;  %v10478_v30 = vld [vmem:[%s9887_s26 + $0x8c] sm:$0x1] }
  0xd5   : > { %12918 = vst [vmem:[#allocation17_spill] sm:$0xff] %v10406_v39  ;;  %v10408_v10 = vpop.permute.xlu0 %652 }
  0xd6   : > { %12919 = vst [vmem:[#allocation18_spill] sm:$0xff] %v10408_v10  ;;  %1033 = vrot.lane.b32.xlu1 %v1002_v63, %s9768_s27  ;;  %v7815_v63 = vld [vmem:[%s9887_s26 + $0xe0] sm:$0xe]  ;;  %v3841_v26 = vshll.u32 %v7937_v27, 16  ;;  %v10530_v10 = vld [vmem:[%s9887_s26 + $0xbc] sm:$0x1] }
  0xd7   : > { %1031 = vrot.lane.b32.xlu0 %v995_v34, %s9768_s27  ;;  %v7466_v34 = vcombine.low %v7434_v50, %v10349_v42  ;;  %v7847_v22 = vcombine.low %v7815_v63, %v10377_v29  ;;  %v3839_v29 = vshrl.u32 %v7937_v27, 16 }
  0xd8   : > { %v10414_v21 = vpop.permute.xlu1 %658  ;;  %v3843_v51 = vrot.slane %v3841_v26, 1 }
  0xd9   : > { %12920 = vst [vmem:[#allocation19_spill] sm:$0xff] %v10414_v21  ;;  %v10417_v18 = vpop.permute.xlu0 %656  ;;  %v3351_v50 = vrot.slane %v7847_v22, 1 }
  0xda   : > { %12921 = vst [vmem:[#allocation20_spill] sm:$0xff] %v10417_v18  ;;  %1125 = vrot.lane.b32.xlu1 %v1096_v35, %s9769_s30  ;;  %v10446_v35 = vld [vmem:[%s9887_s26 + $0x7c] sm:$0x1]  ;;  %v3844_v27 = vor.u32 %v3843_v51, %v3839_v29  ;;  %v7922_v18 = vld [vmem:[%s9887_s26 + $0x70] sm:$0xe] }
  0xdb   : > { %1123 = vrot.lane.b32.xlu0 %v1095_v58, %s9769_s30  ;;  %v7890_v58 = vld [vmem:[%s9887_s26 + $0x70] sm:$0xf]  ;;  %v7939_v42 = vcombine.low %v7891_v24, %v10446_v35 }
  0xdc   : > { %v10428_v12 = vpop.permute.xlu1 %662  ;;  %v7938_v44 = vcombine.low %v7890_v58, %v10453_v55 }
  0xdd   : > { %12922 = vst [vmem:[#allocation21_spill] sm:$0xff] %v10428_v12  ;;  %v10435_v38 = vpop.permute.xlu0 %660  ;;  %v3853_v1 = vshrl.u32 %v7939_v42, 16  ;;  %v7895_v12 = vld [vmem:[%s9887_s26 + $0x98] sm:$0xf] }
  0xde   : > { %12923 = vst [vmem:[#allocation22_spill] sm:$0xff] %v10435_v38  ;;  %3286 = vrot.lane.b32.xlu1 %v3255_v40, %s9768_s27  ;;  %v1097_v40 = vrot.slane %v7466_v34, 1  ;;  %v3846_v26 = vshrl.u32 %v7938_v44, 16  ;;  %v7920_v38 = vld [vmem:[%s9887_s26 + $0x60] sm:$0xe] }
  0xdf   : > { %3284 = vrot.lane.b32.xlu0 %v3248_v53, %s9768_s27  ;;  %v3834_v53 = vshll.u32 %v7936_v7, 16 }
  0xe0   : > { %v10448_v16 = vpop.permute.xlu1 %1005 }
  0xe1   : > { %v10455_v54 = vpop.permute.xlu0 %1003  ;;  %v3836_v63 = vrot.slane %v3834_v53, 1 }
  0xe2   : > { %3378 = vrot.lane.b32.xlu1 %v3349_v36, %s9769_s30  ;;  %v3855_v36 = vshll.u32 %v7939_v42, 16  ;;  %v10485_v42 = vld [vmem:[%s9887_s26 + $0x84] sm:$0x1] }
  0xe3   : > { %3376 = vrot.lane.b32.xlu0 %v3348_v0, %s9769_s30  ;;  %v3848_v0 = vshll.u32 %v7938_v44, 16  ;;  %v3837_v22 = vor.u32 %v3836_v63, %v3832_v33  ;;  %v7952_v33 = vcombine.low %v7920_v38, %v10433_v11  ;;  %v7923_v63 = vld [vmem:[%s9887_s26 + $0x78] sm:$0xe]  ;;  %v7943_v38 = vcombine.low %v7895_v12, %v10498_v32 }
  0xe4   : > { %v10463_v46 = vpop.permute.xlu1 %1009  ;;  %v3857_v58 = vrot.slane %v3855_v36, 1 }
  0xe5   : > { %v10465_v4 = vpop.permute.xlu0 %1007  ;;  %v3850_v7 = vrot.slane %v3848_v0, 1 }
  0xe6   : > { %1129 = vrot.lane.b32.xlu1 %v1098_v20, %s9769_s30  ;;  %v7921_v20 = vld [vmem:[%s9887_s26 + $0x68] sm:$0xe]  ;;  %v3858_v44 = vor.u32 %v3857_v58, %v3853_v1  ;;  %v10505_v1 = vld [vmem:[%s9887_s26 + $0x94] sm:$0x1] }
  0xe7   : > { %1127 = vrot.lane.b32.xlu0 %v1097_v40, %s9769_s30  ;;  %v7893_v40 = vld [vmem:[%s9887_s26 + $0x88] sm:$0xf]  ;;  %v7953_v51 = vcombine.low %v7921_v20, %v10426_v8  ;;  %v7955_v20 = vcombine.low %v7923_v63, %v10446_v35  ;;  %v3883_v63 = vshll.u32 %v7943_v38, 16 }
  0xe8   : > { %v10469_v34 = vpop.permute.xlu1 %1013  ;;  %v7941_v36 = vcombine.low %v7893_v40, %v10478_v30 }
  0xe9   : > { %v10471_v24 = vpop.permute.xlu0 %1011  ;;  %v4024_v58 = vrot.slane %v7953_v51, 1 }
  0xea   : > { %3382 = vrot.lane.b32.xlu1 %v3351_v50, %s9769_s30  ;;  %v7892_v50 = vld [vmem:[%s9887_s26 + $0x80] sm:$0xf]  ;;  %v3869_v11 = vshll.u32 %v7941_v36, 16  ;;  %v3867_v35 = vshrl.u32 %v7941_v36, 16 }
  0xeb   : > { %3380 = vrot.lane.b32.xlu0 %v3350_v61, %s9769_s30  ;;  %v3851_v61 = vor.u32 %v3850_v7, %v3846_v26  ;;  %v7940_v0 = vcombine.low %v7892_v50, %v10485_v42  ;;  %v7954_v26 = vcombine.low %v7922_v18, %v10453_v55 }
  0xec   : > { %v10480_v53 = vpop.permute.xlu1 %1017  ;;  %v3871_v51 = vrot.slane %v3869_v11, 1  ;;  %v3885_v11 = vrot.slane %v3883_v63, 1  ;;  %v7926_v63 = vld [vmem:[%s9887_s26 + $0x90] sm:$0xe] }
  0xed   : > { %v10487_v29 = vpop.permute.xlu0 %1015  ;;  %v3862_v7 = vshll.u32 %v7940_v0, 16  ;;  %v4025_v12 = vrot.slane %v7954_v26, 1  ;;  %v3860_v18 = vshrl.u32 %v7940_v0, 16 }
  0xee   : > { %3945 = vrot.lane.b32.xlu1 %v3844_v27, %s9768_s27  ;;  %v7894_v27 = vld [vmem:[%s9887_s26 + $0x90] sm:$0xf]  ;;  %v3872_v36 = vor.u32 %v3871_v51, %v3867_v35  ;;  %v10536_v35 = vld [vmem:[%s9887_s26 + $0xb4] sm:$0x1]  ;;  %v7927_v51 = vld [vmem:[%s9887_s26 + $0x98] sm:$0xe] }
  0xef   : > { %3943 = vrot.lane.b32.xlu0 %v3837_v22, %s9768_s27  ;;  %v4023_v22 = vrot.slane %v7952_v33, 1  ;;  %v7942_v40 = vcombine.low %v7894_v27, %v10505_v1  ;;  %v3864_v55 = vrot.slane %v3862_v7, 1  ;;  %v7897_v7 = vld [vmem:[%s9887_s26 + $0xb8] sm:$0xf] }
  0xf0   : > { %v10500_v49 = vpop.permute.xlu1 %1021 }
  0xf1   : > { %v10507_v8 = vpop.permute.xlu0 %1019  ;;  %v3865_v0 = vor.u32 %v3864_v55, %v3860_v18  ;;  %v7956_v18 = vcombine.low %v7924_v17, %v10485_v42 }
  0xf2   : > { %3949 = vrot.lane.b32.xlu1 %v3858_v44, %s9768_s27  ;;  %v4026_v44 = vrot.slane %v7955_v20, 1  ;;  %v3881_v20 = vshrl.u32 %v7943_v38, 16 }
  0xf3   : > { %3947 = vrot.lane.b32.xlu0 %v3851_v61, %s9768_s27  ;;  %v3876_v61 = vshll.u32 %v7942_v40, 16 }
  0xf4   : > { %v10515_v50 = vpop.permute.xlu1 %1025 }
  0xf5   : > { %v10517_v21 = vpop.permute.xlu0 %1023  ;;  %v3878_v26 = vrot.slane %v3876_v61, 1  ;;  %v7899_v61 = vld [vmem:[%s9887_s26 + $0xc8] sm:$0xf] }
  0xf6   : > { %4041 = vrot.lane.b32.xlu1 %v4024_v58, %s9769_s30  ;;  %v7925_v58 = vld [vmem:[%s9887_s26 + $0x88] sm:$0xe] }
  0xf7   : > { %4039 = vrot.lane.b32.xlu0 %v4023_v22, %s9769_s30  ;;  %v3874_v22 = vshrl.u32 %v7942_v40, 16  ;;  %v7957_v6 = vcombine.low %v7925_v58, %v10478_v30  ;;  %v3886_v40 = vor.u32 %v3885_v11, %v3881_v20  ;;  %v10547_v58 = vld [vmem:[%s9887_s26 + $0xcc] sm:$0x1]  ;;  %v7898_v11 = vld [vmem:[%s9887_s26 + $0xc0] sm:$0xf] }
  0xf8   : > { %v10521_v33 = vpop.permute.xlu1 %3256  ;;  %v7947_v60 = vcombine.low %v7899_v61, %v10547_v58  ;;  %v7929_v61 = vld [vmem:[%s9887_s26 + $0xb8] sm:$0xe] }
  0xf9   : > { %v10523_v27 = vpop.permute.xlu0 %1027  ;;  %v3879_v30 = vor.u32 %v3878_v26, %v3874_v22  ;;  %v4028_v20 = vrot.slane %v7957_v6, 1  ;;  %v7959_v22 = vcombine.low %v7927_v51, %v10498_v32  ;;  %v7958_v26 = vcombine.low %v7926_v63, %v10505_v1 }
  0xfa   : > { %4045 = vrot.lane.b32.xlu1 %v4026_v44, %s9769_s30  ;;  %v7896_v44 = vld [vmem:[%s9887_s26 + $0xb0] sm:$0xf]  ;;  %v3911_v63 = vshll.u32 %v7947_v60, 16 }
  0xfb   : > { %4043 = vrot.lane.b32.xlu0 %v4025_v12, %s9769_s30  ;;  %v7945_v12 = vcombine.low %v7897_v7, %v10530_v10  ;;  %v7944_v55 = vcombine.low %v7896_v44, %v10536_v35  ;;  %v1136_v7 = vsel %vm664_vm1, %v9516_v2, %v10448_v16  ;;  %v4027_v16 = vrot.slane %v7956_v18, 1 }
  0xfc   : > { %v1100_v39 = vpop.permute.xlu1 %1099  ;;  %v4030_v1 = vrot.slane %v7959_v22, 1  ;;  %v7961_v22 = vcombine.low %v7929_v61, %v10530_v10  ;;  %v7928_v61 = vld [vmem:[%s9887_s26 + $0xb0] sm:$0xe] }
  0xfd   : > { %v3259_v38 = vpop.permute.xlu0 %3258  ;;  %v3897_v52 = vshll.u32 %v7945_v12, 16  ;;  %v3888_v18 = vshrl.u32 %v7944_v55, 16 }
  0xfe   : > { %3953 = vrot.lane.b32.xlu1 %v3872_v36, %s9768_s27 }
  0xff   : > { %3951 = vrot.lane.b32.xlu0 %v3865_v0, %s9768_s27  ;;  %v9517_v0 = vld [vmem:[%s9887_s26 + $0x8] sm:$0xf]  ;;  %v3899_v51 = vrot.slane %v3897_v52, 1 }
 0x100   : > { %v10549_v36 = vpop.permute.xlu1 %3260  ;;  %v1133_v17 = vsel %vm664_vm1, %v9517_v0, %v10455_v54  ;;  %v3890_v54 = vshll.u32 %v7944_v55, 16  ;;  %v7946_v0 = vcombine.low %v7898_v11, %v10553_v3 }
 0x101   : > { %v1102_v42 = vpop.permute.xlu0 %1101  ;;  %v1180_v44 = vsel %vm713_vm2, %v1133_v17, %v1100_v39 }
 0x102   : > { %v1182_v6 = vsel %vm713_vm2, %v1136_v7, %v1102_v42  ;;  %3957 = vrot.lane.b32.xlu1 %v3886_v40, %s9768_s27  ;;  %v3895_v40 = vshrl.u32 %v7945_v12, 16  ;;  %v3892_v11 = vrot.slane %v3890_v54, 1  ;;  %v3904_v7 = vshll.u32 %v7946_v0, 16  ;;  %v9518_v42 = vld [vmem:[%s9887_s26 + $0x58] sm:$0xf] }
 0x103   : > { %3955 = vrot.lane.b32.xlu0 %v3879_v30, %s9768_s27  ;;  %v7482_v2 = vcombine.low %v1180_v44, %v1182_v6  ;;  %v4029_v30 = vrot.slane %v7958_v26, 1  ;;  %v3386_v44 = vsel %vm664_vm1, %v9518_v42, %v10521_v33  ;;  %v9519_v6 = vld [vmem:[%s9887_s26 + $0x60] sm:$0xf]  ;;  %v3909_v12 = vshrl.u32 %v7947_v60, 16  ;;  %v10586_v54 = vld [vmem:[%s9887_s26 + $0xdc] sm:$0x1] }
 0x104   : > { %v3353_v32 = vpop.permute.xlu1 %3352  ;;  %v3913_v33 = vrot.slane %v3911_v63, 1  ;;  %v3902_v42 = vshrl.u32 %v7946_v0, 16  ;;  %v3906_v10 = vrot.slane %v3904_v7, 1 }
 0x105   : > { %8545 = vmatprep.mubr.msk.bf16.mxu1 %vm1307_vm3, %v7482_v2  ;;  %v10570_v39 = vpop.permute.xlu0 %3262  ;;  %v3433_v55 = vsel %vm713_vm2, %v3386_v44, %v3353_v32  ;;  %v3900_v2 = vor.u32 %v3899_v51, %v3895_v40  ;;  %v7900_v44 = vld [vmem:[%s9887_s26 + $0xd0] sm:$0xf]  ;;  %v9521_v40 = vld [vmem:[%s9887_s26 + $0x18] sm:$0xf] }
 0x106   : > { %4049 = vrot.lane.b32.xlu1 %v4028_v20, %s9769_s30  ;;  %v3389_v20 = vsel %vm664_vm1, %v9519_v6, %v3259_v38  ;;  %v3893_v38 = vor.u32 %v3892_v11, %v3888_v18  ;;  %v10592_v6 = vld [vmem:[%s9887_s26 + $0xd4] sm:$0x1]  ;;  %v1139_v51 = vsel %vm664_vm1, %v9521_v40, %v10465_v4  ;;  %v7960_v4 = vcombine.low %v7928_v61, %v10536_v35  ;;  %v7931_v11 = vld [vmem:[%s9887_s26 + $0xc8] sm:$0xe]  ;;  %v7930_v35 = vld [vmem:[%s9887_s26 + $0xc0] sm:$0xe] }
 0x107   : > { %4047 = vrot.lane.b32.xlu0 %v4027_v16, %s9769_s30  ;;  %v7901_v16 = vld [vmem:[%s9887_s26 + $0xd8] sm:$0xf]  ;;  %v9522_v61 = vld [vmem:[%s9887_s26 + $0x68] sm:$0xf] }
 0x108   : > { %v1104_v17 = vpop.permute.xlu1 %1103  ;;  %v10602_v63 = vcombine.low %v7901_v16, %v10586_v54  ;;  %v10615_v16 = vld [vmem:[%s9887_s26 + $0xec] sm:$0x1] }
 0x109   : > { %v3355_v52 = vpop.permute.xlu0 %3354 }
 0x10a   : > { %v3435_v26 = vsel %vm713_vm2, %v3389_v20, %v3355_v52  ;;  %4053 = vrot.lane.b32.xlu1 %v4030_v1, %s9769_s30  ;;  %v9520_v20 = vld [vmem:[%s9887_s26 + $0x20] sm:$0xf]  ;;  %v3907_v52 = vor.u32 %v3906_v10, %v3902_v42 }
 0x10b   : > { %4051 = vrot.lane.b32.xlu0 %v4029_v30, %s9769_s30  ;;  %v7862_v60 = vcombine.low %v3433_v55, %v3435_v26  ;;  %v1142_v1 = vsel %vm664_vm1, %v9520_v20, %v10463_v46  ;;  %v1184_v30 = vsel %vm713_vm2, %v1139_v51, %v1104_v17  ;;  %v3914_v46 = vor.u32 %v3913_v33, %v3909_v12  ;;  %v7903_v17 = vld [vmem:[%s9887_s26 + $0xe8] sm:$0xf]  ;;  %v7902_v33 = vld [vmem:[%s9887_s26 + $0xe0] sm:$0xf] }
 0x10c   : > { %v3357_v32 = vpop.permute.xlu1 %3356  ;;  %v4032_v55 = vrot.slane %v7961_v22, 1  ;;  %v10611_v26 = vcombine.low %v7900_v44, %v10592_v6  ;;  %v3392_v22 = vsel %vm664_vm1, %v9522_v61, %v10549_v36  ;;  %v7963_v44 = vcombine.low %v7931_v11, %v10547_v58 }
 0x10d   : > { %8665 = vmatprep.mubr.msk.bf16.mxu0 %vm1307_vm3, %v7862_v60  ;;  %v1106_v0 = vpop.permute.xlu0 %1105  ;;  %v10625_v60 = vld [vmem:[%s9887_s26 + $0xe4] sm:$0x1]  ;;  %v3925_v20 = vshll.u32 %v10602_v63, 16  ;;  %v4031_v51 = vrot.slane %v7960_v4, 1  ;;  %v10640_v36 = vcombine.low %v7903_v17, %v10615_v16 }
 0x10e   : > { %v1186_v18 = vsel %vm713_vm2, %v1142_v1, %v1106_v0  ;;  %3961 = vrot.lane.b32.xlu1 %v3900_v2, %s9768_s27  ;;  %v9196_v2 = vld [vmem:[%s12900_s1 + $0x8] sm:$0xff]   ;;  %v3437_v1 = vsel %vm713_vm2, %v3392_v22, %v3357_v32  ;;  %v7962_v0 = vcombine.low %v7930_v35, %v10553_v3  ;;  %v3918_v58 = vshll.u32 %v10611_v26, 16  ;;  %v9199_v32 = vld [vmem:[%s12900_s1 + $0x10] sm:$0xff]   ;;  %v9207_v3 = vld [vmem:[%s12900_s1 + $0x120] sm:$0xff]  }
 0x10f   : > { %v7483_v7 = vcombine.low %v1184_v30, %v1186_v18  ;;  %3959 = vrot.lane.b32.xlu0 %v3893_v38, %s9768_s27  ;;  %v9523_v38 = vld [vmem:[%s9887_s26 + $0x70] sm:$0xf]  ;;  %v10647_v30 = vcombine.low %v7902_v33, %v10625_v60  ;;  %v3927_v4 = vrot.slane %v3925_v20, 1  ;;  %v4034_v11 = vrot.slane %v7963_v44, 1  ;;  %v9203_v33 = vld [vmem:[%s12900_s1 + $0x18] sm:$0xff]  }
 0x110   : > { %v10620_v12 = vpop.permute.xlu1 %3264  ;;  %v3395_v42 = vsel %vm664_vm1, %v9523_v38, %v10570_v39  ;;  %v3920_v17 = vrot.slane %v3918_v58, 1  ;;  %v9525_v22 = vld [vmem:[%s9887_s26 + $0x28] sm:$0xf]  ;;  %v7530_v44 = vld [vmem:[%s9887_s26 + $0x18] sm:$0xf] }
 0x111   : > { %8546 = vmatmul.mubr.msk.bf16.vlgmr.msra.gmra.mrb[0].mxu1 %vm1307_vm3, %v7483_v7  ;;  %v3359_v10 = vpop.permute.xlu0 %3358  ;;  %v3939_v7 = vshll.u32 %v10640_v36, 16  ;;  %v3932_v35 = vshll.u32 %v10647_v30, 16  ;;  %v10679_v20 = vld [vmem:[%s9887_s26 + $0x1c] sm:$0x1] }
 0x112   : > { %v3439_v40 = vsel %vm713_vm2, %v3395_v42, %v3359_v10  ;;  %3965 = vrot.lane.b32.xlu1 %v3914_v46, %s9768_s27  ;;  %8562 = vmatpush3.bf16.msra.mxu1 %v10366_v56  ;;  %v3923_v56 = vshrl.u32 %v10602_v63, 16  ;;  %v3916_v63 = vshrl.u32 %v10611_v26, 16  ;;  %v1145_v26 = vsel %vm664_vm1, %v9525_v22, %v10471_v24  ;;  %v8008_v22 = vld [vmem:[%s9887_s26 + $0xa8] sm:$0xf] }
 0x113   : > { %v7863_v39 = vcombine.low %v3437_v1, %v3439_v40  ;;  %3963 = vrot.lane.b32.xlu0 %v3907_v52, %s9768_s27  ;;  %8563 = vmatprep.subr.bf16.mxu1 %v9196_v2  ;;  %v4033_v52 = vrot.slane %v7962_v0, 1  ;;  %v3937_v10 = vshrl.u32 %v10640_v36, 16  ;;  %v3941_v24 = vrot.slane %v3939_v7, 1  ;;  %v7932_v36 = vld [vmem:[%s9887_s26 + $0xd0] sm:$0xe] }
 0x114   : > { %v1108_v18 = vpop.permute.xlu1 %1107  ;;  %v3928_v42 = vor.u32 %v3927_v4, %v3923_v56  ;;  %v3930_v40 = vshrl.u32 %v10647_v30, 16  ;;  %v3921_v0 = vor.u32 %v3920_v17, %v3916_v63  ;;  %v3934_v58 = vrot.slane %v3932_v35, 1  ;;  %v7529_v56 = vld [vmem:[%s9887_s26 + $0x10] sm:$0xf]  ;;  %v10693_v4 = vld [vmem:[%s9887_s26 + $0x14] sm:$0x1] }
 0x115   : > { %8666 = vmatmul.mubr.msk.bf16.vlgmr.msra.gmra.mrb[0].mxu0 %vm1307_vm3, %v7863_v39  ;;  %v10653_v46 = vpop.permute.xlu0 %3266  ;;  %v7935_v7 = vld [vmem:[%s9887_s26 + $0xe8] sm:$0xe]  ;;  %v10701_v30 = vcombine.low %v7530_v44, %v10679_v20  ;;  %v7964_v63 = vcombine.low %v7932_v36, %v10592_v6  ;;  %v9215_v17 = vld [vmem:[%s12900_s1 + $0x130] sm:$0xff]   ;;  %v3942_v35 = vor.u32 %v3941_v24, %v3937_v10  ;;  %v10728_v44 = vld [vmem:[%s9887_s26 + $0xa4] sm:$0x1] }
 0x116   : > { %4057 = vrot.lane.b32.xlu1 %v4032_v55, %s9769_s30  ;;  %8564 = vmatpush3.bf16.msra.mxu1 %v9196_v2  ;;  %v9524_v2 = vld [vmem:[%s9887_s26 + $0x30] sm:$0xf]  ;;  %v7967_v6 = vcombine.low %v7935_v7, %v10615_v16  ;;  %v9526_v16 = vld [vmem:[%s9887_s26 + $0x78] sm:$0xf] }
 0x117   : > { %4055 = vrot.lane.b32.xlu0 %v4031_v51, %s9769_s30  ;;  %8565 = vmatprep.subr.bf16.mxu1 %v9199_v32  ;;  %v1148_v61 = vsel %vm664_vm1, %v9524_v2, %v10469_v34  ;;  %v1188_v34 = vsel %vm713_vm2, %v1145_v26, %v1108_v18  ;;  %v7933_v51 = vld [vmem:[%s9887_s26 + $0xd8] sm:$0xe]  ;;  %v9206_v18 = vld [vmem:[%s12900_s1 + $0x20] sm:$0xff]   ;;  %v10720_v26 = vld [vmem:[%s9887_s26 + $0xac] sm:$0x1]  ;;  %v1779_v10 = vshll.u32 %v10701_v30, 16 }
 0x118   : > { %v10667_v55 = vpop.permute.xlu1 %3268  ;;  %8682 = vmatpush3.bf16.msra.mxu0 %v10404_v23  ;;  %v9211_v23 = vld [vmem:[%s12900_s1 + $0x128] sm:$0xff]   ;;  %v7934_v2 = vld [vmem:[%s9887_s26 + $0xe0] sm:$0xe]  ;;  %v9218_v36 = vld [vmem:[%s12900_s1 + $0x138] sm:$0xff]  }
 0x119   : > { %v1110_v38 = vpop.permute.xlu0 %1109  ;;  %8683 = vmatprep.subr.bf16.mxu0 %v9207_v3 }
 0x11a   : > { %v1190_v1 = vsel %vm713_vm2, %v1148_v61, %v1110_v38  ;;  %4061 = vrot.lane.b32.xlu1 %v4034_v11, %s9769_s30  ;;  %8566 = vmatpush3.bf16.msra.mxu1 %v9199_v32  ;;  %v7966_v61 = vcombine.low %v7934_v2, %v10625_v60  ;;  %v9210_v38 = vld [vmem:[%s12900_s1 + $0x28] sm:$0xff]   ;;  %v3398_v60 = vsel %vm664_vm1, %v9526_v16, %v10620_v12  ;;  %v7531_v16 = vld [vmem:[%s9887_s26 + $0x20] sm:$0xf] }
 0x11b   : > { %v7484_v39 = vcombine.low %v1188_v34, %v1190_v1  ;;  %4059 = vrot.lane.b32.xlu0 %v4033_v52, %s9769_s30  ;;  %8567 = vmatprep.subr.bf16.mxu1 %v9203_v33  ;;  %v7965_v52 = vcombine.low %v7933_v51, %v10586_v54  ;;  %v3935_v54 = vor.u32 %v3934_v58, %v3930_v40  ;;  %v9527_v34 = vld [vmem:[%s9887_s26 + $0x80] sm:$0xf]  ;;  %v4035_v51 = vrot.slane %v7964_v63, 1  ;;  %v10748_v58 = vld [vmem:[%s9887_s26 + $0x2c] sm:$0x1] }
 0x11c   : > { %v3361_v11 = vpop.permute.xlu1 %3360  ;;  %8684 = vmatpush3.bf16.msra.mxu0 %v9207_v3  ;;  %v10713_v3 = vcombine.low %v7529_v56, %v10693_v4  ;;  %v3401_v1 = vsel %vm664_vm1, %v9527_v34, %v10653_v46  ;;  %v10744_v46 = vcombine.low %v8008_v22, %v10720_v26  ;;  %v4037_v7 = vrot.slane %v7966_v61, 1 }
 0x11d   : > { %8549 = vmatprep.mubr.msk.bf16.mxu1 %vm1307_vm3, %v7484_v39  ;;  %v10704_v32 = vpop.permute.xlu0 %3270  ;;  %8685 = vmatprep.subr.bf16.mxu0 %v9211_v23  ;;  %v4036_v40 = vrot.slane %v7965_v52, 1  ;;  %v3441_v39 = vsel %vm713_vm2, %v3398_v60, %v3361_v11  ;;  %v4038_v11 = vrot.slane %v7967_v6, 1  ;;  %v9214_v52 = vld [vmem:[%s12900_s1 + $0x30] sm:$0x3f]   ;;  %v1781_v22 = vrot.slane %v1779_v10, 1 }
 0x11e   : > { %3969 = vrot.lane.b32.xlu1 %v3928_v42, %s9768_s27  ;;  %8568 = vmatpush3.bf16.msra.mxu1 %v9203_v33  ;;  %v8007_v33 = vld [vmem:[%s9887_s26 + $0xa0] sm:$0xf]  ;;  %v1772_v12 = vshll.u32 %v10713_v3, 16  ;;  %v9529_v6 = vld [vmem:[%s9887_s26 + $0x38] sm:$0xf]  ;;  %v1770_v34 = vshrl.u32 %v10713_v3, 16 }
 0x11f   : > { %3967 = vrot.lane.b32.xlu0 %v3921_v0, %s9768_s27  ;;  %8569 = vmatprep.subr.bf16.mxu1 %v9206_v18  ;;  %v7532_v0 = vld [vmem:[%s9887_s26 + $0x28] sm:$0xf]  ;;  %v10752_v2 = vcombine.low %v8007_v33, %v10728_v44  ;;  %v9528_v60 = vld [vmem:[%s9887_s26 + $0x40] sm:$0xf]  ;;  %v1151_v61 = vsel %vm664_vm1, %v9529_v6, %v10487_v29 }
 0x120   : > { %v1112_v42 = vpop.permute.xlu1 %1111  ;;  %8686 = vmatpush3.bf16.msra.mxu0 %v9211_v23  ;;  %v1774_v29 = vrot.slane %v1772_v12, 1  ;;  %v9530_v12 = vld [vmem:[%s9887_s26 + $0x88] sm:$0xf] }
 0x121   : > { %v3363_v24 = vpop.permute.xlu0 %3362  ;;  %8687 = vmatprep.subr.bf16.mxu0 %v9215_v17  ;;  %v1192_v10 = vsel %vm713_vm2, %v1151_v61, %v1112_v42  ;;  %v1539_v42 = vsel %vm1332_vm0, %v9214_v52, 0 }
 0x122   : > { %v3443_v23 = vsel %vm713_vm2, %v3401_v1, %v3363_v24  ;;  %3973 = vrot.lane.b32.xlu1 %v3942_v35, %s9768_s27  ;;  %8570 = vmatpush3.bf16.msra.mxu1 %v9206_v18  ;;  %v1777_v35 = vshrl.u32 %v10701_v30, 16  ;;  %v10760_v18 = vld [vmem:[%s9887_s26 + $0x24] sm:$0x1]  ;;  %v10771_v30 = vcombine.low %v7532_v0, %v10748_v58  ;;  %v4529_v1 = vshll.u32 %v10744_v46, 16  ;;  %v9531_v0 = vld [vmem:[%s9887_s26 + $0x90] sm:$0xf] }
 0x123   : > { %v7864_v56 = vcombine.low %v3441_v39, %v3443_v23  ;;  %3971 = vrot.lane.b32.xlu0 %v3935_v54, %s9768_s27  ;;  %8571 = vmatprep.subr.bf16.mxu1 %v9210_v38  ;;  %v1154_v54 = vsel %vm664_vm1, %v9528_v60, %v10480_v53  ;;  %v4522_v24 = vshll.u32 %v10752_v2, 16  ;;  %v10783_v39 = vcombine.low %v7531_v16, %v10760_v18 }
 0x124   : > { %v3365_v63 = vpop.permute.xlu1 %3364  ;;  %8688 = vmatpush3.bf16.msra.mxu0 %v9215_v17  ;;  %v9221_v17 = vld [vmem:[%s12900_s1 + $0x140] sm:$0xff]   ;;  %v4527_v16 = vshrl.u32 %v10744_v46, 16  ;;  %v1793_v60 = vshll.u32 %v10771_v30, 16 }
 0x125   : > { %8669 = vmatprep.mubr.msk.bf16.mxu0 %vm1307_vm3, %v7864_v56  ;;  %v1114_v33 = vpop.permute.xlu0 %1113  ;;  %8689 = vmatprep.subr.bf16.mxu0 %v9218_v36  ;;  %v3407_v56 = vsel %vm664_vm1, %v9531_v0, %v10704_v32  ;;  %v4524_v6 = vrot.slane %v4522_v24, 1  ;;  %v1786_v61 = vshll.u32 %v10783_v39, 16  ;;  %v1784_v24 = vshrl.u32 %v10783_v39, 16 }
 0x126   : > { %v1194_v53 = vsel %vm713_vm2, %v1154_v54, %v1114_v33  ;;  %4065 = vrot.lane.b32.xlu1 %v4036_v40, %s9769_s30  ;;  %8572 = vmatpush3.bf16.msra.mxu1 %v9210_v38  ;;  %v10790_v40 = vld [vmem:[%s12900_s1 + $0x70] sm:$0xff]   ;;  %v1782_v38 = vor.u32 %v1781_v22, %v1777_v35  ;;  %v4531_v35 = vrot.slane %v4529_v1, 1  ;;  %v4520_v22 = vshrl.u32 %v10752_v2, 16  ;;  %v8010_v33 = vld [vmem:[%s9887_s26 + $0xb8] sm:$0xf] }
 0x127   : > { %v7485_v3 = vcombine.low %v1192_v10, %v1194_v53  ;;  %4063 = vrot.lane.b32.xlu0 %v4035_v51, %s9769_s30  ;;  %8944 = vmatprep.subr.msk.bf16.mxu1 %vm1332_vm0, %v9214_v52  ;;  %v3404_v51 = vsel %vm664_vm1, %v9530_v12, %v10667_v55  ;;  %v1775_v54 = vor.u32 %v1774_v29, %v1770_v34  ;;  %v10814_v10 = vld [vmem:[%s9887_s26 + $0xbc] sm:$0x1]  ;;  %v8009_v53 = vld [vmem:[%s9887_s26 + $0xb0] sm:$0xf]  ;;  %v1795_v2 = vrot.slane %v1793_v60, 1 }
 0x128   : > { %v10792_v23 = vpop.permute.xlu1 %3272  ;;  %8690 = vmatpush3.bf16.msra.mxu0 %v9218_v36  ;;  %v9224_v36 = vld [vmem:[%s12900_s1 + $0x148] sm:$0x3f]   ;;  %v3445_v55 = vsel %vm713_vm2, %v3404_v51, %v3365_v63  ;;  %v10828_v29 = vld [vmem:[%s12900_s1 + $0x150] sm:$0xff]   ;;  %v8058_v1 = vcombine.low %v8010_v33, %v10814_v10  ;;  %v7562_v12 = vld [vmem:[%s9887_s26 + $0x18] sm:$0xe] }
 0x129   : > { %8550 = vmatmul.mubr.msk.bf16.gmra.mrb[4].mxu1 %vm1307_vm3, %v7485_v3  ;;  %v3367_v52 = vpop.permute.xlu0 %3366  ;;  %8691 = vmatprep.subr.bf16.mxu0 %v9221_v17  ;;  %v10819_v3 = vld [vmem:[%s9887_s26 + $0xb4] sm:$0x1]  ;;  %v4272_v34 = vsel %vm1332_vm0, %v9224_v36, 0 }
 0x12a   : > { %v3447_v32 = vsel %vm713_vm2, %v3407_v56, %v3367_v52  ;;  %4069 = vrot.lane.b32.xlu1 %v4038_v11, %s9769_s30  ;;  %8574 = vmatpush3.bf16.msra.mxu1 %v1539_v42  ;;  %v1788_v42 = vrot.slane %v1786_v61, 1  ;;  %v8057_v51 = vcombine.low %v8009_v53, %v10819_v3  ;;  %v7561_v56 = vld [vmem:[%s9887_s26 + $0x10] sm:$0xe]  ;;  %v9532_v52 = vld [vmem:[%s9887_s26 + $0x60] sm:$0xf] }
 0x12b   : > { %v7865_v46 = vcombine.low %v3445_v55, %v3447_v32  ;;  %4067 = vrot.lane.b32.xlu0 %v4037_v7, %s9769_s30  ;;  %8591 = vmatprep.subr.bf16.mxu1 %v10790_v40  ;;  %v1791_v7 = vshrl.u32 %v10771_v30, 16  ;;  %v4525_v30 = vor.u32 %v4524_v6, %v4520_v22  ;;  %v4543_v22 = vshll.u32 %v8058_v1, 16  ;;  %v8040_v53 = vld [vmem:[%s9887_s26 + $0xa8] sm:$0xe] }
 0x12c   : > { %v1116_v63 = vpop.permute.xlu1 %1115  ;;  %8692 = vmatpush3.bf16.msra.mxu0 %v9221_v17  ;;  %v4532_v17 = vor.u32 %v4531_v35, %v4527_v16  ;;  %v9533_v16 = vld [vmem:[%s9887_s26 + $0x58] sm:$0xf]  ;;  %v7594_v35 = vcombine.low %v7562_v12, %v10679_v20  ;;  %v4541_v20 = vshrl.u32 %v8058_v1, 16 }
 0x12d   : > { %8670 = vmatmul.mubr.msk.bf16.gmra.mrb[4].mxu0 %vm1307_vm3, %v7865_v46  ;;  %v3275_v11 = vpop.permute.xlu0 %3274  ;;  %8948 = vmatprep.subr.msk.bf16.mxu0 %vm1332_vm0, %v9224_v36  ;;  %v1157_v60 = vsel %vm664_vm1, %v9533_v16, %v10507_v8  ;;  %v1796_v55 = vor.u32 %v1795_v2, %v1791_v7  ;;  %v7593_v8 = vcombine.low %v7561_v56, %v10693_v4  ;;  %v4534_v2 = vshrl.u32 %v8057_v51, 16 }
 0x12e   : > { %1883 = vrot.lane.b32.xlu1 %v1782_v38, %s9768_s27  ;;  %v1160_v38 = vsel %vm664_vm1, %v9532_v52, %v10500_v49  ;;  %v1196_v39 = vsel %vm713_vm2, %v1157_v60, %v1116_v63  ;;  %v1789_v49 = vor.u32 %v1788_v42, %v1784_v24  ;;  %v1962_v33 = vrot.slane %v7594_v35, 1  ;;  %v9535_v42 = vld [vmem:[%s9887_s26 + $0xb0] sm:$0xf]  ;;  %v7564_v52 = vld [vmem:[%s9887_s26 + $0x28] sm:$0xe] }
 0x12f   : > { %1881 = vrot.lane.b32.xlu0 %v1775_v54, %s9768_s27  ;;  %v4536_v54 = vshll.u32 %v8057_v51, 16  ;;  %v4545_v63 = vrot.slane %v4543_v22, 1  ;;  %v1961_v7 = vrot.slane %v7593_v8, 1  ;;  %v3413_v12 = vsel %vm664_vm1, %v9535_v42, %v3275_v11  ;;  %v7533_v35 = vld [vmem:[%s9887_s26 + $0x30] sm:$0xf] }
 0x130   : > { %v10836_v0 = vpop.permute.xlu1 %3276  ;;  %8694 = vmatpush3.bf16.msra.mxu0 %v4272_v34  ;;  %v8072_v56 = vcombine.low %v8040_v53, %v10720_v26  ;;  %v10877_v22 = vld [vmem:[%s9887_s26 + $0x34] sm:$0x1]  ;;  %v9537_v8 = vld [vmem:[%s9887_s26 + $0x68] sm:$0xf]  ;;  %v10893_v53 = vld [vmem:[%s9887_s26 + $0xcc] sm:$0x1] }
 0x131   : > { %v1118_v36 = vpop.permute.xlu0 %1117  ;;  %8711 = vmatprep.subr.bf16.mxu0 %v10828_v29  ;;  %v4538_v34 = vrot.slane %v4536_v54, 1  ;;  %v4546_v16 = vor.u32 %v4545_v63, %v4541_v20  ;;  %v8042_v20 = vld [vmem:[%s9887_s26 + $0xb8] sm:$0xe]  ;;  %v8012_v63 = vld [vmem:[%s9887_s26 + $0xc8] sm:$0xf] }
 0x132   : > { %v1198_v32 = vsel %vm713_vm2, %v1160_v38, %v1118_v36  ;;  %4633 = vrot.lane.b32.xlu1 %v4532_v17, %s9768_s27  ;;  %v8039_v17 = vld [vmem:[%s9887_s26 + $0xa0] sm:$0xe]  ;;  %v7534_v36 = vld [vmem:[%s9887_s26 + $0x38] sm:$0xf]  ;;  %v10901_v42 = vld [vmem:[%s9887_s26 + $0xc4] sm:$0x1] }
 0x133   : > { %v7486_v46 = vcombine.low %v1196_v39, %v1198_v32  ;;  %4631 = vrot.lane.b32.xlu0 %v4525_v30, %s9768_s27  ;;  %v9534_v30 = vld [vmem:[%s9887_s26 + $0xa8] sm:$0xf]  ;;  %v4539_v11 = vor.u32 %v4538_v34, %v4534_v2  ;;  %v8071_v60 = vcombine.low %v8039_v17, %v10728_v44  ;;  %v7596_v39 = vcombine.low %v7564_v52, %v10748_v58  ;;  %v7563_v32 = vld [vmem:[%s9887_s26 + $0x20] sm:$0xe]  ;;  %v8041_v34 = vld [vmem:[%s9887_s26 + $0xb0] sm:$0xe] }
 0x134   : > { %v3369_v6 = vpop.permute.xlu1 %3368  ;;  %v3410_v24 = vsel %vm664_vm1, %v9534_v30, %v10792_v23  ;;  %v1163_v44 = vsel %vm664_vm1, %v9537_v8, %v10517_v21  ;;  %v7595_v2 = vcombine.low %v7563_v32, %v10760_v18  ;;  %v10919_v32 = vld [vmem:[%s9887_s26 + $0x4c] sm:$0x1] }
 0x135   : > { %8553 = vmatprep.mubr.msk.bf16.mxu1 %vm1307_vm3, %v7486_v46  ;;  %v3279_v61 = vpop.permute.xlu0 %3278  ;;  %v3449_v51 = vsel %vm713_vm2, %v3410_v24, %v3369_v6  ;;  %v9536_v46 = vld [vmem:[%s9887_s26 + $0x70] sm:$0xf]  ;;  %v4712_v6 = vrot.slane %v8072_v56, 1  ;;  %v1964_v30 = vrot.slane %v7596_v39, 1  ;;  %v8011_v24 = vld [vmem:[%s9887_s26 + $0xc0] sm:$0xf] }
 0x136   : > { %1887 = vrot.lane.b32.xlu1 %v1796_v55, %s9768_s27  ;;  %v10871_v55 = vld [vmem:[%s9887_s26 + $0x3c] sm:$0x1]  ;;  %v9539_v56 = vld [vmem:[%s9887_s26 + $0xc0] sm:$0xf]  ;;  %v8059_v39 = vcombine.low %v8011_v24, %v10901_v42 }
 0x137   : > { %1885 = vrot.lane.b32.xlu0 %v1789_v49, %s9768_s27  ;;  %v1166_v49 = vsel %vm664_vm1, %v9536_v46, %v10515_v50  ;;  %v7582_v50 = vcombine.low %v7534_v36, %v10871_v55  ;;  %v3419_v52 = vsel %vm664_vm1, %v9539_v56, %v3279_v61  ;;  %v10925_v46 = vld [vmem:[%s9887_s26 + $0x44] sm:$0x1] }
 0x138   : > { %v1120_v4 = vpop.permute.xlu1 %1119 }
 0x139   : > { %v3371_v1 = vpop.permute.xlu0 %3370  ;;  %v1200_v58 = vsel %vm713_vm2, %v1163_v44, %v1120_v4  ;;  %v7581_v4 = vcombine.low %v7533_v35, %v10877_v22 }
 0x13a   : > { %v3451_v38 = vsel %vm713_vm2, %v3413_v12, %v3371_v1  ;;  %1979 = vrot.lane.b32.xlu1 %v1962_v33, %s9769_s30  ;;  %v9538_v12 = vld [vmem:[%s9887_s26 + $0xb8] sm:$0xf] }
 0x13b   : > { %v7866_v23 = vcombine.low %v3449_v51, %v3451_v38  ;;  %1977 = vrot.lane.b32.xlu0 %v1961_v7, %s9769_s30  ;;  %v4711_v7 = vrot.slane %v8071_v60, 1  ;;  %v3416_v1 = vsel %vm664_vm1, %v9538_v12, %v10836_v0  ;;  %v8074_v51 = vcombine.low %v8042_v20, %v10814_v10  ;;  %v7536_v10 = vld [vmem:[%s9887_s26 + $0x48] sm:$0xf] }
 0x13c   : > { %v3373_v26 = vpop.permute.xlu1 %3372  ;;  %v8060_v38 = vcombine.low %v8012_v63, %v10893_v53  ;;  %v8073_v0 = vcombine.low %v8041_v34, %v10819_v3  ;;  %v1963_v60 = vrot.slane %v7595_v2, 1  ;;  %v1800_v36 = vshll.u32 %v7581_v4, 16 }
 0x13d   : > { %8673 = vmatprep.mubr.msk.bf16.mxu0 %vm1307_vm3, %v7866_v23  ;;  %v1122_v54 = vpop.permute.xlu0 %1121  ;;  %v4714_v3 = vrot.slane %v8074_v51, 1  ;;  %v4550_v63 = vshll.u32 %v8059_v39, 16  ;;  %v9540_v51 = vld [vmem:[%s9887_s26 + $0x80] sm:$0xf] }
 0x13e   : > { %v1202_v33 = vsel %vm713_vm2, %v1166_v49, %v1122_v54  ;;  %4637 = vrot.lane.b32.xlu1 %v4546_v16, %s9768_s27  ;;  %v3453_v16 = vsel %vm713_vm2, %v3416_v1, %v3373_v26  ;;  %v7535_v26 = vld [vmem:[%s9887_s26 + $0x40] sm:$0xf]  ;;  %v4557_v8 = vshll.u32 %v8060_v38, 16  ;;  %v4713_v44 = vrot.slane %v8073_v0, 1  ;;  %v10948_v0 = vld [vmem:[%s9887_s26 + $0xd4] sm:$0x1] }
 0x13f   : > { %v7487_v21 = vcombine.low %v1200_v58, %v1202_v33  ;;  %4635 = vrot.lane.b32.xlu0 %v4539_v11, %s9768_s27  ;;  %v1807_v11 = vshll.u32 %v7582_v50, 16  ;;  %v1805_v54 = vshrl.u32 %v7582_v50, 16  ;;  %v7584_v58 = vcombine.low %v7536_v10, %v10919_v32 }
 0x140   : > { %v1030_v17 = vpop.permute.xlu1 %1029  ;;  %v1798_v33 = vshrl.u32 %v7581_v4, 16  ;;  %v1802_v20 = vrot.slane %v1800_v36, 1  ;;  %v4555_v34 = vshrl.u32 %v8060_v38, 16  ;;  %v4559_v50 = vrot.slane %v4557_v8, 1 }
 0x141   : > { %8554 = vmatmul.mubr.msk.bf16.gmra.mrb[8].mxu1 %vm1307_vm3, %v7487_v21  ;;  %v3375_v18 = vpop.permute.xlu0 %3374  ;;  %v7583_v21 = vcombine.low %v7535_v26, %v10925_v46  ;;  %v4548_v4 = vshrl.u32 %v8059_v39, 16  ;;  %v1821_v24 = vshll.u32 %v7584_v58, 16  ;;  %v4552_v1 = vrot.slane %v4550_v63, 1 }
 0x142   : > { %v3455_v23 = vsel %vm713_vm2, %v3419_v52, %v3375_v18  ;;  %4729 = vrot.lane.b32.xlu1 %v4712_v6, %s9769_s30  ;;  %v1809_v6 = vrot.slane %v1807_v11, 1  ;;  %v1803_v12 = vor.u32 %v1802_v20, %v1798_v33  ;;  %v8014_v52 = vld [vmem:[%s9887_s26 + $0xd8] sm:$0xf]  ;;  %v10942_v18 = vld [vmem:[%s9887_s26 + $0xdc] sm:$0x1]  ;;  %v4560_v39 = vor.u32 %v4559_v50, %v4555_v34 }
 0x143   : > { %v7867_v61 = vcombine.low %v3453_v16, %v3455_v23  ;;  %4727 = vrot.lane.b32.xlu0 %v4711_v7, %s9769_s30  ;;  %v1814_v56 = vshll.u32 %v7583_v21, 16  ;;  %v1172_v16 = vsel %vm664_vm1, %v9540_v51, %v1030_v17  ;;  %v8013_v23 = vld [vmem:[%s9887_s26 + $0xd0] sm:$0xf]  ;;  %v9541_v11 = vld [vmem:[%s9887_s26 + $0x78] sm:$0xf]  ;;  %v1819_v10 = vshrl.u32 %v7584_v58, 16 }
 0x144   : > { %v10921_v35 = vpop.permute.xlu1 %3282  ;;  %v1823_v17 = vrot.slane %v1821_v24, 1  ;;  %v8062_v8 = vcombine.low %v8014_v52, %v10942_v18  ;;  %v8061_v33 = vcombine.low %v8013_v23, %v10948_v0  ;;  %v7565_v58 = vld [vmem:[%s9887_s26 + $0x30] sm:$0xe]  ;;  %v9543_v52 = vld [vmem:[%s9887_s26 + $0x8] sm:$0xf] }
 0x145   : > { %8674 = vmatmul.mubr.msk.bf16.gmra.mrb[8].mxu0 %vm1307_vm3, %v7867_v61  ;;  %v10928_v49 = vpop.permute.xlu0 %3280  ;;  %v1169_v61 = vsel %vm664_vm1, %v9541_v11, %v10523_v27  ;;  %v1816_v27 = vrot.slane %v1814_v56, 1  ;;  %v670_v51 = vsel %vm664_vm1, %v9543_v52, %v10246_v15 }
 0x146   : > { %1983 = vrot.lane.b32.xlu1 %v1964_v30, %s9769_s30  ;;  %v1810_v30 = vor.u32 %v1809_v6, %v1805_v54  ;;  %v4553_v54 = vor.u32 %v4552_v1, %v4548_v4  ;;  %v7566_v6 = vld [vmem:[%s9887_s26 + $0x38] sm:$0xe]  ;;  %v4571_v50 = vshll.u32 %v8062_v8, 16  ;;  %v7597_v4 = vcombine.low %v7565_v58, %v10877_v22 }
 0x147   : > { %1981 = vrot.lane.b32.xlu0 %v1963_v60, %s9769_s30  ;;  %v7598_v34 = vcombine.low %v7566_v6, %v10871_v55  ;;  %v4564_v24 = vshll.u32 %v8061_v33, 16  ;;  %v4569_v11 = vshrl.u32 %v8062_v8, 16  ;;  %v9547_v6 = vld [vmem:[%s9887_s26 + $0x88] sm:$0xf] }
 0x148   : > { %v10934_v7 = vpop.permute.xlu1 %1033 }
 0x149   : > { %v10936_v2 = vpop.permute.xlu0 %1031 }
 0x14a   : > { %4733 = vrot.lane.b32.xlu1 %v4714_v3, %s9769_s30  ;;  %v1812_v3 = vshrl.u32 %v7583_v21, 16  ;;  %v1824_v21 = vor.u32 %v1823_v17, %v1819_v10  ;;  %v9545_v10 = vld [vmem:[%s9887_s26] sm:$0xf]  ;;  %v717_v17 = vsel %vm713_vm2, %v670_v51, %v10335_v43 }
 0x14b   : > { %4731 = vrot.lane.b32.xlu0 %v4713_v44, %s9769_s30  ;;  %v7567_v51 = vld [vmem:[%s9887_s26 + $0x40] sm:$0xe] }
 0x14c   : > { %v1126_v38 = vpop.permute.xlu1 %1125 }
 0x14d   : > { %v1206_v60 = vsel %vm713_vm2, %v1172_v16, %v1126_v38  ;;  %v1124_v36 = vpop.permute.xlu0 %1123  ;;  %v9544_v16 = vld [vmem:[%s9887_s26 + $0xc8] sm:$0xf] }
 0x14e   : > { %v1204_v26 = vsel %vm713_vm2, %v1169_v61, %v1124_v36  ;;  %1891 = vrot.lane.b32.xlu1 %v1810_v30, %s9768_s27  ;;  %v1817_v30 = vor.u32 %v1816_v27, %v1812_v3  ;;  %v3422_v55 = vsel %vm664_vm1, %v9544_v16, %v10928_v49  ;;  %v4573_v61 = vrot.slane %v4571_v50, 1  ;;  %v9546_v3 = vld [vmem:[%s9887_s26 + $0x90] sm:$0xf]  ;;  %v7568_v50 = vld [vmem:[%s9887_s26 + $0x48] sm:$0xe] }
 0x14f   : > { %v7488_v44 = vcombine.low %v1204_v26, %v1206_v60  ;;  %1889 = vrot.lane.b32.xlu0 %v1803_v12, %s9768_s27  ;;  %v9542_v12 = vld [vmem:[%s9887_s26 + $0xd0] sm:$0xf]  ;;  %v8044_v60 = vld [vmem:[%s9887_s26 + $0xc8] sm:$0xe]  ;;  %v1965_v36 = vrot.slane %v7597_v4, 1  ;;  %v4566_v49 = vrot.slane %v4564_v24, 1  ;;  %v667_v26 = vsel %vm664_vm1, %v9545_v10, %v10233_v9 }
 0x150   : > { %v3287_v20 = vpop.permute.xlu1 %3286  ;;  %v3425_v1 = vsel %vm664_vm1, %v9542_v12, %v10921_v35  ;;  %v1966_v35 = vrot.slane %v7598_v34, 1  ;;  %v1178_v8 = vsel %vm664_vm1, %v9546_v3, %v10934_v7  ;;  %v715_v27 = vsel %vm713_vm2, %v667_v26, %v10338_v48  ;;  %v11006_v4 = vld [vmem:[%s9887_s26 + $0x6c] sm:$0x1]  ;;  %v7537_v16 = vld [vmem:[%s9887_s26 + $0x60] sm:$0xf] }
 0x151   : > { %8557 = vmatprep.mubr.msk.bf16.mxu1 %vm1307_vm3, %v7488_v44  ;;  %v10962_v63 = vpop.permute.xlu0 %3284  ;;  %v1175_v9 = vsel %vm664_vm1, %v9547_v6, %v10936_v2  ;;  %v8076_v7 = vcombine.low %v8044_v60, %v10893_v53  ;;  %v4574_v48 = vor.u32 %v4573_v61, %v4569_v11  ;;  %v9548_v53 = vld [vmem:[%s9887_s26 + $0x10] sm:$0xf]  ;;  %v7505_v12 = vcombine.low %v715_v27, %v717_v17  ;;  %v8046_v61 = vld [vmem:[%s9887_s26 + $0xd8] sm:$0xe]  ;;  %v9553_v3 = vld [vmem:[%s9887_s26 + $0x20] sm:$0xf] }
 0x152   : > { %4641 = vrot.lane.b32.xlu1 %v4560_v39, %s9768_s27  ;;  %v4562_v39 = vshrl.u32 %v8061_v33, 16  ;;  %v673_v24 = vsel %vm664_vm1, %v9548_v53, %v10231_v5  ;;  %v8016_v60 = vld [vmem:[%s9887_s26 + $0xf8] sm:$0xf]  ;;  %v8045_v10 = vld [vmem:[%s9887_s26 + $0xd0] sm:$0xe] }
 0x153   : > { %4639 = vrot.lane.b32.xlu0 %v4553_v54, %s9768_s27  ;;  %v8043_v54 = vld [vmem:[%s9887_s26 + $0xc0] sm:$0xe]  ;;  %v8015_v27 = vld [vmem:[%s9887_s26 + $0xf0] sm:$0xf]  ;;  %v11056_v6 = vld [vmem:[%s9887_s26 + $0xf4] sm:$0x1] }
 0x154   : > { %v3379_v56 = vpop.permute.xlu1 %3378  ;;  %v4567_v2 = vor.u32 %v4566_v49, %v4562_v39  ;;  %v8075_v34 = vcombine.low %v8043_v54, %v10901_v42  ;;  %v9550_v42 = vld [vmem:[%s9887_s26 + $0x18] sm:$0xf]  ;;  %v7599_v49 = vcombine.low %v7567_v51, %v10925_v46  ;;  %v719_v54 = vsel %vm713_vm2, %v673_v24, %v10356_v47  ;;  %v9557_v53 = vld [vmem:[%s9887_s26 + $0x50] sm:$0xf] }
 0x155   : > { %v3459_v38 = vsel %vm713_vm2, %v3425_v1, %v3379_v56  ;;  %v3377_v22 = vpop.permute.xlu0 %3376  ;;  %v9549_v1 = vld [vmem:[%s9887_s26 + $0xe0] sm:$0xf]  ;;  %v691_v24 = vsel %vm664_vm1, %v9557_v53, %v10289_v25  ;;  %v9254_v51 = vld [vmem:[%s12900_s1 + $0x78] sm:$0xff]   ;;  %v9563_v53 = vld [vmem:[%s9887_s26 + $0x70] sm:$0xf] }
 0x156   : > { %v3457_v23 = vsel %vm713_vm2, %v3422_v55, %v3377_v22  ;;  %1895 = vrot.lane.b32.xlu1 %v1824_v21, %s9768_s27  ;;  %v3431_v56 = vsel %vm664_vm1, %v9549_v1, %v3287_v20  ;;  %v11016_v55 = vld [vmem:[%s9887_s26 + $0x64] sm:$0x1]  ;;  %v9551_v22 = vld [vmem:[%s9887_s26 + $0xd8] sm:$0xf]  ;;  %v4715_v39 = vrot.slane %v8075_v34, 1 }
 0x157   : > { %v7868_v15 = vcombine.low %v3457_v23, %v3459_v38  ;;  %1893 = vrot.lane.b32.xlu0 %v1817_v30, %s9768_s27  ;;  %v7538_v30 = vld [vmem:[%s9887_s26 + $0x68] sm:$0xf]  ;;  %v676_v38 = vsel %vm664_vm1, %v9550_v42, %v10244_v19  ;;  %v3428_v5 = vsel %vm664_vm1, %v9551_v22, %v10962_v63  ;;  %v7600_v19 = vcombine.low %v7568_v50, %v10919_v32  ;;  %v9555_v34 = vld [vmem:[%s9887_s26 + $0x30] sm:$0xf]  ;;  %v9556_v50 = vld [vmem:[%s9887_s26 + $0x58] sm:$0xf] }
 0x158   : > { %v1130_v44 = vpop.permute.xlu1 %1129  ;;  %v11032_v63 = vcombine.low %v7538_v30, %v11006_v4  ;;  %v11042_v26 = vcombine.low %v7537_v16, %v11016_v55  ;;  %v9552_v32 = vld [vmem:[%s9887_s26 + $0x28] sm:$0xf]  ;;  %v694_v30 = vsel %vm664_vm1, %v9556_v50, %v10283_v37  ;;  %v11150_v50 = vld [vmem:[%s9887_s26 + $0x104] sm:$0x1] }
 0x159   : > { %v1210_v33 = vsel %vm713_vm2, %v1178_v8, %v1130_v44  ;;  %8677 = vmatprep.mubr.msk.bf16.mxu0 %vm1307_vm3, %v7868_v15  ;;  %v1128_v43 = vpop.permute.xlu0 %1127  ;;  %v11036_v15 = vld [vmem:[%s9887_s26 + $0xfc] sm:$0x1]  ;;  %v682_v17 = vsel %vm664_vm1, %v9552_v32, %v10259_v31  ;;  %v679_v8 = vsel %vm664_vm1, %v9553_v3, %v10261_v41  ;;  %v721_v44 = vsel %vm713_vm2, %v676_v38, %v10354_v62 }
 0x15a   : > { %v1208_v58 = vsel %vm713_vm2, %v1175_v9, %v1128_v43  ;;  %1987 = vrot.lane.b32.xlu1 %v1966_v35, %s9769_s30  ;;  %v4716_v35 = vrot.slane %v8076_v7, 1  ;;  %v725_v9 = vsel %vm713_vm2, %v682_v17, %v10368_v57  ;;  %v723_v31 = vsel %vm713_vm2, %v679_v8, %v10370_v14 }
 0x15b   : > { %v7489_v21 = vcombine.low %v1208_v58, %v1210_v33  ;;  %1985 = vrot.lane.b32.xlu0 %v1965_v36, %s9769_s30  ;;  %v8078_v62 = vcombine.low %v8046_v61, %v10942_v18  ;;  %v11065_v47 = vcombine.low %v8016_v60, %v11036_v15  ;;  %v9554_v33 = vld [vmem:[%s9887_s26 + $0x38] sm:$0xf]  ;;  %v1968_v57 = vrot.slane %v7600_v19, 1  ;;  %v12924_v19 = vld [vmem:[#allocation15_spill] sm:$0xff] }
 0x15c   : > { %v3383_v52 = vpop.permute.xlu1 %3382  ;;  %v688_v43 = vsel %vm664_vm1, %v9554_v33, %v10272_v59  ;;  %v8077_v14 = vcombine.low %v8045_v10, %v10948_v0  ;;  %v1835_v7 = vshll.u32 %v11032_v63, 16  ;;  %v7506_v58 = vcombine.low %v719_v54, %v721_v44  ;;  %v7540_v59 = vld [vmem:[%s9887_s26 + $0x78] sm:$0xf]  ;;  %v9258_v10 = vld [vmem:[%s12900_s1 + $0x80] sm:$0xff]   ;;  %v11138_v33 = vld [vmem:[%s9887_s26 + $0x10c] sm:$0x1] }
 0x15d   : > { %v3463_v23 = vsel %vm713_vm2, %v3431_v56, %v3383_v52  ;;  %8558 = vmatmul.mubr.msk.bf16.gmra.mrb[12].mxu1 %vm1307_vm3, %v7489_v21  ;;  %v3381_v20 = vpop.permute.xlu0 %3380  ;;  %v1967_v18 = vrot.slane %v7599_v49, 1  ;;  %v11076_v21 = vcombine.low %v8015_v27, %v11056_v6  ;;  %v685_v0 = vsel %vm664_vm1, %v9555_v34, %v10275_v45  ;;  %v7539_v56 = vld [vmem:[%s9887_s26 + $0x70] sm:$0xf]  ;;  %v11093_v52 = vld [vmem:[%s9887_s26 + $0x74] sm:$0x1] }
 0x15e   : > { %v3461_v11 = vsel %vm713_vm2, %v3428_v5, %v3381_v20  ;;  %8575 = vmatprep.mubr.msk.bf16.mxu1 %vm1307_vm3, %v7505_v12  ;;  %4645 = vrot.lane.b32.xlu1 %v4574_v48, %s9768_s27  ;;  %v1828_v48 = vshll.u32 %v11042_v26, 16  ;;  %v7507_v12 = vcombine.low %v723_v31, %v725_v9  ;;  %v729_v45 = vsel %vm713_vm2, %v688_v43, %v10379_v13  ;;  %v9560_v43 = vld [vmem:[%s9887_s26 + $0x68] sm:$0xf] }
 0x15f   : > { %v7869_v36 = vcombine.low %v3461_v11, %v3463_v23  ;;  %4643 = vrot.lane.b32.xlu0 %v4567_v2, %s9768_s27  ;;  %v11080_v2 = vld [vmem:[%s9887_s26 + $0x7c] sm:$0x1]  ;;  %v727_v16 = vsel %vm713_vm2, %v685_v0, %v10385_v28  ;;  %v4718_v42 = vrot.slane %v8078_v62, 1  ;;  %v4585_v25 = vshll.u32 %v11065_v47, 16  ;;  %v8017_v0 = vld [vmem:[%s9887_s26 + $0x100] sm:$0xf] }
 0x160   : > { %v3946_v46 = vpop.permute.xlu1 %3945  ;;  %v4717_v38 = vrot.slane %v8077_v14, 1  ;;  %v1833_v22 = vshrl.u32 %v11032_v63, 16  ;;  %v1837_v5 = vrot.slane %v1835_v7, 1  ;;  %v11108_v13 = vcombine.low %v7540_v59, %v11080_v2  ;;  %v12925_v63 = vld [vmem:[#allocation16_spill] sm:$0xff]  ;;  %v9561_v7 = vld [vmem:[%s9887_s26 + $0x60] sm:$0xf] }
 0x161   : > { %8678 = vmatmul.mubr.msk.bf16.gmra.mrb[12].mxu0 %vm1307_vm3, %v7869_v36  ;;  %v3944_v41 = vpop.permute.xlu0 %3943  ;;  %v1826_v28 = vshrl.u32 %v11042_v26, 16  ;;  %v1830_v23 = vrot.slane %v1828_v48, 1  ;;  %v4578_v20 = vshll.u32 %v11076_v21, 16  ;;  %v7508_v11 = vcombine.low %v727_v16, %v729_v45  ;;  %v9558_v36 = vld [vmem:[%s9887_s26 + $0x68] sm:$0xf] }
 0x162   : > { %4737 = vrot.lane.b32.xlu1 %v4716_v35, %s9769_s30  ;;  %v11114_v35 = vcombine.low %v7539_v56, %v11093_v52  ;;  %v733_v61 = vsel %vm713_vm2, %v694_v30, %v12924_v19  ;;  %v731_v60 = vsel %vm713_vm2, %v691_v24, %v12925_v63  ;;  %v9559_v26 = vld [vmem:[%s9887_s26 + $0x60] sm:$0xf]  ;;  %v4583_v3 = vshrl.u32 %v11065_v47, 16  ;;  %v8018_v47 = vld [vmem:[%s9887_s26 + $0x108] sm:$0xf]  ;;  %v12929_v19 = vld [vmem:[#allocation12_spill] sm:$0xff] }
 0x163   : > { %4735 = vrot.lane.b32.xlu0 %v4715_v39, %s9769_s30  ;;  %v4076_v39 = vsel %vm664_vm1, %v9558_v36, %v3946_v46  ;;  %v4587_v8 = vrot.slane %v4585_v25, 1  ;;  %v1838_v54 = vor.u32 %v1837_v5, %v1833_v22  ;;  %v4576_v46 = vshrl.u32 %v11076_v21, 16  ;;  %v9562_v21 = vld [vmem:[%s9887_s26 + $0x78] sm:$0xf]  ;;  %v9262_v30 = vld [vmem:[%s12900_s1 + $0x88] sm:$0xff]   ;;  %v12930_v63 = vld [vmem:[#allocation17_spill] sm:$0xff] }
 0x164   : > { %v3950_v1 = vpop.permute.xlu1 %3949  ;;  %v1849_v27 = vshll.u32 %v11108_v13, 16  ;;  %v1831_v31 = vor.u32 %v1830_v23, %v1826_v28  ;;  %v1842_v62 = vshll.u32 %v11114_v35, 16  ;;  %v7509_v48 = vcombine.low %v731_v60, %v733_v61  ;;  %v7570_v5 = vld [vmem:[%s9887_s26 + $0x68] sm:$0xe]  ;;  %v9259_v28 = vld [vmem:[%s12900_s1 + $0x158] sm:$0xff]  }
 0x165   : > { %8576 = vmatmul.mubr.msk.bf16.vlgmr.msra.gmra.mrb[0].mxu1 %vm1307_vm3, %v7506_v58  ;;  %v3948_v37 = vpop.permute.xlu0 %3947  ;;  %v12927_v58 = vld [vmem:[#allocation10_spill] sm:$0xff]  ;;  %v4082_v59 = vsel %vm664_vm1, %v9562_v21, %v3950_v1  ;;  %v4588_v56 = vor.u32 %v4587_v8, %v4583_v3  ;;  %v9564_v23 = vld [vmem:[%s9887_s26 + $0x78] sm:$0xf]  ;;  %v9266_v8 = vld [vmem:[%s12900_s1 + $0x90] sm:$0xff]  }
 0x166   : > { %8579 = vmatprep.mubr.msk.bf16.mxu1 %vm1307_vm3, %v7507_v12  ;;  %1991 = vrot.lane.b32.xlu1 %v1968_v57, %s9769_s30  ;;  %v12926_v57 = vld [vmem:[#allocation9_spill] sm:$0xff]  ;;  %v4079_v24 = vsel %vm664_vm1, %v9563_v53, %v3948_v37  ;;  %v1851_v16 = vrot.slane %v1849_v27, 1  ;;  %v1840_v37 = vshrl.u32 %v11114_v35, 16  ;;  %v1844_v22 = vrot.slane %v1842_v62, 1  ;;  %v12931_v36 = vld [vmem:[#allocation18_spill] sm:$0xff] }
 0x167   : > { %1989 = vrot.lane.b32.xlu0 %v1967_v18, %s9769_s30  ;;  %8592 = vmatpush3.bf16.msra.mxu1 %v10790_v40  ;;  %v4073_v40 = vsel %vm664_vm1, %v9559_v26, %v3944_v41  ;;  %v4580_v41 = vrot.slane %v4578_v20, 1  ;;  %v700_v14 = vsel %vm664_vm1, %v9560_v43, %v12926_v57  ;;  %v697_v18 = vsel %vm664_vm1, %v9561_v7, %v12927_v58  ;;  %v12928_v20 = vld [vmem:[#allocation11_spill] sm:$0xff]  ;;  %v7569_v26 = vld [vmem:[%s9887_s26 + $0x60] sm:$0xe]  ;;  %v12935_v7 = vld [vmem:[#allocation14_spill] sm:$0xff] }
 0x168   : > { %v4042_v49 = vpop.permute.xlu1 %4041  ;;  %8593 = vmatprep.subr.bf16.mxu1 %v9254_v51  ;;  %v706_v35 = vsel %vm664_vm1, %v9564_v23, %v12928_v20  ;;  %v737_v60 = vsel %vm713_vm2, %v700_v14, %v12930_v63  ;;  %v9263_v43 = vld [vmem:[%s12900_s1 + $0x160] sm:$0xff]  }
 0x169   : > { %v4122_v32 = vsel %vm713_vm2, %v4076_v39, %v4042_v49  ;;  %v4040_v17 = vpop.permute.xlu0 %4039  ;;  %v735_v39 = vsel %vm713_vm2, %v697_v18, %v12931_v36  ;;  %v12934_v57 = vld [vmem:[#allocation13_spill] sm:$0xff]  ;;  %v9270_v18 = vld [vmem:[%s12900_s1 + $0x98] sm:$0xff]  }
 0x16a   : > { %v4120_v44 = vsel %vm713_vm2, %v4073_v40, %v4040_v17  ;;  %4741 = vrot.lane.b32.xlu1 %v4718_v42, %s9769_s30  ;;  %v11166_v42 = vcombine.low %v8018_v47, %v11138_v33  ;;  %v12932_v40 = vld [vmem:[#allocation19_spill] sm:$0xff]  ;;  %v7510_v27 = vcombine.low %v735_v39, %v737_v60  ;;  %v9567_v14 = vld [vmem:[%s9887_s26 + $0x80] sm:$0xf]  ;;  %v11246_v39 = vld [vmem:[%s9887_s26 + $0x8c] sm:$0x1] }
 0x16b   : > { %v7982_v9 = vcombine.low %v4120_v44, %v4122_v32  ;;  %4739 = vrot.lane.b32.xlu0 %v4717_v38, %s9769_s30  ;;  %8594 = vmatpush3.bf16.msra.mxu1 %v9254_v51  ;;  %v1847_v51 = vshrl.u32 %v11108_v13, 16  ;;  %v4581_v38 = vor.u32 %v4580_v41, %v4576_v46  ;;  %v11171_v13 = vcombine.low %v8017_v0, %v11150_v50  ;;  %v12933_v32 = vld [vmem:[#allocation20_spill] sm:$0xff] }
 0x16c   : > { %v4046_v34 = vpop.permute.xlu1 %4045  ;;  %8595 = vmatprep.subr.bf16.mxu1 %v9258_v10  ;;  %v4599_v46 = vshll.u32 %v11166_v42, 16  ;;  %v709_v58 = vsel %vm664_vm1, %v9567_v14, %v12935_v7  ;;  %v8049_v7 = vld [vmem:[%s9887_s26 + $0x100] sm:$0xe] }
 0x16d   : > { %v4126_v12 = vsel %vm713_vm2, %v4082_v59, %v4046_v34  ;;  %8580 = vmatmul.mubr.msk.bf16.gmra.mrb[4].mxu1 %vm1307_vm3, %v7508_v11  ;;  %8695 = vmatprep.mubr.msk.bf16.mxu0 %vm1307_vm3, %v7982_v9  ;;  %v4044_v1 = vpop.permute.xlu0 %4043  ;;  %v9565_v11 = vld [vmem:[%s9887_s26 + $0x70] sm:$0xf]  ;;  %v1852_v44 = vor.u32 %v1851_v16, %v1847_v51  ;;  %v1845_v9 = vor.u32 %v1844_v22, %v1840_v37  ;;  %v4592_v41 = vshll.u32 %v11171_v13, 16  ;;  %v9568_v51 = vld [vmem:[%s9887_s26 + $0x88] sm:$0xf] }
 0x16e   : > { %v4124_v45 = vsel %vm713_vm2, %v4079_v24, %v4044_v1  ;;  %8583 = vmatprep.mubr.msk.bf16.mxu1 %vm1307_vm3, %v7509_v48  ;;  %1899 = vrot.lane.b32.xlu1 %v1838_v54, %s9768_s27  ;;  %v703_v61 = vsel %vm664_vm1, %v9565_v11, %v12929_v19  ;;  %v7602_v54 = vcombine.low %v7570_v5, %v11006_v4  ;;  %v9566_v4 = vld [vmem:[%s9887_s26 + $0x88] sm:$0xf]  ;;  %v12936_v48 = vld [vmem:[#allocation21_spill] sm:$0xff]  ;;  %v4597_v34 = vshrl.u32 %v11166_v42, 16  ;;  %v8047_v37 = vld [vmem:[%s9887_s26 + $0xf0] sm:$0xe] }
 0x16f   : > { %v7983_v25 = vcombine.low %v4124_v45, %v4126_v12  ;;  %1897 = vrot.lane.b32.xlu0 %v1831_v31, %s9768_s27  ;;  %8596 = vmatpush3.bf16.msra.mxu1 %v9258_v10  ;;  %v741_v10 = vsel %vm713_vm2, %v706_v35, %v12932_v40  ;;  %v739_v17 = vsel %vm713_vm2, %v703_v61, %v12933_v32  ;;  %v4601_v0 = vrot.slane %v4599_v46, 1  ;;  %v9267_v42 = vld [vmem:[%s12900_s1 + $0x168] sm:$0xff]   ;;  %v7572_v11 = vld [vmem:[%s9887_s26 + $0x78] sm:$0xe]  ;;  %v7571_v19 = vld [vmem:[%s9887_s26 + $0x70] sm:$0xe] }
 0x170   : > { %v3954_v49 = vpop.permute.xlu1 %3953  ;;  %8597 = vmatprep.subr.bf16.mxu1 %v9262_v30  ;;  %v7601_v31 = vcombine.low %v7569_v26, %v11016_v55  ;;  %v7511_v62 = vcombine.low %v739_v17, %v741_v10  ;;  %v1970_v59 = vrot.slane %v7602_v54, 1  ;;  %v4590_v12 = vshrl.u32 %v11171_v13, 16  ;;  %v9274_v13 = vld [vmem:[%s12900_s1 + $0xa0] sm:$0x3f]   ;;  %v7542_v61 = vld [vmem:[%s9887_s26 + $0x88] sm:$0xf] }
 0x171   : > { %8696 = vmatmul.mubr.msk.bf16.vlgmr.msra.gmra.mrb[0].mxu0 %vm1307_vm3, %v7983_v25  ;;  %v3952_v3 = vpop.permute.xlu0 %3951  ;;  %v4594_v1 = vrot.slane %v4592_v41, 1  ;;  %v4088_v45 = vsel %vm664_vm1, %v9568_v51, %v3954_v49  ;;  %v9569_v25 = vld [vmem:[%s9887_s26 + $0x80] sm:$0xf]  ;;  %v4602_v20 = vor.u32 %v4601_v0, %v4597_v34  ;;  %v8079_v36 = vcombine.low %v8047_v37, %v11056_v6  ;;  %v11250_v26 = vld [vmem:[%s9887_s26 + $0x84] sm:$0x1] }
 0x172   : > { %4649 = vrot.lane.b32.xlu1 %v4588_v56, %s9768_s27  ;;  %8712 = vmatpush3.bf16.msra.mxu0 %v10828_v29  ;;  %v712_v29 = vsel %vm664_vm1, %v9566_v4, %v12934_v57  ;;  %v1969_v24 = vrot.slane %v7601_v31, 1  ;;  %v8048_v56 = vld [vmem:[%s9887_s26 + $0xf8] sm:$0xe]  ;;  %v7541_v49 = vld [vmem:[%s9887_s26 + $0x80] sm:$0xf]  ;;  %v7604_v46 = vcombine.low %v7572_v11, %v11080_v2  ;;  %v7603_v41 = vcombine.low %v7571_v19, %v11093_v52 }
 0x173   : > { %4647 = vrot.lane.b32.xlu0 %v4581_v38, %s9768_s27  ;;  %8713 = vmatprep.subr.bf16.mxu0 %v9259_v28  ;;  %v745_v21 = vsel %vm713_vm2, %v712_v29, %v12936_v48  ;;  %v4085_v38 = vsel %vm664_vm1, %v9569_v25, %v3952_v3  ;;  %v8080_v35 = vcombine.low %v8048_v56, %v11036_v15  ;;  %v9570_v40 = vld [vmem:[%s9887_s26 + $0x98] sm:$0xf]  ;;  %v11256_v17 = vld [vmem:[%s9887_s26 + $0x11c] sm:$0x1]  ;;  %v9271_v3 = vld [vmem:[%s12900_s1 + $0x170] sm:$0xff]   ;;  %v4719_v2 = vrot.slane %v8079_v36, 1 }
 0x174   : > { %v3958_v47 = vpop.permute.xlu1 %3957  ;;  %8598 = vmatpush3.bf16.msra.mxu1 %v9262_v30  ;;  %v12937_v30 = vld [vmem:[#allocation22_spill] sm:$0xff]  ;;  %v4595_v60 = vor.u32 %v4594_v1, %v4590_v12  ;;  %v8020_v32 = vld [vmem:[%s9887_s26 + $0x118] sm:$0xf]  ;;  %v9571_v6 = vld [vmem:[%s9887_s26 + $0x90] sm:$0xf]  ;;  %v7589_v29 = vcombine.low %v7541_v49, %v11250_v26  ;;  %v1972_v48 = vrot.slane %v7604_v46, 1  ;;  %v8081_v0 = vcombine.low %v8049_v7, %v11150_v50 }
 0x175   : > { %8584 = vmatmul.mubr.msk.bf16.gmra.mrb[8].mxu1 %vm1307_vm3, %v7510_v27  ;;  %v3956_v55 = vpop.permute.xlu0 %3955  ;;  %8599 = vmatprep.subr.bf16.mxu1 %v9266_v8  ;;  %v743_v53 = vsel %vm713_vm2, %v709_v58, %v12937_v30  ;;  %v4094_v15 = vsel %vm664_vm1, %v9570_v40, %v3958_v47  ;;  %v2210_v27 = vsel %vm1332_vm0, %v9274_v13, 0  ;;  %v4720_v31 = vrot.slane %v8080_v35, 1  ;;  %v8019_v47 = vld [vmem:[%s9887_s26 + $0x110] sm:$0xf]  ;;  %v8050_v57 = vld [vmem:[%s9887_s26 + $0x108] sm:$0xe] }
 0x176   : > { %8587 = vmatprep.mubr.msk.bf16.mxu1 %vm1307_vm3, %v7511_v62  ;;  %1903 = vrot.lane.b32.xlu1 %v1852_v44, %s9768_s27  ;;  %v11272_v62 = vcombine.low %v7542_v61, %v11246_v39  ;;  %v11283_v14 = vcombine.low %v8020_v32, %v11256_v17  ;;  %v9275_v58 = vld [vmem:[%s12900_s1 + $0x178] sm:$0xff]   ;;  %v1856_v30 = vshll.u32 %v7589_v29, 16  ;;  %v7543_v56 = vld [vmem:[%s9887_s26 + $0x90] sm:$0xf]  ;;  %v11305_v51 = vld [vmem:[%s9887_s26 + $0x94] sm:$0x1] }
 0x177   : > { %1901 = vrot.lane.b32.xlu0 %v1845_v9, %s9768_s27  ;;  %8714 = vmatpush3.bf16.msra.mxu0 %v9259_v28  ;;  %v7512_v28 = vcombine.low %v743_v53, %v745_v21  ;;  %v1971_v21 = vrot.slane %v7603_v41, 1  ;;  %v11301_v12 = vld [vmem:[%s9887_s26 + $0x9c] sm:$0x1]  ;;  %v9573_v61 = vld [vmem:[%s9887_s26 + $0xb0] sm:$0xf] }
 0x178   : > { %v4050_v16 = vpop.permute.xlu1 %4049  ;;  %8715 = vmatprep.subr.bf16.mxu0 %v9263_v43  ;;  %8600 = vmatpush3.bf16.msra.mxu1 %v9266_v8  ;;  %v4091_v8 = vsel %vm664_vm1, %v9571_v6, %v3956_v55  ;;  %v1863_v34 = vshll.u32 %v11272_v62, 16  ;;  %v4613_v53 = vshll.u32 %v11283_v14, 16  ;;  %v1861_v37 = vshrl.u32 %v11272_v62, 16  ;;  %v9574_v46 = vld [vmem:[%s9887_s26 + $0xc8] sm:$0xf] }
 0x179   : > { %v4130_v22 = vsel %vm713_vm2, %v4088_v45, %v4050_v16  ;;  %v4048_v5 = vpop.permute.xlu0 %4047  ;;  %8601 = vmatprep.subr.bf16.mxu1 %v9270_v18  ;;  %v4611_v35 = vshrl.u32 %v11283_v14, 16  ;;  %v11336_v41 = vld [vmem:[%s9887_s26 + $0x124] sm:$0x1]  ;;  %v9575_v62 = vld [vmem:[%s9887_s26 + $0xc0] sm:$0xf] }
 0x17a   : > { %v4128_v23 = vsel %vm713_vm2, %v4085_v38, %v4048_v5  ;;  %1995 = vrot.lane.b32.xlu1 %v1970_v59, %s9769_s30  ;;  %v8082_v59 = vcombine.low %v8050_v57, %v11138_v33  ;;  %v9278_v33 = vld [vmem:[%s12900_s1 + $0x180] sm:$0x3f]   ;;  %v4721_v38 = vrot.slane %v8081_v0, 1  ;;  %v1858_v5 = vrot.slane %v1856_v30, 1 }
 0x17b   : > { %v7984_v63 = vcombine.low %v4128_v23, %v4130_v22  ;;  %1993 = vrot.lane.b32.xlu0 %v1969_v24, %s9769_s30  ;;  %8716 = vmatpush3.bf16.msra.mxu0 %v9263_v43  ;;  %v11276_v43 = vld [vmem:[%s9887_s26 + $0x114] sm:$0x1]  ;;  %v7544_v24 = vld [vmem:[%s9887_s26 + $0x98] sm:$0xf]  ;;  %v1854_v22 = vshrl.u32 %v7589_v29, 16  ;;  %v4615_v11 = vrot.slane %v4613_v53, 1 }
 0x17c   : > { %v4054_v10 = vpop.permute.xlu1 %4053  ;;  %8717 = vmatprep.subr.bf16.mxu0 %v9267_v42  ;;  %8602 = vmatpush3.bf16.msra.mxu1 %v9270_v18  ;;  %v11291_v18 = vcombine.low %v8019_v47, %v11276_v43  ;;  %v4722_v16 = vrot.slane %v8082_v59, 1  ;;  %v7592_v25 = vcombine.low %v7544_v24, %v11301_v12  ;;  %v4960_v19 = vsel %vm1332_vm0, %v9278_v33, 0  ;;  %v7573_v0 = vld [vmem:[%s9887_s26 + $0x80] sm:$0xe] }
 0x17d   : > { %v4134_v44 = vsel %vm713_vm2, %v4094_v15, %v4054_v10  ;;  %8588 = vmatmul.mubr.msk.bf16.gmra.mrb[12].mxu1 %vm1307_vm3, %v7512_v28  ;;  %8699 = vmatprep.mubr.msk.bf16.mxu0 %vm1307_vm3, %v7984_v63  ;;  %v4052_v54 = vpop.permute.xlu0 %4051  ;;  %v9572_v28 = vld [vmem:[%s9887_s26 + $0xb8] sm:$0xf]  ;;  %v1859_v6 = vor.u32 %v1858_v5, %v1854_v22  ;;  %v4616_v57 = vor.u32 %v4615_v11, %v4611_v35 }
 0x17e   : > { %v4132_v9 = vsel %vm713_vm2, %v4091_v8, %v4052_v54  ;;  %4653 = vrot.lane.b32.xlu1 %v4602_v20, %s9768_s27  ;;  %8945 = vmatprep.subr.msk.bf16.mxu1 %vm1332_vm0, %v9274_v13  ;;  %v4606_v50 = vshll.u32 %v11291_v18, 16  ;;  %v7591_v13 = vcombine.low %v7543_v56, %v11305_v51  ;;  %v4604_v49 = vshrl.u32 %v11291_v18, 16  ;;  %v11330_v54 = vld [vmem:[%s9887_s26 + $0x12c] sm:$0x1] }
 0x17f   : > { %v7985_v4 = vcombine.low %v4132_v9, %v4134_v44  ;;  %4651 = vrot.lane.b32.xlu0 %v4595_v60, %s9768_s27  ;;  %8718 = vmatpush3.bf16.msra.mxu0 %v9267_v42  ;;  %v1865_v42 = vrot.slane %v1863_v34, 1  ;;  %v1877_v32 = vshll.u32 %v7592_v25, 16  ;;  %v8022_v44 = vld [vmem:[%s9887_s26 + $0x128] sm:$0xf] }
 0x180   : > { %v3962_v52 = vpop.permute.xlu1 %3961  ;;  %8719 = vmatprep.subr.bf16.mxu0 %v9271_v3  ;;  %8604 = vmatpush3.bf16.msra.mxu1 %v2210_v27  ;;  %v4608_v40 = vrot.slane %v4606_v50, 1  ;;  %v1870_v8 = vshll.u32 %v7591_v13, 16  ;;  %v1868_v18 = vshrl.u32 %v7591_v13, 16  ;;  %v9576_v13 = vld [vmem:[%s9887_s26 + $0xd8] sm:$0xf] }
 0x181   : > { %8700 = vmatmul.mubr.msk.bf16.gmra.mrb[4].mxu0 %vm1307_vm3, %v7985_v4  ;;  %v3960_v55 = vpop.permute.xlu0 %3959  ;;  %v4100_v23 = vsel %vm664_vm1, %v9572_v28, %v3962_v52  ;;  %v1866_v10 = vor.u32 %v1865_v42, %v1861_v37  ;;  %v1875_v52 = vshrl.u32 %v7592_v25, 16  ;;  %v1879_v7 = vrot.slane %v1877_v32, 1  ;;  %v7649_v32 = vld [vmem:[%s9887_s26 + $0x58] sm:$0xf] }
 0x182   : > { %4745 = vrot.lane.b32.xlu1 %v4720_v31, %s9769_s30  ;;  %v4097_v63 = vsel %vm664_vm1, %v9573_v61, %v3960_v55  ;;  %v8021_v31 = vld [vmem:[%s9887_s26 + $0x120] sm:$0xf]  ;;  %v4609_v29 = vor.u32 %v4608_v40, %v4604_v49 }
 0x183   : > { %4743 = vrot.lane.b32.xlu0 %v4719_v2, %s9769_s30  ;;  %8720 = vmatpush3.bf16.msra.mxu0 %v9271_v3  ;;  %v8069_v59 = vcombine.low %v8021_v31, %v11336_v41  ;;  %v1880_v53 = vor.u32 %v1879_v7, %v1875_v52  ;;  %v8127_v52 = vld [vmem:[%s9887_s26 + $0xa8] sm:$0xf]  ;;  %v11395_v7 = vld [vmem:[%s9887_s26 + $0xac] sm:$0x1] }
 0x184   : > { %v3966_v1 = vpop.permute.xlu1 %3965  ;;  %8721 = vmatprep.subr.bf16.mxu0 %v9275_v58 }
 0x185   : > { %v3964_v45 = vpop.permute.xlu0 %3963  ;;  %v4106_v27 = vsel %vm664_vm1, %v9574_v46, %v3966_v1  ;;  %v4618_v22 = vshrl.u32 %v8069_v59, 16  ;;  %v11378_v46 = vld [vmem:[%s9887_s26 + $0x54] sm:$0x1] }
 0x186   : > { %1999 = vrot.lane.b32.xlu1 %v1972_v48, %s9769_s30  ;;  %v4103_v47 = vsel %vm664_vm1, %v9575_v62, %v3964_v45  ;;  %v1872_v48 = vrot.slane %v1870_v8, 1  ;;  %v4620_v45 = vshll.u32 %v8069_v59, 16 }
 0x187   : > { %1997 = vrot.lane.b32.xlu0 %v1971_v21, %s9769_s30  ;;  %8722 = vmatpush3.bf16.msra.mxu0 %v9275_v58  ;;  %v8070_v58 = vcombine.low %v8022_v44, %v11330_v54  ;;  %v7574_v21 = vld [vmem:[%s9887_s26 + $0x88] sm:$0xe]  ;;  %v7648_v44 = vld [vmem:[%s9887_s26 + $0x50] sm:$0xf] }
 0x188   : > { %v4058_v20 = vpop.permute.xlu1 %4057  ;;  %8949 = vmatprep.subr.msk.bf16.mxu0 %vm1332_vm0, %v9278_v33  ;;  %v7606_v24 = vcombine.low %v7574_v21, %v11246_v39  ;;  %v1873_v56 = vor.u32 %v1872_v48, %v1868_v18  ;;  %v7605_v33 = vcombine.low %v7573_v0, %v11250_v26  ;;  %v4622_v5 = vrot.slane %v4620_v45, 1  ;;  %v8054_v18 = vld [vmem:[%s9887_s26 + $0x128] sm:$0xe]  ;;  %v8053_v21 = vld [vmem:[%s9887_s26 + $0x120] sm:$0xe] }
 0x189   : > { %v4138_v60 = vsel %vm713_vm2, %v4100_v23, %v4058_v20  ;;  %v4056_v36 = vpop.permute.xlu0 %4055  ;;  %v4627_v1 = vshll.u32 %v8070_v58, 16  ;;  %v4625_v42 = vshrl.u32 %v8070_v58, 16  ;;  %v8051_v23 = vld [vmem:[%s9887_s26 + $0x110] sm:$0xe]  ;;  %v7696_v48 = vcombine.low %v7648_v44, %v11378_v46  ;;  %v7651_v45 = vld [vmem:[%s9887_s26 + $0x68] sm:$0xf] }
 0x18a   : > { %v4136_v15 = vsel %vm713_vm2, %v4097_v63, %v4056_v36  ;;  %4749 = vrot.lane.b32.xlu1 %v4722_v16, %s9769_s30  ;;  %v1974_v37 = vrot.slane %v7606_v24, 1  ;;  %v1973_v39 = vrot.slane %v7605_v33, 1  ;;  %v9577_v20 = vld [vmem:[%s9887_s26 + $0xd0] sm:$0xf]  ;;  %v7576_v36 = vld [vmem:[%s9887_s26 + $0x98] sm:$0xe]  ;;  %v4623_v40 = vor.u32 %v4622_v5, %v4618_v22 }
 0x18b   : > { %v7986_v3 = vcombine.low %v4136_v15, %v4138_v60  ;;  %4747 = vrot.lane.b32.xlu0 %v4721_v38, %s9769_s30  ;;  %8724 = vmatpush3.bf16.msra.mxu0 %v4960_v19  ;;  %v4629_v25 = vrot.slane %v4627_v1, 1  ;;  %v8052_v38 = vld [vmem:[%s9887_s26 + $0x118] sm:$0xe]  ;;  %v8083_v15 = vcombine.low %v8051_v23, %v11276_v43  ;;  %v8175_v0 = vcombine.low %v8127_v52, %v11395_v7 }
 0x18c   : > { %v4062_v9 = vpop.permute.xlu1 %4061  ;;  %v8084_v61 = vcombine.low %v8052_v38, %v11256_v17  ;;  %v9578_v17 = vld [vmem:[%s9887_s26 + $0xe8] sm:$0xf]  ;;  %v8086_v24 = vcombine.low %v8054_v18, %v11330_v54  ;;  %v2460_v33 = vshll.u32 %v7696_v48, 16  ;;  %v8129_v44 = vld [vmem:[%s9887_s26 + $0xb8] sm:$0xf] }
 0x18d   : > { %v4142_v4 = vsel %vm713_vm2, %v4106_v27, %v4062_v9  ;;  %8703 = vmatprep.mubr.msk.bf16.mxu0 %vm1307_vm3, %v7986_v3  ;;  %v4060_v2 = vpop.permute.xlu0 %4059  ;;  %v4630_v60 = vor.u32 %v4629_v25, %v4625_v42  ;;  %v11372_v3 = vld [vmem:[%s9887_s26 + $0x5c] sm:$0x1]  ;;  %v9579_v27 = vld [vmem:[%s9887_s26 + $0xe0] sm:$0xf]  ;;  %v11427_v25 = vld [vmem:[%s9887_s26 + $0x64] sm:$0x1] }
 0x18e   : > { %v4140_v14 = vsel %vm713_vm2, %v4103_v47, %v4060_v2  ;;  %1907 = vrot.lane.b32.xlu1 %v1866_v10, %s9768_s27  ;;  %v7575_v10 = vld [vmem:[%s9887_s26 + $0x90] sm:$0xe]  ;;  %v4724_v62 = vrot.slane %v8084_v61, 1  ;;  %v7608_v2 = vcombine.low %v7576_v36, %v11301_v12  ;;  %v11403_v12 = vld [vmem:[%s12900_s1 + $0xa8] sm:$0xff]   ;;  %v7650_v42 = vld [vmem:[%s9887_s26 + $0x60] sm:$0xf] }
 0x18f   : > { %v7987_v55 = vcombine.low %v4140_v14, %v4142_v4  ;;  %1905 = vrot.lane.b32.xlu0 %v1859_v6, %s9768_s27  ;;  %v8128_v47 = vld [vmem:[%s9887_s26 + $0xb0] sm:$0xf]  ;;  %v11391_v14 = vld [vmem:[%s9887_s26 + $0xb4] sm:$0x1]  ;;  %8621 = vmatprep.subr.bf16.mxu1 %v11403_v12  ;;  %v2462_v23 = vrot.slane %v2460_v33, 1 }
 0x190   : > { %v3970_v34 = vpop.permute.xlu1 %3969  ;;  %v9582_v33 = vld [vmem:[%s9887_s26 + $0xa8] sm:$0xf] }
 0x191   : > { %8704 = vmatmul.mubr.msk.bf16.gmra.mrb[8].mxu0 %vm1307_vm3, %v7987_v55  ;;  %v3968_v30 = vpop.permute.xlu0 %3967  ;;  %v4112_v26 = vsel %vm664_vm1, %v9576_v13, %v3970_v34  ;;  %v4723_v55 = vrot.slane %v8083_v15, 1  ;;  %v8176_v34 = vcombine.low %v8128_v47, %v11391_v14 }
 0x192   : > { %4657 = vrot.lane.b32.xlu1 %v4616_v57, %s9768_s27  ;;  %v4109_v35 = vsel %vm664_vm1, %v9577_v20, %v3968_v30  ;;  %v7607_v57 = vcombine.low %v7575_v10, %v11305_v51  ;;  %v1976_v30 = vrot.slane %v7608_v2, 1  ;;  %v7698_v20 = vcombine.low %v7650_v42, %v11427_v25  ;;  %v8130_v10 = vld [vmem:[%s9887_s26 + $0xc0] sm:$0xf] }
 0x193   : > { %4655 = vrot.lane.b32.xlu0 %v4609_v29, %s9768_s27  ;;  %v7697_v29 = vcombine.low %v7649_v32, %v11372_v3  ;;  %v5216_v38 = vshll.u32 %v8176_v34, 16  ;;  %v11444_v32 = vld [vmem:[%s9887_s26 + $0xc4] sm:$0x1] }
 0x194   : > { %v3974_v50 = vpop.permute.xlu1 %3973  ;;  %v2474_v15 = vshll.u32 %v7698_v20, 16  ;;  %v8178_v52 = vcombine.low %v8130_v10, %v11444_v32  ;;  %v7683_v10 = vld [vmem:[%s9887_s26 + $0x68] sm:$0xe] }
 0x195   : > { %v3972_v16 = vpop.permute.xlu0 %3971  ;;  %v4118_v6 = vsel %vm664_vm1, %v9578_v17, %v3974_v50  ;;  %v2467_v1 = vshll.u32 %v7697_v29, 16  ;;  %v11416_v50 = vld [vmem:[%s9887_s26 + $0x6c] sm:$0x1]  ;;  %v2465_v22 = vshrl.u32 %v7697_v29, 16  ;;  %v5218_v61 = vrot.slane %v5216_v38, 1 }
 0x196   : > { %1911 = vrot.lane.b32.xlu1 %v1880_v53, %s9768_s27  ;;  %v4115_v9 = vsel %vm664_vm1, %v9579_v27, %v3972_v16  ;;  %v1975_v53 = vrot.slane %v7607_v57, 1  ;;  %v11421_v16 = vld [vmem:[%s12900_s1 + $0x188] sm:$0xff]   ;;  %v7699_v13 = vcombine.low %v7651_v45, %v11416_v50  ;;  %v9580_v17 = vld [vmem:[%s9887_s26 + $0x18] sm:$0xf]  ;;  %v11450_v27 = vld [vmem:[%s9887_s26 + $0xbc] sm:$0x1] }
 0x197   : > { %1909 = vrot.lane.b32.xlu0 %v1873_v56, %s9768_s27  ;;  %v8085_v56 = vcombine.low %v8053_v21, %v11336_v41  ;;  %8741 = vmatprep.subr.bf16.mxu0 %v11421_v16  ;;  %v4726_v41 = vrot.slane %v8086_v24, 1  ;;  %v2469_v5 = vrot.slane %v2467_v1, 1  ;;  %v2476_v18 = vrot.slane %v2474_v15, 1  ;;  %v9583_v38 = vld [vmem:[%s9887_s26 + $0xa0] sm:$0xf] }
 0x198   : > { %v4066_v28 = vpop.permute.xlu1 %4065  ;;  %v2479_v57 = vshrl.u32 %v7699_v13, 16 }
 0x199   : > { %v4146_v11 = vsel %vm713_vm2, %v4112_v26, %v4066_v28  ;;  %v4064_v19 = vpop.permute.xlu0 %4063  ;;  %v4725_v26 = vrot.slane %v8085_v56, 1  ;;  %v2458_v28 = vshrl.u32 %v7696_v48, 16  ;;  %v2470_v36 = vor.u32 %v2469_v5, %v2465_v22  ;;  %v7681_v48 = vld [vmem:[%s9887_s26 + $0x58] sm:$0xe]  ;;  %v8160_v22 = vld [vmem:[%s9887_s26 + $0xb0] sm:$0xe] }
 0x19a   : > { %v4144_v63 = vsel %vm713_vm2, %v4109_v35, %v4064_v19  ;;  %2003 = vrot.lane.b32.xlu1 %v1974_v37, %s9769_s30  ;;  %v5214_v19 = vshrl.u32 %v8176_v34, 16 }
 0x19b   : > { %v7988_v49 = vcombine.low %v4144_v63, %v4146_v11  ;;  %2001 = vrot.lane.b32.xlu0 %v1973_v39, %s9769_s30  ;;  %v5209_v39 = vshll.u32 %v8175_v0, 16  ;;  %v5207_v63 = vshrl.u32 %v8175_v0, 16 }
 0x19c   : > { %v4070_v8 = vpop.permute.xlu1 %4069  ;;  %v5219_v47 = vor.u32 %v5218_v61, %v5214_v19 }
 0x19d   : > { %v4150_v31 = vsel %vm713_vm2, %v4118_v6, %v4070_v8  ;;  %8707 = vmatprep.mubr.msk.bf16.mxu0 %vm1307_vm3, %v7988_v49  ;;  %v4068_v43 = vpop.permute.xlu0 %4067  ;;  %v2481_v49 = vshll.u32 %v7699_v13, 16  ;;  %v5228_v13 = vshrl.u32 %v8178_v52, 16 }
 0x19e   : > { %v4148_v4 = vsel %vm713_vm2, %v4115_v9, %v4068_v43  ;;  %4661 = vrot.lane.b32.xlu1 %v4630_v60, %s9768_s27  ;;  %v5211_v60 = vrot.slane %v5209_v39, 1  ;;  %v9581_v9 = vld [vmem:[%s9887_s26 + $0x10] sm:$0xf] }
 0x19f   : > { %v7989_v58 = vcombine.low %v4148_v4, %v4150_v31  ;;  %4659 = vrot.lane.b32.xlu0 %v4623_v40, %s9768_s27  ;;  %v2463_v40 = vor.u32 %v2462_v23, %v2458_v28  ;;  %v2483_v29 = vrot.slane %v2481_v49, 1 }
 0x1a0   : > { %v1884_v51 = vpop.permute.xlu1 %1883  ;;  %v5212_v4 = vor.u32 %v5211_v60, %v5207_v63  ;;  %v8192_v63 = vcombine.low %v8160_v22, %v11391_v14  ;;  %v8159_v60 = vld [vmem:[%s9887_s26 + $0xa8] sm:$0xe] }
 0x1a1   : > { %8708 = vmatmul.mubr.msk.bf16.gmra.mrb[12].mxu0 %vm1307_vm3, %v7989_v58  ;;  %v1882_v59 = vpop.permute.xlu0 %1881  ;;  %v2014_v6 = vsel %vm664_vm1, %v9580_v17, %v1884_v51  ;;  %v8177_v51 = vcombine.low %v8129_v44, %v11450_v27  ;;  %v2484_v0 = vor.u32 %v2483_v29, %v2479_v57  ;;  %v9587_v29 = vld [vmem:[%s9887_s26 + $0xb0] sm:$0xf] }
 0x1a2   : > { %4753 = vrot.lane.b32.xlu1 %v4724_v62, %s9769_s30  ;;  %v2011_v31 = vsel %vm664_vm1, %v9581_v9, %v1882_v59  ;;  %v7680_v59 = vld [vmem:[%s9887_s26 + $0x50] sm:$0xe]  ;;  %v8191_v9 = vcombine.low %v8159_v60, %v11395_v7  ;;  %v5399_v57 = vrot.slane %v8192_v63, 1 }
 0x1a3   : > { %4751 = vrot.lane.b32.xlu0 %v4723_v55, %s9769_s30  ;;  %v2472_v55 = vshrl.u32 %v7698_v20, 16  ;;  %v7712_v1 = vcombine.low %v7680_v59, %v11378_v46  ;;  %v5223_v56 = vshll.u32 %v8177_v51, 16  ;;  %v5221_v23 = vshrl.u32 %v8177_v51, 16  ;;  %v9584_v20 = vld [vmem:[%s9887_s26 + $0x28] sm:$0xf] }
 0x1a4   : > { %v11423_v37 = vpop.permute.xlu1 %4633  ;;  %v8132_v51 = vld [vmem:[%s9887_s26 + $0xd0] sm:$0xf] }
 0x1a5   : > { %v11429_v54 = vpop.permute.xlu0 %4631  ;;  %v2477_v24 = vor.u32 %v2476_v18, %v2472_v55  ;;  %v4764_v45 = vsel %vm664_vm1, %v9582_v33, %v11423_v37  ;;  %v2649_v28 = vrot.slane %v7712_v1, 1  ;;  %v7715_v55 = vcombine.low %v7683_v10, %v11416_v50  ;;  %v8161_v1 = vld [vmem:[%s9887_s26 + $0xb8] sm:$0xe]  ;;  %v9337_v33 = vld [vmem:[%s12900_s1 + $0x190] sm:$0xff]   ;;  %v9344_v10 = vld [vmem:[%s12900_s1 + $0xc8] sm:$0xff]  }
 0x1a6   : > { %2007 = vrot.lane.b32.xlu1 %v1976_v30, %s9769_s30  ;;  %v7713_v30 = vcombine.low %v7681_v48, %v11372_v3  ;;  %v4761_v39 = vsel %vm664_vm1, %v9583_v38, %v11429_v54  ;;  %v5225_v54 = vrot.slane %v5223_v56, 1  ;;  %v8162_v48 = vld [vmem:[%s9887_s26 + $0xc0] sm:$0xe]  ;;  %v9336_v56 = vld [vmem:[%s12900_s1 + $0xb8] sm:$0xff]  }
 0x1a7   : > { %2005 = vrot.lane.b32.xlu0 %v1975_v53, %s9769_s30  ;;  %v5230_v53 = vshll.u32 %v8178_v52, 16 }
 0x1a8   : > { %v11436_v35 = vpop.permute.xlu1 %1887  ;;  %v2650_v46 = vrot.slane %v7713_v30, 1  ;;  %v8131_v30 = vld [vmem:[%s9887_s26 + $0xc8] sm:$0xf] }
 0x1a9   : > { %v11438_v11 = vpop.permute.xlu0 %1885  ;;  %v2020_v19 = vsel %vm664_vm1, %v9584_v20, %v11436_v35  ;;  %v7682_v35 = vld [vmem:[%s9887_s26 + $0x60] sm:$0xe] }
 0x1aa   : > { %4757 = vrot.lane.b32.xlu1 %v4726_v41, %s9769_s30  ;;  %v7714_v18 = vcombine.low %v7682_v35, %v11427_v25  ;;  %v5398_v25 = vrot.slane %v8191_v9, 1 }
 0x1ab   : > { %4755 = vrot.lane.b32.xlu0 %v4725_v26, %s9769_s30  ;;  %v5232_v26 = vrot.slane %v5230_v53, 1  ;;  %v11528_v53 = vld [vmem:[%s9887_s26 + $0xcc] sm:$0x1] }
 0x1ac   : > { %v1980_v8 = vpop.permute.xlu1 %1979  ;;  %v11549_v38 = vcombine.low %v8131_v30, %v11528_v53 }
 0x1ad   : > { %v2060_v43 = vsel %vm713_vm2, %v2014_v6, %v1980_v8  ;;  %v1978_v62 = vpop.permute.xlu0 %1977  ;;  %v5233_v14 = vor.u32 %v5232_v26, %v5228_v13  ;;  %v7653_v6 = vld [vmem:[%s9887_s26 + $0x78] sm:$0xf]  ;;  %v11494_v8 = vld [vmem:[%s9887_s26 + $0x7c] sm:$0x1]  ;;  %v7654_v13 = vld [vmem:[%s9887_s26 + $0x80] sm:$0xf] }
 0x1ae   : > { %v2058_v2 = vsel %vm713_vm2, %v2011_v31, %v1978_v62  ;;  %2571 = vrot.lane.b32.xlu1 %v2470_v36, %s9768_s27  ;;  %v9585_v36 = vld [vmem:[%s9887_s26 + $0x20] sm:$0xf]  ;;  %v7652_v31 = vld [vmem:[%s9887_s26 + $0x70] sm:$0xf]  ;;  %v11518_v59 = vcombine.low %v7653_v6, %v11494_v8  ;;  %v11562_v26 = vld [vmem:[%s9887_s26 + $0x84] sm:$0x1] }
 0x1af   : > { %v7623_v58 = vcombine.low %v2058_v2, %v2060_v43  ;;  %2569 = vrot.lane.b32.xlu0 %v2463_v40, %s9768_s27  ;;  %v2017_v49 = vsel %vm664_vm1, %v9585_v36, %v11438_v11  ;;  %v5226_v11 = vor.u32 %v5225_v54, %v5221_v23  ;;  %v11500_v43 = vld [vmem:[%s9887_s26 + $0x74] sm:$0x1]  ;;  %v9341_v23 = vld [vmem:[%s12900_s1 + $0x198] sm:$0xff]   ;;  %v11583_v60 = vcombine.low %v7654_v13, %v11562_v26 }
 0x1b0   : > { %v4638_v21 = vpop.permute.xlu1 %4637  ;;  %v9332_v62 = vld [vmem:[%s12900_s1 + $0xb0] sm:$0xff]  }
 0x1b1   : > { %8605 = vmatprep.mubr.msk.bf16.mxu1 %vm1307_vm3, %v7623_v58  ;;  %v4636_v34 = vpop.permute.xlu0 %4635 }
 0x1b2   : > { %5320 = vrot.lane.b32.xlu1 %v5219_v47, %s9768_s27  ;;  %v9586_v47 = vld [vmem:[%s9887_s26 + $0xb8] sm:$0xf]  ;;  %v4767_v52 = vsel %vm664_vm1, %v9587_v29, %v4636_v34  ;;  %v11521_v34 = vcombine.low %v7652_v31, %v11500_v43 }
 0x1b3   : > { %5318 = vrot.lane.b32.xlu0 %v5212_v4, %s9768_s27  ;;  %v4770_v4 = vsel %vm664_vm1, %v9586_v47, %v4638_v21  ;;  %v9588_v29 = vld [vmem:[%s9887_s26 + $0x38] sm:$0xf] }
 0x1b4   : > { %v4730_v42 = vpop.permute.xlu1 %4729  ;;  %v2488_v22 = vshll.u32 %v11521_v34, 16 }
 0x1b5   : > { %v4810_v41 = vsel %vm713_vm2, %v4764_v45, %v4730_v42  ;;  %v4728_v3 = vpop.permute.xlu0 %4727  ;;  %v8194_v45 = vcombine.low %v8162_v48, %v11444_v32  ;;  %v8193_v32 = vcombine.low %v8161_v1, %v11450_v27  ;;  %v9589_v48 = vld [vmem:[%s9887_s26 + $0x30] sm:$0xf] }
 0x1b6   : > { %v4808_v5 = vsel %vm713_vm2, %v4761_v39, %v4728_v3  ;;  %2575 = vrot.lane.b32.xlu1 %v2484_v0, %s9768_s27  ;;  %v11524_v0 = vld [vmem:[%s9887_s26 + $0xd4] sm:$0x1]  ;;  %v2652_v39 = vrot.slane %v7715_v55, 1  ;;  %v2495_v3 = vshll.u32 %v11518_v59, 16 }
 0x1b7   : > { %v8101_v37 = vcombine.low %v4808_v5, %v4810_v41  ;;  %2573 = vrot.lane.b32.xlu0 %v2477_v24, %s9768_s27  ;;  %v11546_v42 = vcombine.low %v8132_v51, %v11524_v0  ;;  %v2651_v41 = vrot.slane %v7714_v18, 1  ;;  %v7655_v5 = vld [vmem:[%s9887_s26 + $0x88] sm:$0xf]  ;;  %v5401_v54 = vrot.slane %v8194_v45, 1  ;;  %v9348_v55 = vld [vmem:[%s12900_s1 + $0xd0] sm:$0xff]  }
 0x1b8   : > { %v1984_v61 = vpop.permute.xlu1 %1983  ;;  %v5400_v36 = vrot.slane %v8193_v32, 1  ;;  %v9349_v18 = vld [vmem:[%s12900_s1 + $0x1a8] sm:$0xff]   ;;  %v7685_v45 = vld [vmem:[%s9887_s26 + $0x78] sm:$0xe] }
 0x1b9   : > { %v2064_v40 = vsel %vm713_vm2, %v2020_v19, %v1984_v61  ;;  %8725 = vmatprep.mubr.msk.bf16.mxu0 %vm1307_vm3, %v8101_v37  ;;  %v1982_v15 = vpop.permute.xlu0 %1981  ;;  %v5244_v20 = vshll.u32 %v11546_v42, 16  ;;  %v5237_v19 = vshll.u32 %v11549_v38, 16  ;;  %v2497_v61 = vrot.slane %v2495_v3, 1  ;;  %v9353_v3 = vld [vmem:[%s12900_s1 + $0x1b0] sm:$0xff]  }
 0x1ba   : > { %v2062_v17 = vsel %vm713_vm2, %v2017_v49, %v1982_v15  ;;  %2667 = vrot.lane.b32.xlu1 %v2650_v46, %s9769_s30  ;;  %v11558_v46 = vld [vmem:[%s9887_s26 + $0x8c] sm:$0x1]  ;;  %v2486_v49 = vshrl.u32 %v11521_v34, 16  ;;  %v5242_v35 = vshrl.u32 %v11546_v42, 16  ;;  %v7717_v32 = vcombine.low %v7685_v45, %v11494_v8  ;;  %v9356_v8 = vld [vmem:[%s12900_s1 + $0x1b8] sm:$0x3f]  }
 0x1bb   : > { %v7624_v44 = vcombine.low %v2062_v17, %v2064_v40  ;;  %2665 = vrot.lane.b32.xlu0 %v2649_v28, %s9769_s30  ;;  %v9340_v28 = vld [vmem:[%s12900_s1 + $0xc0] sm:$0xff]   ;;  %v11580_v63 = vcombine.low %v7655_v5, %v11558_v46  ;;  %v2490_v40 = vrot.slane %v2488_v22, 1  ;;  %v5246_v6 = vrot.slane %v5244_v20, 1 }
 0x1bc   : > { %v4734_v2 = vpop.permute.xlu1 %4733  ;;  %v9345_v17 = vld [vmem:[%s12900_s1 + $0x1a0] sm:$0xff]  }
 0x1bd   : > { %v4814_v7 = vsel %vm713_vm2, %v4770_v4, %v4734_v2  ;;  %8606 = vmatmul.mubr.msk.bf16.vlgmr.msra.gmra.mrb[0].mxu1 %vm1307_vm3, %v7624_v44  ;;  %v4732_v58 = vpop.permute.xlu0 %4731  ;;  %v5235_v44 = vshrl.u32 %v11549_v38, 16  ;;  %v2509_v31 = vshll.u32 %v11580_v63, 16  ;;  %v2491_v47 = vor.u32 %v2490_v40, %v2486_v49  ;;  %v8134_v4 = vld [vmem:[%s9887_s26 + $0xe0] sm:$0xf]  ;;  %v11605_v2 = vld [vmem:[%s9887_s26 + $0xe4] sm:$0x1] }
 0x1be   : > { %v4812_v21 = vsel %vm713_vm2, %v4767_v52, %v4732_v58  ;;  %5324 = vrot.lane.b32.xlu1 %v5233_v14, %s9768_s27  ;;  %8622 = vmatpush3.bf16.msra.mxu1 %v11403_v12  ;;  %v11612_v58 = vld [vmem:[%s9887_s26 + $0xdc] sm:$0x1]  ;;  %v5247_v34 = vor.u32 %v5246_v6, %v5242_v35  ;;  %v11628_v1 = vcombine.low %v8134_v4, %v11605_v2  ;;  %v9593_v4 = vld [vmem:[%s9887_s26 + $0x40] sm:$0xf] }
 0x1bf   : > { %v8102_v50 = vcombine.low %v4812_v21, %v4814_v7  ;;  %5322 = vrot.lane.b32.xlu0 %v5226_v11, %s9768_s27  ;;  %8623 = vmatprep.subr.bf16.mxu1 %v9332_v62  ;;  %v5239_v11 = vrot.slane %v5237_v19, 1  ;;  %v9352_v38 = vld [vmem:[%s12900_s1 + $0xd8] sm:$0x3f]   ;;  %v9590_v19 = vld [vmem:[%s9887_s26 + $0xc8] sm:$0xf] }
 0x1c0   : > { %v11532_v24 = vpop.permute.xlu1 %1891  ;;  %v5258_v13 = vshll.u32 %v11628_v1, 16  ;;  %v2898_v20 = vsel %vm1332_vm0, %v9352_v38, 0  ;;  %v5256_v40 = vshrl.u32 %v11628_v1, 16  ;;  %v9595_v1 = vld [vmem:[%s9887_s26 + $0xd0] sm:$0xf] }
 0x1c1   : > { %8726 = vmatmul.mubr.msk.bf16.vlgmr.msra.gmra.mrb[0].mxu0 %vm1307_vm3, %v8102_v50  ;;  %v11542_v12 = vpop.permute.xlu0 %1889  ;;  %v2026_v52 = vsel %vm664_vm1, %v9588_v29, %v11532_v24  ;;  %v5240_v30 = vor.u32 %v5239_v11, %v5235_v44  ;;  %v2511_v24 = vrot.slane %v2509_v31, 1  ;;  %v9592_v11 = vld [vmem:[%s9887_s26 + $0x48] sm:$0xf]  ;;  %v8136_v45 = vld [vmem:[%s9887_s26 + $0x100] sm:$0xf] }
 0x1c2   : > { %5416 = vrot.lane.b32.xlu1 %v5399_v57, %s9769_s30  ;;  %8624 = vmatpush3.bf16.msra.mxu1 %v9332_v62  ;;  %v2502_v62 = vshll.u32 %v11583_v60, 16  ;;  %v8133_v57 = vld [vmem:[%s9887_s26 + $0xd8] sm:$0xf]  ;;  %v2023_v51 = vsel %vm664_vm1, %v9589_v48, %v11542_v12 }
 0x1c3   : > { %5414 = vrot.lane.b32.xlu0 %v5398_v25, %s9769_s30  ;;  %8742 = vmatpush3.bf16.msra.mxu0 %v11421_v16  ;;  %v2493_v16 = vshrl.u32 %v11518_v59, 16  ;;  %v2507_v25 = vshrl.u32 %v11580_v63, 16  ;;  %v8181_v42 = vcombine.low %v8133_v57, %v11612_v58  ;;  %v9591_v63 = vld [vmem:[%s9887_s26 + $0xc0] sm:$0xf] }
 0x1c4   : > { %v11565_v37 = vpop.permute.xlu1 %4641  ;;  %8625 = vmatprep.subr.bf16.mxu1 %v9336_v56  ;;  %8743 = vmatprep.subr.bf16.mxu0 %v9337_v33  ;;  %v2504_v12 = vrot.slane %v2502_v62, 1  ;;  %v8163_v62 = vld [vmem:[%s9887_s26 + $0xc8] sm:$0xe] }
 0x1c5   : > { %v11573_v27 = vpop.permute.xlu0 %4639  ;;  %v2498_v9 = vor.u32 %v2497_v61, %v2493_v16  ;;  %v2512_v5 = vor.u32 %v2511_v24, %v2507_v25  ;;  %v4776_v16 = vsel %vm664_vm1, %v9590_v19, %v11565_v37  ;;  %v2654_v37 = vrot.slane %v7717_v32, 1  ;;  %v7656_v25 = vld [vmem:[%s9887_s26 + $0xa0] sm:$0xf]  ;;  %v11695_v24 = vld [vmem:[%s9887_s26 + $0xa4] sm:$0x1] }
 0x1c6   : > { %2671 = vrot.lane.b32.xlu1 %v2652_v39, %s9769_s30  ;;  %8626 = vmatpush3.bf16.msra.mxu1 %v9336_v56  ;;  %v5249_v6 = vshrl.u32 %v8181_v42, 16  ;;  %v8195_v48 = vcombine.low %v8163_v62, %v11528_v53 }
 0x1c7   : > { %2669 = vrot.lane.b32.xlu0 %v2651_v41, %s9769_s30  ;;  %8744 = vmatpush3.bf16.msra.mxu0 %v9337_v33  ;;  %v2500_v33 = vshrl.u32 %v11583_v60, 16  ;;  %v7684_v41 = vld [vmem:[%s9887_s26 + $0x70] sm:$0xe] }
 0x1c8   : > { %v11587_v15 = vpop.permute.xlu1 %1895  ;;  %8627 = vmatprep.subr.bf16.mxu1 %v9340_v28  ;;  %8745 = vmatprep.subr.bf16.mxu0 %v9341_v23  ;;  %v5402_v32 = vrot.slane %v8195_v48, 1  ;;  %v8138_v48 = vld [vmem:[%s9887_s26 + $0x110] sm:$0xf] }
 0x1c9   : > { %v11595_v14 = vpop.permute.xlu0 %1893 }
 0x1ca   : > { %5420 = vrot.lane.b32.xlu1 %v5401_v54, %s9769_s30  ;;  %8628 = vmatpush3.bf16.msra.mxu1 %v9340_v28  ;;  %v2505_v28 = vor.u32 %v2504_v12, %v2500_v33  ;;  %v5251_v54 = vshll.u32 %v8181_v42, 16  ;;  %v2029_v57 = vsel %vm664_vm1, %v9593_v4, %v11595_v14 }
 0x1cb   : > { %5418 = vrot.lane.b32.xlu0 %v5400_v36, %s9769_s30  ;;  %8746 = vmatpush3.bf16.msra.mxu0 %v9341_v23  ;;  %v7716_v23 = vcombine.low %v7684_v41, %v11500_v43  ;;  %v4773_v43 = vsel %vm664_vm1, %v9591_v63, %v11573_v27  ;;  %v11708_v41 = vld [vmem:[%s9887_s26 + $0x104] sm:$0x1] }
 0x1cc   : > { %v1988_v7 = vpop.permute.xlu1 %1987  ;;  %8629 = vmatprep.subr.bf16.mxu1 %v9344_v10  ;;  %8747 = vmatprep.subr.bf16.mxu0 %v9345_v17  ;;  %v5253_v44 = vrot.slane %v5251_v54, 1  ;;  %v8184_v19 = vcombine.low %v8136_v45, %v11708_v41 }
 0x1cd   : > { %v2068_v21 = vsel %vm713_vm2, %v2026_v52, %v1988_v7  ;;  %v1986_v59 = vpop.permute.xlu0 %1985  ;;  %v2653_v27 = vrot.slane %v7716_v23, 1  ;;  %v7704_v23 = vcombine.low %v7656_v25, %v11695_v24  ;;  %v9597_v25 = vld [vmem:[%s9887_s26 + $0x60] sm:$0xf] }
 0x1ce   : > { %v2066_v50 = vsel %vm713_vm2, %v2023_v51, %v1986_v59  ;;  %2579 = vrot.lane.b32.xlu1 %v2498_v9, %s9768_s27  ;;  %8630 = vmatpush3.bf16.msra.mxu1 %v9344_v10  ;;  %v5260_v10 = vrot.slane %v5258_v13, 1  ;;  %v2032_v9 = vsel %vm664_vm1, %v9592_v11, %v11587_v15  ;;  %v5254_v14 = vor.u32 %v5253_v44, %v5249_v6  ;;  %v7687_v51 = vld [vmem:[%s9887_s26 + $0x88] sm:$0xe]  ;;  %v11687_v59 = vld [vmem:[%s9887_s26 + $0xac] sm:$0x1] }
 0x1cf   : > { %v7625_v56 = vcombine.low %v2066_v50, %v2068_v21  ;;  %2577 = vrot.lane.b32.xlu0 %v2491_v47, %s9768_s27  ;;  %8748 = vmatpush3.bf16.msra.mxu0 %v9345_v17  ;;  %v8164_v17 = vld [vmem:[%s9887_s26 + $0xd0] sm:$0xe]  ;;  %v5647_v47 = vsel %vm1332_vm0, %v9356_v8, 0  ;;  %v7657_v21 = vld [vmem:[%s9887_s26 + $0xa8] sm:$0xf] }
 0x1d0   : > { %v11637_v39 = vpop.permute.xlu1 %4645  ;;  %8631 = vmatprep.subr.bf16.mxu1 %v9348_v55  ;;  %8749 = vmatprep.subr.bf16.mxu0 %v9349_v18  ;;  %v8196_v15 = vcombine.low %v8164_v17, %v11524_v0  ;;  %v9594_v0 = vld [vmem:[%s9887_s26 + $0xd8] sm:$0xf]  ;;  %v7686_v50 = vld [vmem:[%s9887_s26 + $0x80] sm:$0xe] }
 0x1d1   : > { %8609 = vmatprep.mubr.msk.bf16.mxu1 %vm1307_vm3, %v7625_v56  ;;  %v11644_v22 = vpop.permute.xlu0 %4643  ;;  %v7718_v13 = vcombine.low %v7686_v50, %v11562_v26  ;;  %v11756_v50 = vld [vmem:[%s9887_s26 + $0x10c] sm:$0x1] }
 0x1d2   : > { %5328 = vrot.lane.b32.xlu1 %v5247_v34, %s9768_s27  ;;  %8632 = vmatpush3.bf16.msra.mxu1 %v9348_v55  ;;  %v5261_v55 = vor.u32 %v5260_v10, %v5256_v40  ;;  %v4782_v34 = vsel %vm664_vm1, %v9594_v0, %v11637_v39  ;;  %v4779_v53 = vsel %vm664_vm1, %v9595_v1, %v11644_v22  ;;  %v5403_v12 = vrot.slane %v8196_v15, 1  ;;  %v11712_v22 = vld [vmem:[%s9887_s26 + $0xfc] sm:$0x1]  ;;  %v7658_v40 = vld [vmem:[%s9887_s26 + $0xb0] sm:$0xf] }
 0x1d3   : > { %5326 = vrot.lane.b32.xlu0 %v5240_v30, %s9768_s27  ;;  %8750 = vmatpush3.bf16.msra.mxu0 %v9349_v18  ;;  %v7705_v39 = vcombine.low %v7657_v21, %v11687_v59  ;;  %v2655_v63 = vrot.slane %v7718_v13, 1  ;;  %v11734_v10 = vld [vmem:[%s9887_s26 + $0xb4] sm:$0x1]  ;;  %v9596_v21 = vld [vmem:[%s9887_s26 + $0x68] sm:$0xf] }
 0x1d4   : > { %v4738_v61 = vpop.permute.xlu1 %4737  ;;  %8946 = vmatprep.subr.msk.bf16.mxu1 %vm1332_vm0, %v9352_v38  ;;  %8751 = vmatprep.subr.bf16.mxu0 %v9353_v3  ;;  %v7719_v38 = vcombine.low %v7687_v51, %v11558_v46  ;;  %v8165_v46 = vld [vmem:[%s9887_s26 + $0xd8] sm:$0xe]  ;;  %v7706_v62 = vcombine.low %v7658_v40, %v11734_v10  ;;  %v11750_v51 = vld [vmem:[%s9887_s26 + $0x114] sm:$0x1]  ;;  %v7689_v13 = vld [vmem:[%s9887_s26 + $0xa8] sm:$0xe] }
 0x1d5   : > { %v4818_v60 = vsel %vm713_vm2, %v4776_v16, %v4738_v61  ;;  %v4736_v36 = vpop.permute.xlu0 %4735  ;;  %v2521_v6 = vshrl.u32 %v7705_v39, 16 }
 0x1d6   : > { %v4816_v49 = vsel %vm713_vm2, %v4773_v43, %v4736_v36  ;;  %2583 = vrot.lane.b32.xlu1 %v2512_v5, %s9768_s27  ;;  %8634 = vmatpush3.bf16.msra.mxu1 %v2898_v20  ;;  %v2656_v61 = vrot.slane %v7719_v38, 1  ;;  %v8197_v43 = vcombine.low %v8165_v46, %v11612_v58  ;;  %v7659_v36 = vld [vmem:[%s9887_s26 + $0xb8] sm:$0xf] }
 0x1d7   : > { %v8103_v35 = vcombine.low %v4816_v49, %v4818_v60  ;;  %2581 = vrot.lane.b32.xlu0 %v2505_v28, %s9768_s27  ;;  %8752 = vmatpush3.bf16.msra.mxu0 %v9353_v3  ;;  %v8135_v3 = vld [vmem:[%s9887_s26 + $0xf8] sm:$0xf]  ;;  %v8166_v28 = vld [vmem:[%s9887_s26 + $0xe0] sm:$0xe]  ;;  %v2516_v60 = vshll.u32 %v7704_v23, 16 }
 0x1d8   : > { %v1992_v31 = vpop.permute.xlu1 %1991  ;;  %8950 = vmatprep.subr.msk.bf16.mxu0 %vm1332_vm0, %v9356_v8  ;;  %v8183_v16 = vcombine.low %v8135_v3, %v11712_v22  ;;  %v8198_v26 = vcombine.low %v8166_v28, %v11605_v2  ;;  %v2523_v8 = vshll.u32 %v7705_v39, 16  ;;  %v11728_v49 = vld [vmem:[%s9887_s26 + $0xbc] sm:$0x1]  ;;  %v5404_v11 = vrot.slane %v8197_v43, 1 }
 0x1d9   : > { %v2072_v29 = vsel %vm713_vm2, %v2032_v9, %v1992_v31  ;;  %8729 = vmatprep.mubr.msk.bf16.mxu0 %vm1307_vm3, %v8103_v35  ;;  %v1990_v52 = vpop.permute.xlu0 %1989  ;;  %v5272_v35 = vshll.u32 %v8184_v19, 16  ;;  %v7707_v58 = vcombine.low %v7659_v36, %v11728_v49  ;;  %v2514_v9 = vshrl.u32 %v7704_v23, 16  ;;  %v9599_v36 = vld [vmem:[%s9887_s26 + $0xf0] sm:$0xf] }
 0x1da   : > { %v2070_v7 = vsel %vm713_vm2, %v2029_v57, %v1990_v52  ;;  %2675 = vrot.lane.b32.xlu1 %v2654_v37, %s9769_s30  ;;  %v5405_v2 = vrot.slane %v8198_v26, 1  ;;  %v2525_v44 = vrot.slane %v2523_v8, 1  ;;  %v2518_v31 = vrot.slane %v2516_v60, 1 }
 0x1db   : > { %v7626_v18 = vcombine.low %v2070_v7, %v2072_v29  ;;  %2673 = vrot.lane.b32.xlu0 %v2653_v27, %s9769_s30  ;;  %8754 = vmatpush3.bf16.msra.mxu0 %v5647_v47  ;;  %v5265_v27 = vshll.u32 %v8183_v16, 16  ;;  %v5270_v57 = vshrl.u32 %v8184_v19, 16  ;;  %v5274_v29 = vrot.slane %v5272_v35, 1 }
 0x1dc   : > { %v4742_v30 = vpop.permute.xlu1 %4741  ;;  %v5263_v52 = vshrl.u32 %v8183_v16, 16  ;;  %v2526_v7 = vor.u32 %v2525_v44, %v2521_v6  ;;  %v8186_v39 = vcombine.low %v8138_v48, %v11750_v51  ;;  %v7721_v19 = vcombine.low %v7689_v13, %v11687_v59  ;;  %v8168_v44 = vld [vmem:[%s9887_s26 + $0x100] sm:$0xe]  ;;  %v8139_v13 = vld [vmem:[%s9887_s26 + $0x118] sm:$0xf] }
 0x1dd   : > { %v4822_v56 = vsel %vm713_vm2, %v4782_v34, %v4742_v30  ;;  %8610 = vmatmul.mubr.msk.bf16.gmra.mrb[4].mxu1 %vm1307_vm3, %v7626_v18  ;;  %v4740_v33 = vpop.permute.xlu0 %4739  ;;  %v5267_v15 = vrot.slane %v5265_v27, 1  ;;  %v2519_v18 = vor.u32 %v2518_v31, %v2514_v9  ;;  %v8137_v30 = vld [vmem:[%s9887_s26 + $0x108] sm:$0xf] }
 0x1de   : > { %v4820_v42 = vsel %vm713_vm2, %v4779_v53, %v4740_v33  ;;  %5332 = vrot.lane.b32.xlu1 %v5261_v55, %s9768_s27  ;;  %v2537_v55 = vshll.u32 %v7707_v58, 16  ;;  %v5275_v33 = vor.u32 %v5274_v29, %v5270_v57  ;;  %v8185_v28 = vcombine.low %v8137_v30, %v11756_v50  ;;  %v8167_v57 = vld [vmem:[%s9887_s26 + $0xf8] sm:$0xe]  ;;  %v9601_v29 = vld [vmem:[%s9887_s26 + $0x70] sm:$0xf] }
 0x1df   : > { %v8104_v5 = vcombine.low %v4820_v42, %v4822_v56  ;;  %5330 = vrot.lane.b32.xlu0 %v5254_v14, %s9768_s27  ;;  %v2530_v14 = vshll.u32 %v7706_v62, 16  ;;  %v2535_v42 = vshrl.u32 %v7707_v58, 16  ;;  %v5286_v16 = vshll.u32 %v8186_v39, 16  ;;  %v9602_v30 = vld [vmem:[%s9887_s26 + $0x108] sm:$0xf] }
 0x1e0   : > { %v1900_v54 = vpop.permute.xlu1 %1899  ;;  %v2539_v38 = vrot.slane %v2537_v55, 1  ;;  %v5279_v8 = vshll.u32 %v8185_v28, 16  ;;  %v8200_v55 = vcombine.low %v8168_v44, %v11708_v41  ;;  %v8199_v48 = vcombine.low %v8167_v57, %v11712_v22 }
 0x1e1   : > { %8730 = vmatmul.mubr.msk.bf16.gmra.mrb[4].mxu0 %vm1307_vm3, %v8104_v5  ;;  %v1898_v20 = vpop.permute.xlu0 %1897  ;;  %v2038_v0 = vsel %vm664_vm1, %v9596_v21, %v1900_v54  ;;  %v2528_v5 = vshrl.u32 %v7706_v62, 16  ;;  %v7688_v54 = vld [vmem:[%s9887_s26 + $0xa0] sm:$0xe]  ;;  %v5288_v6 = vrot.slane %v5286_v16, 1  ;;  %v7691_v21 = vld [vmem:[%s9887_s26 + $0xb8] sm:$0xe] }
 0x1e2   : > { %5424 = vrot.lane.b32.xlu1 %v5403_v12, %s9769_s30  ;;  %v2035_v1 = vsel %vm664_vm1, %v9597_v25, %v1898_v20  ;;  %v5268_v12 = vor.u32 %v5267_v15, %v5263_v52  ;;  %v2540_v20 = vor.u32 %v2539_v38, %v2535_v42  ;;  %v7720_v26 = vcombine.low %v7688_v54, %v11695_v24  ;;  %v8140_v38 = vld [vmem:[%s9887_s26 + $0x120] sm:$0xf] }
 0x1e3   : > { %5422 = vrot.lane.b32.xlu0 %v5402_v32, %s9769_s30  ;;  %v2532_v32 = vrot.slane %v2530_v14, 1  ;;  %v2658_v24 = vrot.slane %v7721_v19, 1  ;;  %v5281_v9 = vrot.slane %v5279_v8, 1  ;;  %v5407_v42 = vrot.slane %v8200_v55, 1 }
 0x1e4   : > { %v11730_v37 = vpop.permute.xlu1 %4649  ;;  %v2657_v58 = vrot.slane %v7720_v26, 1  ;;  %v5406_v54 = vrot.slane %v8199_v48, 1  ;;  %v11867_v48 = vld [vmem:[%s9887_s26 + $0x130] sm:$0xf] }
 0x1e5   : > { %v11736_v17 = vpop.permute.xlu0 %4647 }
 0x1e6   : > { %2679 = vrot.lane.b32.xlu1 %v2656_v61, %s9769_s30  ;;  %v2533_v61 = vor.u32 %v2532_v32, %v2528_v5  ;;  %v4785_v40 = vsel %vm664_vm1, %v9599_v36, %v11736_v17  ;;  %v9600_v17 = vld [vmem:[%s9887_s26 + $0x78] sm:$0xf]  ;;  %v11820_v32 = vld [vmem:[%s9887_s26 + $0x124] sm:$0x1] }
 0x1e7   : > { %2677 = vrot.lane.b32.xlu0 %v2655_v63, %s9769_s30  ;;  %v9598_v63 = vld [vmem:[%s9887_s26 + $0xf8] sm:$0xf]  ;;  %v8188_v26 = vcombine.low %v8140_v38, %v11820_v32 }
 0x1e8   : > { %v11742_v47 = vpop.permute.xlu1 %1903  ;;  %v4788_v43 = vsel %vm664_vm1, %v9598_v63, %v11730_v37 }
 0x1e9   : > { %v11744_v4 = vpop.permute.xlu0 %1901  ;;  %v2044_v31 = vsel %vm664_vm1, %v9600_v17, %v11742_v47 }
 0x1ea   : > { %5428 = vrot.lane.b32.xlu1 %v5405_v2, %s9769_s30  ;;  %v5284_v2 = vshrl.u32 %v8186_v39, 16  ;;  %v2041_v52 = vsel %vm664_vm1, %v9601_v29, %v11744_v4 }
 0x1eb   : > { %5426 = vrot.lane.b32.xlu0 %v5404_v11, %s9769_s30  ;;  %v5277_v11 = vshrl.u32 %v8185_v28, 16  ;;  %v11824_v28 = vld [vmem:[%s9887_s26 + $0x11c] sm:$0x1] }
 0x1ec   : > { %v1996_v34 = vpop.permute.xlu1 %1995  ;;  %v8187_v8 = vcombine.low %v8139_v13, %v11824_v28 }
 0x1ed   : > { %v2076_v53 = vsel %vm713_vm2, %v2038_v0, %v1996_v34  ;;  %v1994_v56 = vpop.permute.xlu0 %1993  ;;  %v5282_v4 = vor.u32 %v5281_v9, %v5277_v11  ;;  %v7661_v0 = vld [vmem:[%s9887_s26 + $0xc8] sm:$0xf]  ;;  %v11801_v34 = vld [vmem:[%s9887_s26 + $0xcc] sm:$0x1] }
 0x1ee   : > { %v2074_v45 = vsel %vm713_vm2, %v2035_v1, %v1994_v56  ;;  %2587 = vrot.lane.b32.xlu1 %v2526_v7, %s9768_s27  ;;  %v7690_v1 = vld [vmem:[%s9887_s26 + $0xb0] sm:$0xe]  ;;  %v11808_v56 = vld [vmem:[%s9887_s26 + $0xc4] sm:$0x1]  ;;  %v7709_v5 = vcombine.low %v7661_v0, %v11801_v34  ;;  %v5293_v44 = vshll.u32 %v8187_v8, 16 }
 0x1ef   : > { %v7627_v3 = vcombine.low %v2074_v45, %v2076_v53  ;;  %2585 = vrot.lane.b32.xlu0 %v2519_v18, %s9768_s27  ;;  %v5289_v18 = vor.u32 %v5288_v6, %v5284_v2  ;;  %v7660_v53 = vld [vmem:[%s9887_s26 + $0xc0] sm:$0xf]  ;;  %v11850_v2 = vld [vmem:[%s9887_s26 + $0xd4] sm:$0x1]  ;;  %v9604_v0 = vld [vmem:[%s9887_s26 + $0x88] sm:$0xf] }
 0x1f0   : > { %v4654_v23 = vpop.permute.xlu1 %4653  ;;  %v7708_v19 = vcombine.low %v7660_v53, %v11808_v56  ;;  %v5295_v55 = vrot.slane %v5293_v44, 1  ;;  %v9605_v53 = vld [vmem:[%s9887_s26 + $0x80] sm:$0xf] }
 0x1f1   : > { %8613 = vmatprep.mubr.msk.bf16.mxu1 %vm1307_vm3, %v7627_v3  ;;  %v4652_v46 = vpop.permute.xlu0 %4651  ;;  %v4794_v41 = vsel %vm664_vm1, %v9602_v30, %v4654_v23  ;;  %v7723_v3 = vcombine.low %v7691_v21, %v11728_v49  ;;  %v8169_v49 = vld [vmem:[%s9887_s26 + $0x108] sm:$0xe]  ;;  %v11870_v21 = vld [vmem:[%s9887_s26 + $0x134] sm:$0x1] }
 0x1f2   : > { %5336 = vrot.lane.b32.xlu1 %v5275_v33, %s9768_s27  ;;  %v9603_v33 = vld [vmem:[%s9887_s26 + $0x100] sm:$0xf]  ;;  %v8201_v36 = vcombine.low %v8169_v49, %v11756_v50  ;;  %v2542_v17 = vshrl.u32 %v7708_v19, 16 }
 0x1f3   : > { %5334 = vrot.lane.b32.xlu0 %v5268_v12, %s9768_s27  ;;  %v4791_v12 = vsel %vm664_vm1, %v9603_v33, %v4652_v46  ;;  %v7722_v46 = vcombine.low %v7690_v1, %v11734_v10  ;;  %v2660_v63 = vrot.slane %v7723_v3, 1  ;;  %v11878_v1 = vld [vmem:[%s9887_s26 + $0x12c] sm:$0x1] }
 0x1f4   : > { %v4746_v60 = vpop.permute.xlu1 %4745  ;;  %v5408_v9 = vrot.slane %v8201_v36, 1 }
 0x1f5   : > { %v4826_v59 = vsel %vm713_vm2, %v4788_v43, %v4746_v60  ;;  %v4744_v35 = vpop.permute.xlu0 %4743  ;;  %v2551_v43 = vshll.u32 %v7709_v5, 16  ;;  %v2659_v60 = vrot.slane %v7722_v46, 1  ;;  %v7693_v46 = vld [vmem:[%s9887_s26 + $0xc8] sm:$0xe] }
 0x1f6   : > { %v4824_v27 = vsel %vm713_vm2, %v4785_v40, %v4744_v35  ;;  %2591 = vrot.lane.b32.xlu1 %v2540_v20, %s9768_s27  ;;  %v8170_v20 = vld [vmem:[%s9887_s26 + $0x110] sm:$0xe]  ;;  %v2544_v40 = vshll.u32 %v7708_v19, 16  ;;  %v11842_v35 = vld [vmem:[%s9887_s26 + $0xdc] sm:$0x1] }
 0x1f7   : > { %v8105_v37 = vcombine.low %v4824_v27, %v4826_v59  ;;  %2589 = vrot.lane.b32.xlu0 %v2533_v61, %s9768_s27  ;;  %v8202_v10 = vcombine.low %v8170_v20, %v11750_v51  ;;  %v11839_v59 = vld [vmem:[%s9887_s26 + $0xd8] sm:$0xf]  ;;  %v5300_v51 = vshll.u32 %v8188_v26, 16  ;;  %v2553_v50 = vrot.slane %v2551_v43, 1 }
 0x1f8   : > { %v2000_v62 = vpop.permute.xlu1 %1999  ;;  %v7711_v11 = vcombine.low %v11839_v59, %v11842_v35 }
 0x1f9   : > { %v2080_v15 = vsel %vm713_vm2, %v2044_v31, %v2000_v62  ;;  %8733 = vmatprep.mubr.msk.bf16.mxu0 %vm1307_vm3, %v8105_v37  ;;  %v1998_v7 = vpop.permute.xlu0 %1997  ;;  %v5409_v37 = vrot.slane %v8202_v10, 1  ;;  %v2546_v31 = vrot.slane %v2544_v40, 1 }
 0x1fa   : > { %v2078_v47 = vsel %vm713_vm2, %v2041_v52, %v1998_v7  ;;  %2683 = vrot.lane.b32.xlu1 %v2658_v24, %s9769_s30  ;;  %v11847_v24 = vld [vmem:[%s9887_s26 + $0xd0] sm:$0xf]  ;;  %v5298_v52 = vshrl.u32 %v8188_v26, 16  ;;  %v5291_v7 = vshrl.u32 %v8187_v8, 16  ;;  %v7725_v26 = vcombine.low %v7693_v46, %v11801_v34 }
 0x1fb   : > { %v7628_v14 = vcombine.low %v2078_v47, %v2080_v15  ;;  %2681 = vrot.lane.b32.xlu0 %v2657_v58, %s9769_s30  ;;  %v2549_v58 = vshrl.u32 %v7709_v5, 16  ;;  %v7710_v62 = vcombine.low %v11847_v24, %v11850_v2  ;;  %v5302_v15 = vrot.slane %v5300_v51, 1  ;;  %v9607_v51 = vld [vmem:[%s9887_s26 + $0x110] sm:$0xf] }
 0x1fc   : > { %v4750_v25 = vpop.permute.xlu1 %4749  ;;  %v8190_v5 = vcombine.low %v11867_v48, %v11870_v21 }
 0x1fd   : > { %v4830_v22 = vsel %vm713_vm2, %v4794_v41, %v4750_v25  ;;  %8614 = vmatmul.mubr.msk.bf16.gmra.mrb[8].mxu1 %vm1307_vm3, %v7628_v14  ;;  %v4748_v45 = vpop.permute.xlu0 %4747  ;;  %v2554_v47 = vor.u32 %v2553_v50, %v2549_v58  ;;  %v2547_v14 = vor.u32 %v2546_v31, %v2542_v17  ;;  %v11875_v25 = vld [vmem:[%s9887_s26 + $0x128] sm:$0xf] }
 0x1fe   : > { %v4828_v39 = vsel %vm713_vm2, %v4791_v12, %v4748_v45  ;;  %5340 = vrot.lane.b32.xlu1 %v5289_v18, %s9768_s27  ;;  %v2565_v18 = vshll.u32 %v7711_v11, 16  ;;  %v5303_v45 = vor.u32 %v5302_v15, %v5298_v52  ;;  %v8189_v20 = vcombine.low %v11875_v25, %v11878_v1 }
 0x1ff   : > { %v8106_v23 = vcombine.low %v4828_v39, %v4830_v22  ;;  %5338 = vrot.lane.b32.xlu0 %v5282_v4, %s9768_s27  ;;  %v2558_v4 = vshll.u32 %v7710_v62, 16  ;;  %v2563_v39 = vshrl.u32 %v7711_v11, 16  ;;  %v5314_v8 = vshll.u32 %v8190_v5, 16 }
 0x200   : > { %v1908_v16 = vpop.permute.xlu1 %1907  ;;  %v2567_v3 = vrot.slane %v2565_v18, 1  ;;  %v5307_v43 = vshll.u32 %v8189_v20, 16  ;;  %v5312_v50 = vshrl.u32 %v8190_v5, 16  ;;  %v5305_v31 = vshrl.u32 %v8189_v20, 16  ;;  %v8174_v20 = vld [vmem:[%s9887_s26 + $0x130] sm:$0xe] }
 0x201   : > { %8734 = vmatmul.mubr.msk.bf16.gmra.mrb[8].mxu0 %vm1307_vm3, %v8106_v23  ;;  %v1906_v61 = vpop.permute.xlu0 %1905  ;;  %v2050_v30 = vsel %vm664_vm1, %v9604_v0, %v1908_v16  ;;  %v2556_v23 = vshrl.u32 %v7710_v62, 16  ;;  %v7692_v16 = vld [vmem:[%s9887_s26 + $0xc0] sm:$0xe]  ;;  %v5316_v11 = vrot.slane %v5314_v8, 1  ;;  %v9608_v62 = vld [vmem:[%s9887_s26 + $0x98] sm:$0xf] }
 0x202   : > { %5432 = vrot.lane.b32.xlu1 %v5407_v42, %s9769_s30  ;;  %v2047_v33 = vsel %vm664_vm1, %v9605_v53, %v1906_v61  ;;  %v5296_v42 = vor.u32 %v5295_v55, %v5291_v7  ;;  %v2568_v61 = vor.u32 %v2567_v3, %v2563_v39  ;;  %v7724_v10 = vcombine.low %v7692_v16, %v11808_v56  ;;  %v8171_v7 = vld [vmem:[%s9887_s26 + $0x118] sm:$0xe]  ;;  %v9609_v55 = vld [vmem:[%s9887_s26 + $0x90] sm:$0xf]  ;;  %v9611_v3 = vld [vmem:[%s9887_s26 + $0x120] sm:$0xf] }
 0x203   : > { %5430 = vrot.lane.b32.xlu0 %v5406_v54, %s9769_s30  ;;  %v2560_v54 = vrot.slane %v2558_v4, 1  ;;  %v2662_v56 = vrot.slane %v7725_v26, 1  ;;  %v5317_v0 = vor.u32 %v5316_v11, %v5312_v50  ;;  %v7694_v39 = vld [vmem:[%s9887_s26 + $0xd0] sm:$0xe]  ;;  %v11982_v50 = vld [vmem:[%s9887_s26 + $0xc8] sm:$0xf] }
 0x204   : > { %v11844_v27 = vpop.permute.xlu1 %4657  ;;  %v2661_v17 = vrot.slane %v7724_v10, 1  ;;  %v11985_v11 = vld [vmem:[%s9887_s26 + $0xcc] sm:$0x1] }
 0x205   : > { %v11852_v6 = vpop.permute.xlu0 %4655 }
 0x206   : > { %2687 = vrot.lane.b32.xlu1 %v2660_v63, %s9769_s30  ;;  %v2561_v63 = vor.u32 %v2560_v54, %v2556_v23  ;;  %v4797_v44 = vsel %vm664_vm1, %v9607_v51, %v11852_v6  ;;  %v5309_v6 = vrot.slane %v5307_v43, 1  ;;  %v8173_v43 = vld [vmem:[%s9887_s26 + $0x128] sm:$0xe]  ;;  %v8206_v51 = vcombine.low %v8174_v20, %v11870_v21 }
 0x207   : > { %2685 = vrot.lane.b32.xlu0 %v2659_v60, %s9769_s30  ;;  %v9606_v60 = vld [vmem:[%s9887_s26 + $0x118] sm:$0xf] }
 0x208   : > { %v11860_v57 = vpop.permute.xlu1 %1911  ;;  %v4800_v36 = vsel %vm664_vm1, %v9606_v60, %v11844_v27  ;;  %v5310_v53 = vor.u32 %v5309_v6, %v5305_v31  ;;  %v11965_v60 = vld [vmem:[%s9887_s26 + $0x100] sm:$0xf]  ;;  %v5413_v6 = vrot.slane %v8206_v51, 1 }
 0x209   : > { %v11862_v29 = vpop.permute.xlu0 %1909  ;;  %v2056_v52 = vsel %vm664_vm1, %v9608_v62, %v11860_v57 }
 0x20a   : > { %5436 = vrot.lane.b32.xlu1 %v5409_v37, %s9769_s30 }
 0x20b   : > { %5434 = vrot.lane.b32.xlu0 %v5408_v9, %s9769_s30  ;;  %v8172_v9 = vld [vmem:[%s9887_s26 + $0x120] sm:$0xe] }
 0x20c   : > { %v2004_v41 = vpop.permute.xlu1 %2003  ;;  %v8204_v4 = vcombine.low %v8172_v9, %v11820_v32  ;;  %v11930_v32 = vld [vmem:[%s9887_s26 + $0xb0] sm:$0xf] }
 0x20d   : > { %v2084_v12 = vsel %vm713_vm2, %v2050_v30, %v2004_v41  ;;  %v2002_v22 = vpop.permute.xlu0 %2001  ;;  %v7695_v30 = vld [vmem:[%s9887_s26 + $0xd8] sm:$0xe] }
 0x20e   : > { %v2082_v38 = vsel %vm713_vm2, %v2047_v33, %v2002_v22  ;;  %2595 = vrot.lane.b32.xlu1 %v2554_v47, %s9768_s27  ;;  %v2053_v47 = vsel %vm664_vm1, %v9609_v55, %v11862_v29  ;;  %v11922_v41 = vld [vmem:[%s9887_s26 + $0xb8] sm:$0xf]  ;;  %v8203_v33 = vcombine.low %v8171_v7, %v11824_v28  ;;  %v11933_v22 = vld [vmem:[%s9887_s26 + $0xb4] sm:$0x1]  ;;  %v5411_v23 = vrot.slane %v8204_v4, 1 }
 0x20f   : > { %v7629_v13 = vcombine.low %v2082_v38, %v2084_v12  ;;  %2593 = vrot.lane.b32.xlu0 %v2547_v14, %s9768_s27  ;;  %v11927_v12 = vld [vmem:[%s9887_s26 + $0xbc] sm:$0x1]  ;;  %v7727_v46 = vcombine.low %v7695_v30, %v11842_v35  ;;  %v8295_v16 = vcombine.low %v11930_v32, %v11933_v22  ;;  %v11961_v35 = vld [vmem:[%s12900_s1 + $0x1c0] sm:$0xff]   ;;  %v8298_v55 = vcombine.low %v11982_v50, %v11985_v11  ;;  %v12004_v4 = vld [vmem:[%s9887_s26 + $0x118] sm:$0xf] }
 0x210   : > { %v4662_v19 = vpop.permute.xlu1 %4661  ;;  %v5410_v8 = vrot.slane %v8203_v33, 1  ;;  %8771 = vmatprep.subr.bf16.mxu0 %v11961_v35  ;;  %8801 = vmatprep.subr.bf16.mxu1 %v11961_v35  ;;  %v12012_v30 = vld [vmem:[%s9887_s26 + $0x110] sm:$0xf] }
 0x211   : > { %8617 = vmatprep.mubr.msk.bf16.mxu1 %vm1307_vm3, %v7629_v13  ;;  %v4660_v49 = vpop.permute.xlu0 %4659 }
 0x212   : > { %5344 = vrot.lane.b32.xlu1 %v5303_v45, %s9768_s27  ;;  %v9610_v45 = vld [vmem:[%s9887_s26 + $0x128] sm:$0xf]  ;;  %v4803_v5 = vsel %vm664_vm1, %v9611_v3, %v4660_v49 }
 0x213   : > { %5342 = vrot.lane.b32.xlu0 %v5296_v42, %s9768_s27  ;;  %v4806_v42 = vsel %vm664_vm1, %v9610_v45, %v4662_v19  ;;  %v8296_v19 = vcombine.low %v11922_v41, %v11927_v12  ;;  %v11951_v49 = vld [vmem:[%s9887_s26 + $0x108] sm:$0xf] }
 0x214   : > { %v4754_v40 = vpop.permute.xlu1 %4753 }
 0x215   : > { %v4834_v34 = vsel %vm713_vm2, %v4800_v36, %v4754_v40  ;;  %v4752_v37 = vpop.permute.xlu0 %4751  ;;  %v11968_v36 = vld [vmem:[%s9887_s26 + $0x104] sm:$0x1] }
 0x216   : > { %v4832_v58 = vsel %vm713_vm2, %v4797_v44, %v4752_v37  ;;  %2599 = vrot.lane.b32.xlu1 %v2568_v61, %s9768_s27  ;;  %v11954_v61 = vld [vmem:[%s9887_s26 + $0x10c] sm:$0x1]  ;;  %v2664_v44 = vrot.slane %v7727_v46, 1  ;;  %v5896_v37 = vshll.u32 %v8295_v16, 16  ;;  %v8303_v21 = vcombine.low %v11965_v60, %v11968_v36 }
 0x217   : > { %v8107_v27 = vcombine.low %v4832_v58, %v4834_v34  ;;  %2597 = vrot.lane.b32.xlu0 %v2561_v63, %s9768_s27  ;;  %v7726_v63 = vcombine.low %v7694_v39, %v11850_v2  ;;  %v8304_v2 = vcombine.low %v11951_v49, %v11954_v61  ;;  %v5903_v34 = vshll.u32 %v8296_v19, 16 }
 0x218   : > { %v2008_v15 = vpop.permute.xlu1 %2007  ;;  %v5898_v7 = vrot.slane %v5896_v37, 1  ;;  %v5917_v39 = vshll.u32 %v8298_v55, 16 }
 0x219   : > { %v2088_v18 = vsel %vm713_vm2, %v2056_v52, %v2008_v15  ;;  %8737 = vmatprep.mubr.msk.bf16.mxu0 %vm1307_vm3, %v8107_v27  ;;  %v2006_v14 = vpop.permute.xlu0 %2005  ;;  %v2663_v58 = vrot.slane %v7726_v63, 1  ;;  %v11990_v27 = vld [vmem:[%s9887_s26 + $0xc0] sm:$0xf]  ;;  %v5959_v62 = vshll.u32 %v8304_v2, 16  ;;  %v5905_v52 = vrot.slane %v5903_v34, 1 }
 0x21a   : > { %v2086_v57 = vsel %vm713_vm2, %v2053_v47, %v2006_v14  ;;  %2691 = vrot.lane.b32.xlu1 %v2662_v56, %s9769_s30  ;;  %v8205_v56 = vcombine.low %v8173_v43, %v11878_v1  ;;  %v5901_v1 = vshrl.u32 %v8296_v19, 16  ;;  %v5894_v15 = vshrl.u32 %v8295_v16, 16  ;;  %v9613_v19 = vld [vmem:[%s9887_s26 + $0x50] sm:$0xf] }
 0x21b   : > { %v7630_v29 = vcombine.low %v2086_v57, %v2088_v18  ;;  %2689 = vrot.lane.b32.xlu0 %v2661_v17, %s9769_s30  ;;  %v11993_v17 = vld [vmem:[%s9887_s26 + $0xc4] sm:$0x1]  ;;  %v5952_v18 = vshll.u32 %v8303_v21, 16  ;;  %v12007_v57 = vld [vmem:[%s9887_s26 + $0x11c] sm:$0x1]  ;;  %v5957_v33 = vshrl.u32 %v8304_v2, 16 }
 0x21c   : > { %v4758_v38 = vpop.permute.xlu1 %4757  ;;  %v5412_v47 = vrot.slane %v8205_v56, 1  ;;  %v8297_v14 = vcombine.low %v11990_v27, %v11993_v17  ;;  %v5961_v45 = vrot.slane %v5959_v62, 1  ;;  %v8306_v3 = vcombine.low %v12004_v4, %v12007_v57 }
 0x21d   : > { %v4838_v13 = vsel %vm713_vm2, %v4806_v42, %v4758_v38  ;;  %8618 = vmatmul.mubr.msk.bf16.gmra.mrb[12].mxu1 %vm1307_vm3, %v7630_v29  ;;  %v4756_v28 = vpop.permute.xlu0 %4755  ;;  %v12015_v29 = vld [vmem:[%s9887_s26 + $0x114] sm:$0x1]  ;;  %v5906_v42 = vor.u32 %v5905_v52, %v5901_v1  ;;  %v5899_v38 = vor.u32 %v5898_v7, %v5894_v15  ;;  %v5915_v43 = vshrl.u32 %v8298_v55, 16  ;;  %v8280_v55 = vld [vmem:[%s9887_s26 + $0xb8] sm:$0xe] }
 0x21e   : > { %v4836_v54 = vsel %vm713_vm2, %v4803_v5, %v4756_v28  ;;  %5348 = vrot.lane.b32.xlu1 %v5317_v0, %s9768_s27  ;;  %v5950_v5 = vshrl.u32 %v8303_v21, 16  ;;  %v5910_v28 = vshll.u32 %v8297_v14, 16  ;;  %v5962_v63 = vor.u32 %v5961_v45, %v5957_v33  ;;  %v9615_v45 = vld [vmem:[%s9887_s26 + $0xa8] sm:$0xf] }
 0x21f   : > { %v8108_v26 = vcombine.low %v4836_v54, %v4838_v13  ;;  %5346 = vrot.lane.b32.xlu0 %v5310_v53, %s9768_s27  ;;  %v5954_v13 = vrot.slane %v5952_v18, 1  ;;  %v9612_v54 = vld [vmem:[%s9887_s26 + $0x58] sm:$0xf]  ;;  %v5919_v2 = vrot.slane %v5917_v39, 1  ;;  %v5973_v34 = vshll.u32 %v8306_v3, 16 }
 0x220   : > { %v2572_v10 = vpop.permute.xlu1 %2571  ;;  %v5971_v1 = vshrl.u32 %v8306_v3, 16  ;;  %v9614_v18 = vld [vmem:[%s9887_s26 + $0xb0] sm:$0xf] }
 0x221   : > { %8738 = vmatmul.mubr.msk.bf16.gmra.mrb[12].mxu0 %vm1307_vm3, %v8108_v26  ;;  %v2570_v40 = vpop.permute.xlu0 %2569  ;;  %v2702_v46 = vsel %vm664_vm1, %v9612_v54, %v2572_v10  ;;  %v5955_v10 = vor.u32 %v5954_v13, %v5950_v5  ;;  %v5975_v62 = vrot.slane %v5973_v34, 1  ;;  %v8312_v13 = vcombine.low %v8280_v55, %v11927_v12  ;;  %v12068_v34 = vld [vmem:[%s9887_s26 + $0xd8] sm:$0xf]  ;;  %v8289_v55 = vld [vmem:[%s9887_s26 + $0x110] sm:$0xe] }
 0x222   : > { %5440 = vrot.lane.b32.xlu1 %v5411_v23, %s9769_s30  ;;  %v8305_v23 = vcombine.low %v12012_v30, %v12015_v29  ;;  %v2699_v16 = vsel %vm664_vm1, %v9613_v19, %v2570_v40  ;;  %v5912_v40 = vrot.slane %v5910_v28, 1  ;;  %v8287_v19 = vld [vmem:[%s9887_s26 + $0x100] sm:$0xe] }
 0x223   : > { %5438 = vrot.lane.b32.xlu0 %v5410_v8, %s9769_s30  ;;  %v5976_v5 = vor.u32 %v5975_v62, %v5971_v1  ;;  %v12080_v1 = vld [vmem:[%s9887_s26 + $0xd4] sm:$0x1]  ;;  %v9619_v62 = vld [vmem:[%s9887_s26 + $0xb8] sm:$0xf] }
 0x224   : > { %v11987_v9 = vpop.permute.xlu1 %5320  ;;  %v5964_v15 = vshrl.u32 %v8305_v23, 16 }
 0x225   : > { %v11995_v31 = vpop.permute.xlu0 %5318 }
 0x226   : > { %2695 = vrot.lane.b32.xlu1 %v2664_v44, %s9769_s30  ;;  %v5908_v44 = vshrl.u32 %v8297_v14, 16  ;;  %v5451_v14 = vsel %vm664_vm1, %v9614_v18, %v11987_v9  ;;  %v8288_v9 = vld [vmem:[%s9887_s26 + $0x108] sm:$0xe] }
 0x227   : > { %2693 = vrot.lane.b32.xlu0 %v2663_v58, %s9769_s30  ;;  %v5966_v58 = vshll.u32 %v8305_v23, 16  ;;  %v9382_v18 = vld [vmem:[%s12900_s1 + $0x1c8] sm:$0xff]  }
 0x228   : > { %v12009_v0 = vpop.permute.xlu1 %2575  ;;  %v5913_v52 = vor.u32 %v5912_v40, %v5908_v44  ;;  %v8281_v44 = vld [vmem:[%s9887_s26 + $0xc0] sm:$0xe] }
 0x229   : > { %v12017_v53 = vpop.permute.xlu0 %2573  ;;  %v5968_v7 = vrot.slane %v5966_v58, 1  ;;  %v8290_v58 = vld [vmem:[%s9887_s26 + $0x118] sm:$0xe] }
 0x22a   : > { %5444 = vrot.lane.b32.xlu1 %v5413_v6, %s9769_s30  ;;  %v5920_v6 = vor.u32 %v5919_v2, %v5915_v43  ;;  %v8319_v2 = vcombine.low %v8287_v19, %v11968_v36  ;;  %v9383_v19 = vld [vmem:[%s12900_s1 + $0x1d0] sm:$0xff]  }
 0x22b   : > { %5442 = vrot.lane.b32.xlu0 %v5412_v47, %s9769_s30  ;;  %v8279_v47 = vld [vmem:[%s9887_s26 + $0xb0] sm:$0xe]  ;;  %v5969_v54 = vor.u32 %v5968_v7, %v5964_v15 }
 0x22c   : > { %v2668_v20 = vpop.permute.xlu1 %2667  ;;  %v8311_v28 = vcombine.low %v8279_v47, %v11933_v22  ;;  %v12089_v47 = vld [vmem:[%s9887_s26 + $0x128] sm:$0xf] }
 0x22d   : > { %v2748_v26 = vsel %vm713_vm2, %v2702_v46, %v2668_v20  ;;  %v2666_v8 = vpop.permute.xlu0 %2665 }
 0x22e   : > { %v2746_v51 = vsel %vm713_vm2, %v2699_v16, %v2666_v8  ;;  %6007 = vrot.lane.b32.xlu1 %v5906_v42, %s9768_s27  ;;  %v5448_v42 = vsel %vm664_vm1, %v9615_v45, %v11995_v31  ;;  %v9616_v31 = vld [vmem:[%s9887_s26 + $0x68] sm:$0xf]  ;;  %v9617_v16 = vld [vmem:[%s9887_s26 + $0x60] sm:$0xf]  ;;  %v8320_v8 = vcombine.low %v8288_v9, %v11954_v61  ;;  %v6085_v43 = vrot.slane %v8311_v28, 1 }
 0x22f   : > { %v7742_v37 = vcombine.low %v2746_v51, %v2748_v26  ;;  %6005 = vrot.lane.b32.xlu0 %v5899_v38, %s9768_s27  ;;  %v2708_v46 = vsel %vm664_vm1, %v9616_v31, %v12009_v0  ;;  %v2705_v12 = vsel %vm664_vm1, %v9617_v16, %v12017_v53  ;;  %v8282_v51 = vld [vmem:[%s9887_s26 + $0xc8] sm:$0xe]  ;;  %v12071_v61 = vld [vmem:[%s9887_s26 + $0xdc] sm:$0x1]  ;;  %v12102_v45 = vld [vmem:[%s9887_s26 + $0x12c] sm:$0x1]  ;;  %v8321_v28 = vcombine.low %v8289_v55, %v12015_v29 }
 0x230   : > { %v5325_v56 = vpop.permute.xlu1 %5324  ;;  %v6094_v7 = vrot.slane %v8320_v8, 1  ;;  %v12123_v9 = vcombine.low %v12089_v47, %v12102_v45  ;;  %v12134_v29 = vld [vmem:[%s9887_s26 + $0xe8] sm:$0xf] }
 0x231   : > { %8635 = vmatprep.mubr.msk.bf16.mxu1 %vm1307_vm3, %v7742_v37  ;;  %v5323_v21 = vpop.permute.xlu0 %5322  ;;  %v9618_v37 = vld [vmem:[%s9887_s26 + $0xc0] sm:$0xf]  ;;  %v6095_v8 = vrot.slane %v8321_v28, 1  ;;  %v9620_v28 = vld [vmem:[%s9887_s26 + $0x78] sm:$0xf] }
 0x232   : > { %6023 = vrot.lane.b32.xlu1 %v5962_v63, %s9768_s27  ;;  %v6086_v63 = vrot.slane %v8312_v13, 1  ;;  %v5454_v36 = vsel %vm664_vm1, %v9619_v62, %v5323_v21  ;;  %v8313_v21 = vcombine.low %v8281_v44, %v11993_v17  ;;  %v8322_v13 = vcombine.low %v8290_v58, %v12007_v57  ;;  %v9384_v58 = vld [vmem:[%s12900_s1 + $0x1d8] sm:$0xff]  }
 0x233   : > { %6021 = vrot.lane.b32.xlu0 %v5955_v10, %s9768_s27  ;;  %v5457_v10 = vsel %vm664_vm1, %v9618_v37, %v5325_v56  ;;  %v8314_v56 = vcombine.low %v8282_v51, %v11985_v11  ;;  %v12105_v11 = vld [vmem:[%s9887_s26 + $0x120] sm:$0xf] }
 0x234   : > { %v5417_v33 = vpop.permute.xlu1 %5416  ;;  %v6087_v31 = vrot.slane %v8313_v21, 1 }
 0x235   : > { %v5497_v38 = vsel %vm713_vm2, %v5451_v14, %v5417_v33  ;;  %v5415_v39 = vpop.permute.xlu0 %5414  ;;  %v12099_v33 = vcombine.low %v12068_v34, %v12071_v61 }
 0x236   : > { %v5495_v3 = vsel %vm713_vm2, %v5448_v42, %v5415_v39  ;;  %6011 = vrot.lane.b32.xlu1 %v5920_v6, %s9768_s27  ;;  %v12077_v6 = vld [vmem:[%s9887_s26 + $0xd0] sm:$0xf]  ;;  %v12108_v42 = vld [vmem:[%s9887_s26 + $0x124] sm:$0x1]  ;;  %v6093_v39 = vrot.slane %v8319_v2, 1 }
 0x237   : > { %v8221_v23 = vcombine.low %v5495_v3, %v5497_v38  ;;  %6009 = vrot.lane.b32.xlu0 %v5913_v52, %s9768_s27  ;;  %v8299_v3 = vcombine.low %v12077_v6, %v12080_v1 }
 0x238   : > { %v2672_v20 = vpop.permute.xlu1 %2671 }
 0x239   : > { %v2752_v22 = vsel %vm713_vm2, %v2708_v46, %v2672_v20  ;;  %8755 = vmatprep.mubr.msk.bf16.mxu0 %vm1307_vm3, %v8221_v23  ;;  %v2670_v26 = vpop.permute.xlu0 %2669  ;;  %v12127_v23 = vcombine.low %v12105_v11, %v12108_v42  ;;  %v5931_v46 = vshll.u32 %v12099_v33, 16  ;;  %v5924_v57 = vshll.u32 %v8299_v3, 16  ;;  %v12137_v20 = vld [vmem:[%s9887_s26 + $0xec] sm:$0x1] }
 0x23a   : > { %v2750_v0 = vsel %vm713_vm2, %v2705_v12, %v2670_v26  ;;  %6027 = vrot.lane.b32.xlu1 %v5976_v5, %s9768_s27  ;;  %v12145_v12 = vld [vmem:[%s9887_s26 + $0xe0] sm:$0xf]  ;;  %v6096_v26 = vrot.slane %v8322_v13, 1  ;;  %v8302_v2 = vcombine.low %v12134_v29, %v12137_v20 }
 0x23b   : > { %v7743_v53 = vcombine.low %v2750_v0, %v2752_v22  ;;  %6025 = vrot.lane.b32.xlu0 %v5969_v54, %s9768_s27  ;;  %v6088_v54 = vrot.slane %v8314_v56, 1  ;;  %v12148_v22 = vld [vmem:[%s9887_s26 + $0xe4] sm:$0x1]  ;;  %v5987_v0 = vshll.u32 %v12123_v9, 16  ;;  %v5933_v51 = vrot.slane %v5931_v46, 1 }
 0x23c   : > { %v5421_v40 = vpop.permute.xlu1 %5420  ;;  %v5926_v44 = vrot.slane %v5924_v57, 1  ;;  %v8301_v37 = vcombine.low %v12145_v12, %v12148_v22  ;;  %v5978_v55 = vshrl.u32 %v12127_v23, 16  ;;  %v5945_v21 = vshll.u32 %v8302_v2, 16  ;;  %v9385_v13 = vld [vmem:[%s12900_s1 + $0x1e0] sm:$0xff]  }
 0x23d   : > { %v5501_v52 = vsel %vm713_vm2, %v5457_v10, %v5421_v40  ;;  %8636 = vmatmul.mubr.msk.bf16.vlgmr.msra.gmra.mrb[0].mxu1 %vm1307_vm3, %v7743_v53  ;;  %v5419_v15 = vpop.permute.xlu0 %5418  ;;  %v5922_v53 = vshrl.u32 %v8299_v3, 16  ;;  %v12162_v10 = vld [vmem:[%s9887_s26 + $0x138] sm:$0xf]  ;;  %v12165_v40 = vld [vmem:[%s9887_s26 + $0x13c] sm:$0x1]  ;;  %v5989_v56 = vrot.slane %v5987_v0, 1 }
 0x23e   : > { %v5499_v14 = vsel %vm713_vm2, %v5454_v36, %v5419_v15  ;;  %6103 = vrot.lane.b32.xlu1 %v6086_v63, %s9769_s30  ;;  %8808 = vmatpush3.bf16.msra.mxu1 %v11961_v35  ;;  %v5980_v63 = vshll.u32 %v12127_v23, 16  ;;  %v12173_v36 = vld [vmem:[%s9887_s26 + $0x130] sm:$0xf]  ;;  %v5943_v0 = vshrl.u32 %v8302_v2, 16 }
 0x23f   : > { %v8222_v38 = vcombine.low %v5499_v14, %v5501_v52  ;;  %6101 = vrot.lane.b32.xlu0 %v6085_v43, %s9769_s30  ;;  %8802 = vmatprep.subr.bf16.mxu1 %v9382_v18  ;;  %v5929_v43 = vshrl.u32 %v12099_v33, 16  ;;  %v12176_v52 = vld [vmem:[%s9887_s26 + $0x134] sm:$0x1]  ;;  %v8310_v33 = vcombine.low %v12162_v10, %v12165_v40 }
 0x240   : > { %v12114_v17 = vpop.permute.xlu1 %2579  ;;  %v8309_v3 = vcombine.low %v12173_v36, %v12176_v52 }
 0x241   : > { %8756 = vmatmul.mubr.msk.bf16.vlgmr.msra.gmra.mrb[0].mxu0 %vm1307_vm3, %v8222_v38  ;;  %v12117_v5 = vpop.permute.xlu0 %2577  ;;  %v5934_v14 = vor.u32 %v5933_v51, %v5929_v43  ;;  %v5927_v38 = vor.u32 %v5926_v44, %v5922_v53  ;;  %v6001_v43 = vshll.u32 %v8310_v33, 16  ;;  %v5936_v51 = vshrl.u32 %v8301_v37, 16  ;;  %v9386_v44 = vld [vmem:[%s12900_s1 + $0x1e8] sm:$0xff]  }
 0x242   : > { %6119 = vrot.lane.b32.xlu1 %v6094_v7, %s9769_s30  ;;  %8772 = vmatpush3.bf16.msra.mxu0 %v11961_v35  ;;  %v5985_v7 = vshrl.u32 %v12123_v9, 16  ;;  %v2714_v9 = vsel %vm664_vm1, %v9620_v28, %v12114_v17 }
 0x243   : > { %6117 = vrot.lane.b32.xlu0 %v6093_v39, %s9769_s30  ;;  %8773 = vmatprep.subr.bf16.mxu0 %v9382_v18  ;;  %v5938_v39 = vshll.u32 %v8301_v37, 16  ;;  %v5999_v37 = vshrl.u32 %v8310_v33, 16  ;;  %v9623_v33 = vld [vmem:[%s9887_s26 + $0xc8] sm:$0xf] }
 0x244   : > { %v12142_v16 = vpop.permute.xlu1 %5328  ;;  %8809 = vmatpush3.bf16.msra.mxu1 %v9382_v18 }
 0x245   : > { %v12150_v35 = vpop.permute.xlu0 %5326  ;;  %8803 = vmatprep.subr.bf16.mxu1 %v9383_v19  ;;  %v5940_v53 = vrot.slane %v5938_v39, 1  ;;  %v9622_v39 = vld [vmem:[%s9887_s26 + $0xd0] sm:$0xf] }
 0x246   : > { %6107 = vrot.lane.b32.xlu1 %v6088_v54, %s9769_s30  ;;  %8774 = vmatpush3.bf16.msra.mxu0 %v9382_v18  ;;  %v5982_v18 = vrot.slane %v5980_v63, 1  ;;  %v9621_v54 = vld [vmem:[%s9887_s26 + $0x70] sm:$0xf]  ;;  %v5947_v63 = vrot.slane %v5945_v21, 1  ;;  %v8284_v21 = vld [vmem:[%s9887_s26 + $0xd8] sm:$0xe]  ;;  %v5463_v28 = vsel %vm664_vm1, %v9622_v39, %v12142_v16 }
 0x247   : > { %6105 = vrot.lane.b32.xlu0 %v6087_v31, %s9769_s30  ;;  %8775 = vmatprep.subr.bf16.mxu0 %v9383_v19  ;;  %v2711_v31 = vsel %vm664_vm1, %v9621_v54, %v12117_v5  ;;  %v5994_v5 = vshll.u32 %v8309_v3, 16 }
 0x248   : > { %v12170_v62 = vpop.permute.xlu1 %2583  ;;  %8810 = vmatpush3.bf16.msra.mxu1 %v9383_v19 }
 0x249   : > { %v12178_v15 = vpop.permute.xlu0 %2581  ;;  %8804 = vmatprep.subr.bf16.mxu1 %v9384_v58 }
 0x24a   : > { %6123 = vrot.lane.b32.xlu1 %v6096_v26, %s9769_s30  ;;  %8776 = vmatpush3.bf16.msra.mxu0 %v9383_v19  ;;  %v5990_v19 = vor.u32 %v5989_v56, %v5985_v7  ;;  %v5983_v26 = vor.u32 %v5982_v18, %v5978_v55  ;;  %v6003_v56 = vrot.slane %v6001_v43, 1  ;;  %v5941_v55 = vor.u32 %v5940_v53, %v5936_v51 }
 0x24b   : > { %6121 = vrot.lane.b32.xlu0 %v6095_v8, %s9769_s30  ;;  %8777 = vmatprep.subr.bf16.mxu0 %v9384_v58  ;;  %v5992_v18 = vshrl.u32 %v8309_v3, 16 }
 0x24c   : > { %v2676_v23 = vpop.permute.xlu1 %2675  ;;  %8811 = vmatpush3.bf16.msra.mxu1 %v9384_v58  ;;  %v6004_v16 = vor.u32 %v6003_v56, %v5999_v37  ;;  %v8286_v56 = vld [vmem:[%s9887_s26 + $0xe8] sm:$0xe] }
 0x24d   : > { %v2756_v46 = vsel %vm713_vm2, %v2714_v9, %v2676_v23  ;;  %v2674_v57 = vpop.permute.xlu0 %2673  ;;  %8805 = vmatprep.subr.bf16.mxu1 %v9385_v13  ;;  %v8283_v23 = vld [vmem:[%s9887_s26 + $0xd0] sm:$0xe] }
 0x24e   : > { %v2754_v8 = vsel %vm713_vm2, %v2711_v31, %v2674_v57  ;;  %6015 = vrot.lane.b32.xlu1 %v5934_v14, %s9768_s27  ;;  %8778 = vmatpush3.bf16.msra.mxu0 %v9384_v58  ;;  %v5948_v58 = vor.u32 %v5947_v63, %v5943_v0  ;;  %v5996_v14 = vrot.slane %v5994_v5, 1  ;;  %v9624_v0 = vld [vmem:[%s9887_s26 + $0x88] sm:$0xf] }
 0x24f   : > { %v7744_v17 = vcombine.low %v2754_v8, %v2756_v46  ;;  %6013 = vrot.lane.b32.xlu0 %v5927_v38, %s9768_s27  ;;  %8779 = vmatprep.subr.bf16.mxu0 %v9385_v13  ;;  %v9387_v38 = vld [vmem:[%s12900_s1 + $0x1f0] sm:$0x3f]   ;;  %v8316_v46 = vcombine.low %v8284_v21, %v12071_v61  ;;  %v2720_v63 = vsel %vm664_vm1, %v9624_v0, %v12170_v62  ;;  %v9625_v61 = vld [vmem:[%s9887_s26 + $0x80] sm:$0xf] }
 0x250   : > { %v5333_v7 = vpop.permute.xlu1 %5332  ;;  %8812 = vmatpush3.bf16.msra.mxu1 %v9385_v13  ;;  %v6334_v8 = vsel %vm1332_vm0, %v9387_v38, 0  ;;  %v2717_v51 = vsel %vm664_vm1, %v9625_v61, %v12178_v15  ;;  %v8285_v21 = vld [vmem:[%s9887_s26 + $0xe0] sm:$0xe] }
 0x251   : > { %8639 = vmatprep.mubr.msk.bf16.mxu1 %vm1307_vm3, %v7744_v17  ;;  %v5331_v2 = vpop.permute.xlu0 %5330  ;;  %8806 = vmatprep.subr.bf16.mxu1 %v9386_v44  ;;  %v8291_v17 = vld [vmem:[%s9887_s26 + $0x120] sm:$0xe]  ;;  %v6090_v62 = vrot.slane %v8316_v46, 1 }
 0x252   : > { %6031 = vrot.lane.b32.xlu1 %v5990_v19, %s9768_s27  ;;  %8780 = vmatpush3.bf16.msra.mxu0 %v9385_v13  ;;  %v5460_v13 = vsel %vm664_vm1, %v9623_v33, %v12150_v35  ;;  %v5997_v35 = vor.u32 %v5996_v14, %v5992_v18  ;;  %v8315_v19 = vcombine.low %v8283_v23, %v12080_v1 }
 0x253   : > { %6029 = vrot.lane.b32.xlu0 %v5983_v26, %s9768_s27  ;;  %8781 = vmatprep.subr.bf16.mxu0 %v9386_v44  ;;  %v8292_v26 = vld [vmem:[%s9887_s26 + $0x128] sm:$0xe]  ;;  %v8323_v15 = vcombine.low %v8291_v17, %v12108_v42  ;;  %v8318_v23 = vcombine.low %v8286_v56, %v12137_v20 }
 0x254   : > { %v5425_v9 = vpop.permute.xlu1 %5424  ;;  %8813 = vmatpush3.bf16.msra.mxu1 %v9386_v44  ;;  %v6089_v37 = vrot.slane %v8315_v19, 1 }
 0x255   : > { %v5505_v3 = vsel %vm713_vm2, %v5463_v28, %v5425_v9  ;;  %v5423_v54 = vpop.permute.xlu0 %5422  ;;  %8952 = vmatprep.subr.msk.bf16.mxu1 %vm1332_vm0, %v9387_v38  ;;  %v6097_v33 = vrot.slane %v8323_v15, 1  ;;  %v9631_v15 = vld [vmem:[%s9887_s26 + $0xf8] sm:$0xf] }
 0x256   : > { %v5503_v31 = vsel %vm713_vm2, %v5460_v13, %v5423_v54  ;;  %6019 = vrot.lane.b32.xlu1 %v5948_v58, %s9768_s27  ;;  %8782 = vmatpush3.bf16.msra.mxu0 %v9386_v44  ;;  %v8324_v44 = vcombine.low %v8292_v26, %v12102_v45  ;;  %v8317_v13 = vcombine.low %v8285_v21, %v12148_v22  ;;  %v8293_v54 = vld [vmem:[%s9887_s26 + $0x130] sm:$0xe] }
 0x257   : > { %v8223_v57 = vcombine.low %v5503_v31, %v5505_v3  ;;  %6017 = vrot.lane.b32.xlu0 %v5941_v55, %s9768_s27  ;;  %8951 = vmatprep.subr.msk.bf16.mxu0 %vm1332_vm0, %v9387_v38  ;;  %v9626_v55 = vld [vmem:[%s9887_s26 + $0xe0] sm:$0xf]  ;;  %v9627_v38 = vld [vmem:[%s9887_s26 + $0xd8] sm:$0xf] }
 0x258   : > { %v2680_v43 = vpop.permute.xlu1 %2679  ;;  %8814 = vmatpush3.bf16.msra.mxu1 %v6334_v8  ;;  %v5469_v18 = vsel %vm664_vm1, %v9626_v55, %v5333_v7  ;;  %v5466_v39 = vsel %vm664_vm1, %v9627_v38, %v5331_v2  ;;  %v6098_v42 = vrot.slane %v8324_v44, 1  ;;  %v8294_v3 = vld [vmem:[%s9887_s26 + $0x138] sm:$0xe]  ;;  %v6091_v20 = vrot.slane %v8317_v13, 1  ;;  %v9630_v44 = vld [vmem:[%s9887_s26 + $0x100] sm:$0xf] }
 0x259   : > { %v2760_v1 = vsel %vm713_vm2, %v2720_v63, %v2680_v43  ;;  %8759 = vmatprep.mubr.msk.bf16.mxu0 %vm1307_vm3, %v8223_v57  ;;  %v2678_v53 = vpop.permute.xlu0 %2677  ;;  %v8326_v46 = vcombine.low %v8294_v3, %v12165_v40  ;;  %v8325_v57 = vcombine.low %v8293_v54, %v12176_v52  ;;  %v9628_v40 = vld [vmem:[%s9887_s26 + $0xa8] sm:$0xf]  ;;  %v9629_v43 = vld [vmem:[%s9887_s26 + $0xa0] sm:$0xf]  ;;  %v9632_v38 = vld [vmem:[%s9887_s26 + $0xb8] sm:$0xf] }
 0x25a   : > { %v2758_v5 = vsel %vm713_vm2, %v2717_v51, %v2678_v53  ;;  %6035 = vrot.lane.b32.xlu1 %v6004_v16, %s9768_s27  ;;  %8784 = vmatpush3.bf16.msra.mxu0 %v6334_v8  ;;  %v6092_v16 = vrot.slane %v8318_v23, 1  ;;  %v9634_v13 = vld [vmem:[%s9887_s26 + $0x110] sm:$0xf]  ;;  %v9635_v54 = vld [vmem:[%s9887_s26 + $0x108] sm:$0xf] }
 0x25b   : > { %v7745_v58 = vcombine.low %v2758_v5, %v2760_v1  ;;  %6033 = vrot.lane.b32.xlu0 %v5997_v35, %s9768_s27  ;;  %v6100_v19 = vrot.slane %v8326_v46, 1  ;;  %v6099_v26 = vrot.slane %v8325_v57, 1 }
 0x25c   : > { %v5429_v14 = vpop.permute.xlu1 %5428 }
 0x25d   : > { %v5509_v45 = vsel %vm713_vm2, %v5469_v18, %v5429_v14  ;;  %8640 = vmatmul.mubr.msk.bf16.gmra.mrb[4].mxu1 %vm1307_vm3, %v7745_v58  ;;  %v5427_v28 = vpop.permute.xlu0 %5426 }
 0x25e   : > { %v5507_v9 = vsel %vm713_vm2, %v5466_v39, %v5427_v28  ;;  %6111 = vrot.lane.b32.xlu1 %v6090_v62, %s9769_s30  ;;  %v9633_v28 = vld [vmem:[%s9887_s26 + $0xb0] sm:$0xf] }
 0x25f   : > { %v8224_v7 = vcombine.low %v5507_v9, %v5509_v45  ;;  %6109 = vrot.lane.b32.xlu0 %v6089_v37, %s9769_s30 }
 0x260   : > { %v2588_v2 = vpop.permute.xlu1 %2587 }
 0x261   : > { %8760 = vmatmul.mubr.msk.bf16.gmra.mrb[4].mxu0 %vm1307_vm3, %v8224_v7  ;;  %v2586_v31 = vpop.permute.xlu0 %2585  ;;  %v2726_v63 = vsel %vm664_vm1, %v9628_v40, %v2588_v2  ;;  %v9636_v40 = vld [vmem:[%s9887_s26 + $0xc8] sm:$0xf] }
 0x262   : > { %6127 = vrot.lane.b32.xlu1 %v6098_v42, %s9769_s30  ;;  %v2723_v17 = vsel %vm664_vm1, %v9629_v43, %v2586_v31  ;;  %v9637_v43 = vld [vmem:[%s9887_s26 + $0xc0] sm:$0xf] }
 0x263   : > { %6125 = vrot.lane.b32.xlu0 %v6097_v33, %s9769_s30 }
 0x264   : > { %v5337_v35 = vpop.permute.xlu1 %5336 }
 0x265   : > { %v5335_v22 = vpop.permute.xlu0 %5334  ;;  %v5475_v58 = vsel %vm664_vm1, %v9630_v44, %v5337_v35  ;;  %v9638_v44 = vld [vmem:[%s9887_s26 + $0x120] sm:$0xf] }
 0x266   : > { %6115 = vrot.lane.b32.xlu1 %v6092_v16, %s9769_s30  ;;  %v5472_v56 = vsel %vm664_vm1, %v9631_v15, %v5335_v22  ;;  %v9639_v15 = vld [vmem:[%s9887_s26 + $0x118] sm:$0xf]  ;;  %s12678_s26 = sand.u32 1, %s9742_s19  }
 0x267   : > { %6113 = vrot.lane.b32.xlu0 %v6091_v20, %s9769_s30  ;;  %s7345_s27 = sshll.u32 %s12678_s26, 7 }
 0x268   : > { %v2592_v8 = vpop.permute.xlu1 %2591  ;;  %s12752_s17 = scalar_lea.vmem [#allocation3], %s7345_s27 }
 0x269   : > { %v2590_v0 = vpop.permute.xlu0 %2589  ;;  %v2732_v39 = vsel %vm664_vm1, %v9632_v38, %v2592_v8  ;;  %s7151_s13 = sshll.u32 %s12752_s17, 4  ;;  %s12797_s13 = int_to_ptr.vmem [resolvable:$true] %s7151_s13 }
 0x26a   : > { %6131 = vrot.lane.b32.xlu1 %v6100_v19, %s9769_s30  ;;  %v2729_v9 = vsel %vm664_vm1, %v9633_v28, %v2590_v0  ;;  %p9647_p4 = scmp.lt.s32.totalorder %s12797_s13, %s9645_s9 }
 0x26b   : > { %6129 = vrot.lane.b32.xlu0 %v6099_v26, %s9769_s30  ;;  %s9770_s30 = smov 32  }
 0x26c   : > { %v2684_v52 = vpop.permute.xlu1 %2683 }
 0x26d   : > { %v2764_v61 = vsel %vm713_vm2, %v2726_v63, %v2684_v52  ;;  %v2682_v51 = vpop.permute.xlu0 %2681 }
 0x26e   : > { %v2762_v1 = vsel %vm713_vm2, %v2723_v17, %v2682_v51 }
 0x26f   : > { %v7746_v53 = vcombine.low %v2762_v1, %v2764_v61 }
 0x270   : > { %v5341_v5 = vpop.permute.xlu1 %5340 }
 0x271   : > { %8643 = vmatprep.mubr.msk.bf16.mxu1 %vm1307_vm3, %v7746_v53  ;;  %v5339_v62 = vpop.permute.xlu0 %5338  ;;  %v5481_v3 = vsel %vm664_vm1, %v9634_v13, %v5341_v5 }
 0x272   : > { %v5478_v31 = vsel %vm664_vm1, %v9635_v54, %v5339_v62 }
 0x274   : > { %v5433_v37 = vpop.permute.xlu1 %5432 }
 0x275   : > { %v5513_v55 = vsel %vm713_vm2, %v5475_v58, %v5433_v37  ;;  %v5431_v18 = vpop.permute.xlu0 %5430 }
 0x276   : > { %v5511_v14 = vsel %vm713_vm2, %v5472_v56, %v5431_v18 }
 0x277   : > { %v8225_v21 = vcombine.low %v5511_v14, %v5513_v55 }
 0x278   : > { %v2688_v45 = vpop.permute.xlu1 %2687 }
 0x279   : > { %v2768_v42 = vsel %vm713_vm2, %v2732_v39, %v2688_v45  ;;  %8763 = vmatprep.mubr.msk.bf16.mxu0 %vm1307_vm3, %v8225_v21  ;;  %v2686_v23 = vpop.permute.xlu0 %2685 }
 0x27a   : > { %v2766_v7 = vsel %vm713_vm2, %v2729_v9, %v2686_v23 }
 0x27b   : > { %v7747_v33 = vcombine.low %v2766_v7, %v2768_v42 }
 0x27c   : > { %v5437_v2 = vpop.permute.xlu1 %5436 }
 0x27d   : > { %v5517_v16 = vsel %vm713_vm2, %v5481_v3, %v5437_v2  ;;  %8644 = vmatmul.mubr.msk.bf16.gmra.mrb[8].mxu1 %vm1307_vm3, %v7747_v33  ;;  %v5435_v46 = vpop.permute.xlu0 %5434 }
 0x27e   : > { %v5515_v20 = vsel %vm713_vm2, %v5478_v31, %v5435_v46 }
 0x27f   : > { %v8226_v57 = vcombine.low %v5515_v20, %v5517_v16 }
 0x280   : > { %v2596_v35 = vpop.permute.xlu1 %2595 }
 0x281   : > { %8764 = vmatmul.mubr.msk.bf16.gmra.mrb[8].mxu0 %vm1307_vm3, %v8226_v57  ;;  %v2594_v22 = vpop.permute.xlu0 %2593  ;;  %v2738_v63 = vsel %vm664_vm1, %v9636_v40, %v2596_v35 }
 0x282   : > { %v2735_v17 = vsel %vm664_vm1, %v9637_v43, %v2594_v22 }
 0x284   : > { %v5345_v19 = vpop.permute.xlu1 %5344 }
 0x285   : > { %v5343_v26 = vpop.permute.xlu0 %5342  ;;  %v5487_v58 = vsel %vm664_vm1, %v9638_v44, %v5345_v19 }
 0x286   : > { %v5484_v56 = vsel %vm664_vm1, %v9639_v15, %v5343_v26 }
 0x288   : > { %v2600_v8 = vpop.permute.xlu1 %2599 }
 0x289   : > { %v2598_v0 = vpop.permute.xlu0 %2597  ;;  %v2744_v38 = vsel %vm664_vm1, %v11839_v59, %v2600_v8 }
 0x28a   : > { %v2741_v45 = vsel %vm664_vm1, %v11847_v24, %v2598_v0 }
 0x28c   : > { %v2692_v52 = vpop.permute.xlu1 %2691 }
 0x28d   : > { %v2772_v61 = vsel %vm713_vm2, %v2738_v63, %v2692_v52  ;;  %v2690_v51 = vpop.permute.xlu0 %2689 }
 0x28e   : > { %v2770_v1 = vsel %vm713_vm2, %v2735_v17, %v2690_v51 }
 0x28f   : > { %v7748_v53 = vcombine.low %v2770_v1, %v2772_v61 }
 0x290   : > { %v5349_v5 = vpop.permute.xlu1 %5348 }
 0x291   : > { %8647 = vmatprep.mubr.msk.bf16.mxu1 %vm1307_vm3, %v7748_v53  ;;  %v5347_v62 = vpop.permute.xlu0 %5346  ;;  %v5493_v7 = vsel %vm664_vm1, %v11867_v48, %v5349_v5 }
 0x292   : > { %v5490_v13 = vsel %vm664_vm1, %v11875_v25, %v5347_v62 }
 0x294   : > { %v5441_v37 = vpop.permute.xlu1 %5440 }
 0x295   : > { %v5521_v55 = vsel %vm713_vm2, %v5487_v58, %v5441_v37  ;;  %v5439_v18 = vpop.permute.xlu0 %5438 }
 0x296   : > { %v5519_v14 = vsel %vm713_vm2, %v5484_v56, %v5439_v18 }
 0x297   : > { %v8227_v21 = vcombine.low %v5519_v14, %v5521_v55 }
 0x298   : > { %v2696_v39 = vpop.permute.xlu1 %2695 }
 0x299   : > { %v2776_v28 = vsel %vm713_vm2, %v2744_v38, %v2696_v39  ;;  %8767 = vmatprep.mubr.msk.bf16.mxu0 %vm1307_vm3, %v8227_v21  ;;  %v2694_v9 = vpop.permute.xlu0 %2693 }
 0x29a   : > { %v2774_v42 = vsel %vm713_vm2, %v2741_v45, %v2694_v9 }
 0x29b   : > { %v7749_v23 = vcombine.low %v2774_v42, %v2776_v28 }
 0x29c   : > { %v5445_v33 = vpop.permute.xlu1 %5444 }
 0x29d   : > { %v5525_v59 = vsel %vm713_vm2, %v5493_v7, %v5445_v33  ;;  %8648 = vmatmul.mubr.msk.bf16.gmra.mrb[12].mxu1 %vm1307_vm3, %v7749_v23  ;;  %v5443_v24 = vpop.permute.xlu0 %5442 }
 0x29e   : > { %v5523_v3 = vsel %vm713_vm2, %v5490_v13, %v5443_v24 }
 0x29f   : > { %v8228_v2 = vcombine.low %v5523_v3, %v5525_v59 }
 0x2a0   : > { %v6008_v54 = vpop.permute.xlu1 %6007 }
 0x2a1   : > { %8768 = vmatmul.mubr.msk.bf16.gmra.mrb[12].mxu0 %vm1307_vm3, %v8228_v2  ;;  %v6006_v31 = vpop.permute.xlu0 %6005  ;;  %v6138_v25 = vsel %vm664_vm1, %v11922_v41, %v6008_v54 }
 0x2a2   : > { %v6135_v19 = vsel %vm664_vm1, %v11930_v32, %v6006_v31 }
 0x2a4   : > { %v6024_v16 = vpop.permute.xlu1 %6023 }
 0x2a5   : > { %v6022_v46 = vpop.permute.xlu0 %6021  ;;  %v6162_v63 = vsel %vm664_vm1, %v11951_v49, %v6024_v16 }
 0x2a6   : > { %v6159_v43 = vsel %vm664_vm1, %v11965_v60, %v6022_v46 }
 0x2a8   : > { %v6012_v20 = vpop.permute.xlu1 %6011 }
 0x2a9   : > { %v6010_v48 = vpop.permute.xlu0 %6009  ;;  %v6144_v51 = vsel %vm664_vm1, %v11982_v50, %v6012_v20 }
 0x2aa   : > { %v6141_v53 = vsel %vm664_vm1, %v11990_v27, %v6010_v48 }
 0x2ac   : > { %v6028_v57 = vpop.permute.xlu1 %6027 }
 0x2ad   : > { %v6026_v35 = vpop.permute.xlu0 %6025  ;;  %v6168_v44 = vsel %vm664_vm1, %v12004_v4, %v6028_v57 }
 0x2ae   : > { %v6165_v37 = vsel %vm664_vm1, %v12012_v30, %v6026_v35 }
 0x2b0   : > { %v6104_v22 = vpop.permute.xlu1 %6103 }
 0x2b1   : > { %v6184_v26 = vsel %vm713_vm2, %v6138_v25, %v6104_v22  ;;  %v6102_v8 = vpop.permute.xlu0 %6101 }
 0x2b2   : > { %v6182_v0 = vsel %vm713_vm2, %v6135_v19, %v6102_v8 }
 0x2b3   : > { %v8341_v40 = vcombine.low %v6182_v0, %v6184_v26 }
 0x2b4   : > { %v6120_v52 = vpop.permute.xlu1 %6119 }
 0x2b5   : > { %v6200_v17 = vsel %vm713_vm2, %v6162_v63, %v6120_v52  ;;  %8785 = vmatprep.mubr.msk.bf16.mxu0 %vm1307_vm3, %v8341_v40  ;;  %v6118_v41 = vpop.permute.xlu0 %6117 }
 0x2b6   : > { %v6198_v32 = vsel %vm713_vm2, %v6159_v43, %v6118_v41 }
 0x2b7   : > { %v8345_v61 = vcombine.low %v6198_v32, %v6200_v17 }
 0x2b8   : > { %v6108_v1 = vpop.permute.xlu1 %6107 }
 0x2b9   : > { %v6188_v49 = vsel %vm713_vm2, %v6144_v51, %v6108_v1  ;;  %8793 = vmatprep.mubr.msk.bf16.mxu1 %vm1307_vm3, %v8345_v61  ;;  %v6106_v60 = vpop.permute.xlu0 %6105 }
 0x2ba   : > { %v6186_v5 = vsel %vm713_vm2, %v6141_v53, %v6106_v60 }
 0x2bb   : > { %v8342_v62 = vcombine.low %v6186_v5, %v6188_v49 }
 0x2bc   : > { %v6124_v58 = vpop.permute.xlu1 %6123 }
 0x2bd   : > { %v6204_v50 = vsel %vm713_vm2, %v6168_v44, %v6124_v58  ;;  %8786 = vmatmul.mubr.msk.bf16.vlgmr.msra.gmra.mrb[0].mxu0 %vm1307_vm3, %v8342_v62  ;;  %v6122_v27 = vpop.permute.xlu0 %6121 }
 0x2be   : > { %v6202_v15 = vsel %vm713_vm2, %v6165_v37, %v6122_v27 }
 0x2bf   : > { %v8346_v56 = vcombine.low %v6202_v15, %v6204_v50 }
 0x2c0   : > { %v6016_v55 = vpop.permute.xlu1 %6015 }
 0x2c1   : > { %8794 = vmatmul.mubr.msk.bf16.vlgmr.msra.gmra.mrb[16].mxu1 %vm1307_vm3, %v8346_v56  ;;  %v6014_v18 = vpop.permute.xlu0 %6013  ;;  %v6150_v30 = vsel %vm664_vm1, %v12068_v34, %v6016_v55 }
 0x2c2   : > { %v6147_v9 = vsel %vm664_vm1, %v12077_v6, %v6014_v18 }
 0x2c4   : > { %v6032_v14 = vpop.permute.xlu1 %6031 }
 0x2c5   : > { %v6030_v21 = vpop.permute.xlu0 %6029  ;;  %v6174_v13 = vsel %vm664_vm1, %v12089_v47, %v6032_v14 }
 0x2c6   : > { %v6171_v24 = vsel %vm664_vm1, %v12105_v11, %v6030_v21 }
 0x2c8   : > { %v6020_v38 = vpop.permute.xlu1 %6019 }
 0x2c9   : > { %v6018_v4 = vpop.permute.xlu0 %6017  ;;  %v6156_v54 = vsel %vm664_vm1, %v12134_v29, %v6020_v38 }
 0x2ca   : > { %v6153_v16 = vsel %vm664_vm1, %v12145_v12, %v6018_v4 }
 0x2cc   : > { %v6036_v39 = vpop.permute.xlu1 %6035 }
 0x2cd   : > { %v6034_v45 = vpop.permute.xlu0 %6033  ;;  %v6180_v48 = vsel %vm664_vm1, %v12162_v10, %v6036_v39  ;;  %v12389_v39 = vld [vmem:[%s12901_s2] ss:$0 sm:$0xff] }
 0x2ce   : > { %v6177_v35 = vsel %vm664_vm1, %v12173_v36, %v6034_v45 }
 0x2d0   : > { %v6112_v28 = vpop.permute.xlu1 %6111 }
 0x2d1   : > { %v6192_v42 = vsel %vm713_vm2, %v6150_v30, %v6112_v28  ;;  %v6110_v23 = vpop.permute.xlu0 %6109 }
 0x2d2   : > { %v6190_v7 = vsel %vm713_vm2, %v6147_v9, %v6110_v23 }
 0x2d3   : > { %v8343_v33 = vcombine.low %v6190_v7, %v6192_v42 }
 0x2d4   : > { %v6128_v59 = vpop.permute.xlu1 %6127 }
 0x2d5   : > { %v6208_v3 = vsel %vm713_vm2, %v6174_v13, %v6128_v59  ;;  %8789 = vmatprep.mubr.msk.bf16.mxu0 %vm1307_vm3, %v8343_v33  ;;  %v6126_v34 = vpop.permute.xlu0 %6125 }
 0x2d6   : > { %v6206_v6 = vsel %vm713_vm2, %v6171_v24, %v6126_v34 }
 0x2d7   : > { %v8347_v2 = vcombine.low %v6206_v6, %v6208_v3 }
 0x2d8   : > { %v6116_v31 = vpop.permute.xlu1 %6115 }
 0x2d9   : > { %v6196_v47 = vsel %vm713_vm2, %v6156_v54, %v6116_v31  ;;  %8797 = vmatprep.mubr.msk.bf16.mxu1 %vm1307_vm3, %v8347_v2  ;;  %v6114_v11 = vpop.permute.xlu0 %6113 }
 0x2da   : > { %v6194_v46 = vsel %vm713_vm2, %v6153_v16, %v6114_v11 }
 0x2db   : > { %v8344_v20 = vcombine.low %v6194_v46, %v6196_v47 }
 0x2dc   : > { %v6132_v57 = vpop.permute.xlu1 %6131 }
 0x2dd   : > { %v6212_v29 = vsel %vm713_vm2, %v6180_v48, %v6132_v57  ;;  %8790 = vmatmul.mubr.msk.bf16.gmra.mrb[4].mxu0 %vm1307_vm3, %v8344_v20  ;;  %v6130_v12 = vpop.permute.xlu0 %6129 }
 0x2de   : > { %v6210_v25 = vsel %vm713_vm2, %v6177_v35, %v6130_v12 }
 0x2df   : > { %v8348_v22 = vcombine.low %v6210_v25, %v6212_v29 }
 0x2e1   : > { %8798 = vmatmul.mubr.msk.bf16.gmra.mrb[20].mxu1 %vm1307_vm3, %v8348_v22 }
 0x310   : > { %v8637_v19 = vpop.f32.mrb[0].mxu1 }
 0x311   : > { %v2934_v26 = vpop.f32.mrb[1].mxu1 }
 0x312   : > { %v8638_v8 = vpop.f32.mrb[2].mxu1 }
 0x313   : > { %v2937_v0 = vpop.f32.mrb[3].mxu1 }
 0x330   : > { %v12378_v40 = vpop.f32.mrb[4].mxu1 }
 0x331   : > { %v12380_v10 = vpop.f32.mrb[5].mxu1 }
 0x332   : > { %v12382_v63 = vpop.f32.mrb[6].mxu1 }
 0x333   : > { %v12384_v36 = vpop.f32.mrb[7].mxu1 }
 0x350   : > { %v8645_v52 = vpop.f32.mrb[8].mxu1 }
 0x351   : > { %v2966_v43 = vpop.f32.mrb[9].mxu1 }
 0x352   : > { %v8646_v17 = vpop.f32.mrb[10].mxu1 }
 0x353   : > { %v2969_v41 = vpop.f32.mrb[11].mxu1 }
 0x354   : > { %v8765_v32 = vpop.f32.mrb[8].mxu0 }
 0x355   : > { %v8823_v61 = vadd.f32 %v8765_v32, %v8645_v52  ;;  %v5715_v51 = vpop.f32.mrb[9].mxu0 }
 0x356   : > { %v8825_v1 = vadd.f32 %v5715_v51, %v2966_v43  ;;  %v8766_v53 = vpop.f32.mrb[10].mxu0 }
 0x357   : > { %v8827_v49 = vadd.f32 %v8766_v53, %v8646_v17  ;;  %v5718_v60 = vpop.f32.mrb[11].mxu0 }
 0x358   : > { %v8829_v5 = vadd.f32 %v5718_v60, %v2969_v41 }
 0x370   : > { %v8649_v62 = vpop.f32.mrb[12].mxu1 }
 0x371   : > { %v2982_v44 = vpop.f32.mrb[13].mxu1 }
 0x372   : > { %v8650_v58 = vpop.f32.mrb[14].mxu1 }
 0x373   : > { %v2985_v37 = vpop.f32.mrb[15].mxu1 }
 0x374   : > { %v8769_v50 = vpop.f32.mrb[12].mxu0 }
 0x375   : > { %v8831_v27 = vadd.f32 %v8769_v50, %v8649_v62  ;;  %v5731_v15 = vpop.f32.mrb[13].mxu0 }
 0x376   : > { %v8833_v56 = vadd.f32 %v5731_v15, %v2982_v44  ;;  %v8770_v55 = vpop.f32.mrb[14].mxu0 }
 0x377   : > { %v8835_v18 = vadd.f32 %v8770_v55, %v8650_v58  ;;  %v5734_v14 = vpop.f32.mrb[15].mxu0 }
 0x378   : > { %v8837_v21 = vadd.f32 %v5734_v14, %v2985_v37 }
 0x390   : > { %v8787_v38 = vpop.f32.mrb[0].mxu0 }
 0x391   : > { %v8815_v4 = vadd.f32 %v8787_v38, %v8637_v19  ;;  %v6370_v45 = vpop.f32.mrb[1].mxu0  ;;  %v6616_v38 = vld [vmem:[%s12477_s14] sm:$0xff] }
 0x392   : > { %v8816_v30 = vadd.f32 %v6370_v45, %v2934_v26  ;;  %v8788_v28 = vpop.f32.mrb[2].mxu0  ;;  %v6617_v45 = vld [vmem:[%s12477_s14 + $0x8] sm:$0xff] }
 0x393   : > { %v8817_v9 = vadd.f32 %v8788_v28, %v8638_v8  ;;  %v6373_v42 = vpop.f32.mrb[3].mxu0  ;;  %v12395_v24 = vadd.f32 %v8815_v4, %v12389_v39  ;;  %v6619_v28 = vld [vmem:[%s12477_s14 + $0x18] sm:$0xff] }
 0x394   : > { %v12392_v23 = vadd.f32 %v8816_v30, %v12389_v39  ;;  %v8818_v7 = vadd.f32 %v6373_v42, %v2937_v0  ;;  %v8795_v33 = vpop.f32.mrb[16].mxu1  ;;  %v6620_v30 = vld [vmem:[%s12477_s14 + $0x20] sm:$0xff]  ;;  %v6621_v42 = vld [vmem:[%s12477_s14 + $0x28] sm:$0xff] }
 0x395   : > { %v8824_v13 = vadd.f32 %v8823_v61, %v8795_v33  ;;  %v6402_v59 = vpop.f32.mrb[17].mxu1  ;;  %v12403_v16 = vadd.f32 %v8817_v9, %v12389_v39  ;;  %v6622_v9 = vld [vmem:[%s12477_s14 + $0x30] sm:$0xff]  ;;  %v6623_v33 = vld [vmem:[%s12477_s14 + $0x38] sm:$0xff] }
 0x396   : > { %9388 = vtanh.f32 %v12392_v23  ;;  %v8826_v3 = vadd.f32 %v8825_v1, %v6402_v59  ;;  %v8796_v34 = vpop.f32.mrb[18].mxu1  ;;  %v12399_v54 = vadd.f32 %v8818_v7, %v12389_v39  ;;  %v6624_v7 = vld [vmem:[%s12477_s14 + $0x40] sm:$0xff]  ;;  %v6625_v59 = vld [vmem:[%s12477_s14 + $0x48] sm:$0xff] }
 0x397   : > { %v8828_v6 = vadd.f32 %v8827_v49, %v8796_v34  ;;  %v6405_v2 = vpop.f32.mrb[19].mxu1  ;;  %9390 = vtanh.f32 %v12395_v24  ;;  %v12434_v51 = vadd.f32 %v8824_v13, %v12389_v39  ;;  %v6626_v13 = vld [vmem:[%s12477_s14 + $0x50] sm:$0xff]  ;;  %v6627_v34 = vld [vmem:[%s12477_s14 + $0x58] sm:$0xff] }
 0x398   : > { %v8830_v31 = vadd.f32 %v8829_v5, %v6405_v2  ;;  %9392 = vtanh.f32 %v12399_v54  ;;  %v12426_v61 = vadd.f32 %v8826_v3, %v12389_v39  ;;  %v6628_v3 = vld [vmem:[%s12477_s14 + $0x60] sm:$0xff]  ;;  %v8365_v2 = vmul.f32 -1.442695, %v12392_v23 }
 0x399   : > { %9394 = vtanh.f32 %v12403_v16  ;;  %v12448_v5 = vadd.f32 %v8828_v6, %v12389_v39  ;;  %v6630_v6 = vld [vmem:[%s12477_s14 + $0x70] sm:$0xff] }
 0x39a   : > { %v12439_v53 = vadd.f32 %v8830_v31, %v12389_v39  ;;  %v6629_v31 = vld [vmem:[%s12477_s14 + $0x68] sm:$0xff] }
 0x3a0   : > { %v9389_v47 = vpop.eup %9388 }
 0x3a1   : > { %6728 = vrot.lane.b32.xlu0 %v9389_v47, %s9770_s30  ;;  %v9391_v11 = vpop.eup %9390  ;;  %v8367_v47 = vmul.f32 -1.442695, %v12395_v24 }
 0x3a2   : > { %v9393_v46 = vpop.eup %9392 }
 0x3a3   : > { %6730 = vrot.lane.b32.xlu1 %v9393_v46, %s9770_s30  ;;  %v9395_v20 = vpop.eup %9394  ;;  %v8366_v46 = vmul.f32 -1.442695, %v12399_v54 }
 0x3a5   : > { %6732 = vrot.lane.b32.xlu0 %v9391_v11, %s9770_s30  ;;  %v6631_v11 = vld [vmem:[%s12477_s14 + $0x78] sm:$0xff] }
 0x3a7   : > { %6734 = vrot.lane.b32.xlu1 %v9395_v20, %s9770_s30  ;;  %v8368_v20 = vmul.f32 -1.442695, %v12403_v16 }
 0x3b0   : > { %v8791_v48 = vpop.f32.mrb[4].mxu0 }
 0x3b1   : > { %v8819_v57 = vadd.f32 %v8791_v48, %v12378_v40  ;;  %v6386_v35 = vpop.f32.mrb[5].mxu0 }
 0x3b2   : > { %v8820_v29 = vadd.f32 %v6386_v35, %v12380_v10  ;;  %v8792_v12 = vpop.f32.mrb[6].mxu0 }
 0x3b3   : > { %v8821_v25 = vadd.f32 %v8792_v12, %v12382_v63  ;;  %v6389_v22 = vpop.f32.mrb[7].mxu0  ;;  %v12419_v43 = vadd.f32 %v8819_v57, %v12389_v39 }
 0x3b4   : > { %v12415_v19 = vadd.f32 %v8820_v29, %v12389_v39  ;;  %v8822_v26 = vadd.f32 %v6389_v22, %v12384_v36  ;;  %v8799_v8 = vpop.f32.mrb[20].mxu1 }
 0x3b5   : > { %v8832_v0 = vadd.f32 %v8831_v27, %v8799_v8  ;;  %v6418_v52 = vpop.f32.mrb[21].mxu1  ;;  %v12430_v36 = vadd.f32 %v8821_v25, %v12389_v39 }
 0x3b6   : > { %9396 = vtanh.f32 %v12415_v19  ;;  %v8834_v40 = vadd.f32 %v8833_v56, %v6418_v52  ;;  %v8800_v10 = vpop.f32.mrb[22].mxu1  ;;  %v12423_v63 = vadd.f32 %v8822_v26, %v12389_v39  ;;  %v8369_v26 = vmul.f32 -1.442695, %v12415_v19 }
 0x3b7   : > { %v8836_v17 = vadd.f32 %v8835_v18, %v8800_v10  ;;  %v6421_v41 = vpop.f32.mrb[23].mxu1  ;;  %9398 = vtanh.f32 %v12419_v43  ;;  %v12453_v44 = vadd.f32 %v8832_v0, %v12389_v39  ;;  %v8371_v52 = vmul.f32 -1.442695, %v12419_v43 }
 0x3b8   : > { %v8838_v32 = vadd.f32 %v8837_v21, %v6421_v41  ;;  %9400 = vtanh.f32 %v12423_v63  ;;  %v12445_v49 = vadd.f32 %v8834_v40, %v12389_v39  ;;  %v8370_v41 = vmul.f32 -1.442695, %v12423_v63 }
 0x3b9   : > { %9402 = vtanh.f32 %v12426_v61  ;;  %v12466_v15 = vadd.f32 %v8836_v17, %v12389_v39  ;;  %v8373_v19 = vmul.f32 -1.442695, %v12426_v61 }
 0x3ba   : > { %9404 = vtanh.f32 %v12430_v36  ;;  %v12459_v37 = vadd.f32 %v8838_v32, %v12389_v39  ;;  %v6618_v39 = vld [vmem:[%s12477_s14 + $0x10] sm:$0xff]  ;;  %v8377_v61 = vmul.f32 -1.442695, %v12445_v49  ;;  %s12795_s14 = scalar_lea.hbm %s12903_s4, %s12905_s21 }
 0x3bb   : > { %9406 = vtanh.f32 %v12434_v51 }
 0x3bc   : > { %9408 = vtanh.f32 %v12439_v53 }
 0x3bd   : > { %9410 = vtanh.f32 %v12445_v49 }
 0x3be   : > { %9412 = vtanh.f32 %v12448_v5 }
 0x3bf   : > { %9414 = vtanh.f32 %v12453_v44 }
 0x3c0   : > { %v9397_v1 = vpop.eup %9396  ;;  %9416 = vtanh.f32 %v12459_v37 }
 0x3c1   : > { %6736 = vrot.lane.b32.xlu0 %v9397_v1, %s9770_s30  ;;  %v9399_v60 = vpop.eup %9398  ;;  %9418 = vtanh.f32 %v12466_v15 }
 0x3c2   : > { %v9401_v62 = vpop.eup %9400  ;;  %9420 = vpow2.f32 %v8365_v2 }
 0x3c3   : > { %6738 = vrot.lane.b32.xlu1 %v9401_v62, %s9770_s30  ;;  %v9403_v58 = vpop.eup %9402  ;;  %9422 = vpow2.f32 %v8367_v47 }
 0x3c4   : > { %v9405_v50 = vpop.eup %9404  ;;  %9424 = vpow2.f32 %v8366_v46 }
 0x3c5   : > { %6740 = vrot.lane.b32.xlu0 %v9399_v60, %s9770_s30  ;;  %v9407_v27 = vpop.eup %9406  ;;  %9426 = vpow2.f32 %v8368_v20  ;;  %v8372_v60 = vmul.f32 -1.442695, %v12430_v36 }
 0x3c6   : > { %v9409_v56 = vpop.eup %9408 }
 0x3c7   : > { %6742 = vrot.lane.b32.xlu1 %v9405_v50, %s9770_s30  ;;  %v9411_v55 = vpop.eup %9410  ;;  %v8374_v50 = vmul.f32 -1.442695, %v12439_v53 }
 0x3c8   : > { %v9413_v18 = vpop.eup %9412 }
 0x3c9   : > { %6744 = vrot.lane.b32.xlu0 %v9403_v58, %s9770_s30  ;;  %v9415_v14 = vpop.eup %9414  ;;  %v8375_v58 = vmul.f32 -1.442695, %v12434_v51 }
 0x3ca   : > { %v9417_v21 = vpop.eup %9416 }
 0x3cb   : > { %6746 = vrot.lane.b32.xlu1 %v9409_v56, %s9770_s30  ;;  %v9419_v4 = vpop.eup %9418 }
 0x3cc   : > { %v9421_v48 = vpop.eup %9420 }
 0x3cd   : > { %6748 = vrot.lane.b32.xlu0 %v9407_v27, %s9770_s30  ;;  %v6552_v23 = vadd.f32 1.0, %v9421_v48  ;;  %v9423_v57 = vpop.eup %9422 }
 0x3ce   : > { %v9425_v35 = vpop.eup %9424  ;;  %v6554_v29 = vadd.f32 1.0, %v9423_v57 }
 0x3cf   : > { %6750 = vrot.lane.b32.xlu1 %v9413_v18, %s9770_s30  ;;  %9428 = vrcp.f32 %v6552_v23  ;;  %v6553_v12 = vadd.f32 1.0, %v9425_v35  ;;  %v9427_v25 = vpop.eup %9426  ;;  %v8379_v18 = vmul.f32 -1.442695, %v12453_v44 }
 0x3d0   : > { %9430 = vrcp.f32 %v6554_v29  ;;  %v6555_v24 = vadd.f32 1.0, %v9427_v25 }
 0x3d1   : > { %6752 = vrot.lane.b32.xlu0 %v9411_v55, %s9770_s30  ;;  %9432 = vrcp.f32 %v6553_v12  ;;  %v8376_v55 = vmul.f32 -1.442695, %v12448_v5 }
 0x3d2   : > { %9434 = vrcp.f32 %v6555_v24 }
 0x3d3   : > { %6754 = vrot.lane.b32.xlu1 %v9417_v21, %s9770_s30  ;;  %9436 = vpow2.f32 %v8369_v26  ;;  %v8378_v21 = vmul.f32 -1.442695, %v12459_v37 }
 0x3d4   : > { %9438 = vpow2.f32 %v8371_v52 }
 0x3d5   : > { %6756 = vrot.lane.b32.xlu0 %v9415_v14, %s9770_s30  ;;  %9440 = vpow2.f32 %v8370_v41 }
 0x3d6   : > { %9442 = vpow2.f32 %v8373_v19 }
 0x3d7   : > { %6758 = vrot.lane.b32.xlu1 %v9419_v4, %s9770_s30  ;;  %9444 = vpow2.f32 %v8372_v60 }
 0x3d8   : > { %9446 = vpow2.f32 %v8375_v58 }
 0x3d9   : > { %6648 = vrot.lane.b32.xlu0 %v6616_v38, %s9770_s30  ;;  %v12518_v22 = vpop.eup %9428  ;;  %9448 = vpow2.f32 %v8374_v50 }
 0x3da   : > { %v12523_v8 = vpop.eup %9430  ;;  %9450 = vpow2.f32 %v8377_v61 }
 0x3db   : > { %6650 = vrot.lane.b32.xlu1 %v6617_v45, %s9770_s30  ;;  %v12527_v10 = vpop.eup %9432 }
 0x3dc   : > { %v12534_v1 = vpop.eup %9434 }
 0x3dd   : > { %6652 = vrot.lane.b32.xlu0 %v6618_v39, %s9770_s30  ;;  %v9437_v63 = vpop.eup %9436  ;;  %v8380_v39 = vmul.f32 -1.442695, %v12466_v15 }
 0x3de   : > { %v6556_v27 = vadd.f32 1.0, %v9437_v63  ;;  %v9439_v56 = vpop.eup %9438 }
 0x3df   : > { %6654 = vrot.lane.b32.xlu1 %v6619_v28, %s9770_s30  ;;  %v9441_v36 = vpop.eup %9440  ;;  %v6558_v51 = vadd.f32 1.0, %v9439_v56 }
 0x3e0   : > { %9452 = vrcp.f32 %v6556_v27  ;;  %v9443_v14 = vpop.eup %9442  ;;  %v6557_v53 = vadd.f32 1.0, %v9441_v36 }
 0x3e1   : > { %6656 = vrot.lane.b32.xlu0 %v6620_v30, %s9770_s30  ;;  %9454 = vpow2.f32 %v8376_v55  ;;  %v9445_v38 = vpop.eup %9444  ;;  %v6560_v4 = vadd.f32 1.0, %v9443_v14 }
 0x3e2   : > { %9456 = vpow2.f32 %v8379_v18  ;;  %v9447_v49 = vpop.eup %9446  ;;  %v6559_v5 = vadd.f32 1.0, %v9445_v38 }
 0x3e3   : > { %6658 = vrot.lane.b32.xlu1 %v6621_v42, %s9770_s30  ;;  %9458 = vrcp.f32 %v6558_v51  ;;  %v9449_v45 = vpop.eup %9448  ;;  %v6562_v44 = vadd.f32 1.0, %v9447_v49 }
 0x3e4   : > { %9460 = vpow2.f32 %v8378_v21  ;;  %v9451_v30 = vpop.eup %9450 }
 0x3e5   : > { %6660 = vrot.lane.b32.xlu0 %v6622_v9, %s9770_s30  ;;  %9462 = vrcp.f32 %v6557_v53  ;;  %v6561_v9 = vadd.f32 1.0, %v9449_v45 }
 0x3e6   : > { %9464 = vrcp.f32 %v6560_v4 }
 0x3e7   : > { %6662 = vrot.lane.b32.xlu1 %v6623_v33, %s9770_s30  ;;  %9466 = vpow2.f32 %v8380_v39  ;;  %v6564_v33 = vadd.f32 1.0, %v9451_v30 }
 0x3e8   : > { %9468 = vrcp.f32 %v6559_v5 }
 0x3e9   : > { %6664 = vrot.lane.b32.xlu0 %v6624_v7, %s9770_s30  ;;  %9470 = vrcp.f32 %v6562_v44 }
 0x3ea   : > { %v12546_v28 = vpop.eup %9452  ;;  %9472 = vrcp.f32 %v6561_v9 }
 0x3eb   : > { %6666 = vrot.lane.b32.xlu1 %v6625_v59, %s9770_s30  ;;  %v9455_v42 = vpop.eup %9454  ;;  %9474 = vrcp.f32 %v6564_v33 }
 0x3ec   : > { %v6563_v59 = vadd.f32 1.0, %v9455_v42 }
 0x3ed   : > { %6668 = vrot.lane.b32.xlu0 %v6626_v13, %s9770_s30  ;;  %v9457_v13 = vpop.eup %9456 }
 0x3ee   : > { %v12550_v15 = vpop.eup %9458  ;;  %9476 = vrcp.f32 %v6563_v59 }
 0x3ef   : > { %6670 = vrot.lane.b32.xlu1 %v6627_v34, %s9770_s30  ;;  %v9461_v34 = vpop.eup %9460 }
 0x3f0   : > { %v12553_v2 = vpop.eup %9462  ;;  %v6565_v20 = vadd.f32 1.0, %v9461_v34 }
 0x3f1   : > { %6672 = vrot.lane.b32.xlu0 %v6628_v3, %s9770_s30  ;;  %v12557_v46 = vpop.eup %9464 }
 0x3f2   : > { %v9467_v23 = vpop.eup %9466 }
 0x3f3   : > { %6674 = vrot.lane.b32.xlu1 %v6629_v31, %s9770_s30  ;;  %v6566_v31 = vadd.f32 1.0, %v9457_v13  ;;  %v12561_v35 = vpop.eup %9468  ;;  %v6567_v24 = vadd.f32 1.0, %v9467_v23 }
 0x3f4   : > { %v12565_v25 = vpop.eup %9470 }
 0x3f5   : > { %6676 = vrot.lane.b32.xlu0 %v6630_v6, %s9770_s30  ;;  %9478 = vrcp.f32 %v6566_v31 }
 0x3f6   : > { %9480 = vrcp.f32 %v6565_v20 }
 0x3f7   : > { %6678 = vrot.lane.b32.xlu1 %v6631_v11, %s9770_s30  ;;  %9482 = vrcp.f32 %v6567_v24 }
 0x413   : > { %v6729_v54 = vpop.permute.xlu0 %6728 }
 0x414   : > { %v6776_v16 = vmul.f32 %v12518_v22, %v6729_v54 }
 0x415   : > { %v6731_v17 = vpop.permute.xlu1 %6730 }
 0x416   : > { %6808 = vrot.lane.b32.xlu0 %v6776_v16, %s9770_s30  ;;  %v6777_v32 = vmul.f32 %v12527_v10, %v6731_v17  ;;  %v12569_v16 = vpop.eup %9472 }
 0x417   : > { %v6733_v0 = vpop.permute.xlu0 %6732 }
 0x418   : > { %v6778_v40 = vmul.f32 %v12523_v8, %v6733_v0  ;;  %6810 = vrot.lane.b32.xlu1 %v6777_v32, %s9770_s30 }
 0x419   : > { %v6735_v43 = vpop.permute.xlu1 %6734 }
 0x41a   : > { %6812 = vrot.lane.b32.xlu0 %v6778_v40, %s9770_s30  ;;  %v6779_v62 = vmul.f32 %v12534_v1, %v6735_v43  ;;  %v12573_v40 = vpop.eup %9474 }
 0x41b   : > { %v12577_v32 = vpop.eup %9476 }
 0x41c   : > { %6814 = vrot.lane.b32.xlu1 %v6779_v62, %s9770_s30  ;;  %v12581_v60 = vpop.eup %9478 }
 0x41d   : > { %v12585_v63 = vpop.eup %9480 }
 0x41e   : > { %v12590_v27 = vpop.eup %9482 }
 0x433   : > { %v6737_v37 = vpop.permute.xlu0 %6736 }
 0x434   : > { %v6780_v7 = vmul.f32 %v12546_v28, %v6737_v37 }
 0x435   : > { %v6739_v47 = vpop.permute.xlu1 %6738 }
 0x436   : > { %6816 = vrot.lane.b32.xlu0 %v6780_v7, %s9770_s30  ;;  %v6781_v11 = vmul.f32 %v12553_v2, %v6739_v47 }
 0x437   : > { %v6741_v3 = vpop.permute.xlu0 %6740 }
 0x438   : > { %v6782_v6 = vmul.f32 %v12550_v15, %v6741_v3  ;;  %6818 = vrot.lane.b32.xlu1 %v6781_v11, %s9770_s30 }
 0x439   : > { %v6743_v29 = vpop.permute.xlu1 %6742 }
 0x43a   : > { %6820 = vrot.lane.b32.xlu0 %v6782_v6, %s9770_s30  ;;  %v6783_v12 = vmul.f32 %v12561_v35, %v6743_v29 }
 0x43b   : > { %v6745_v48 = vpop.permute.xlu0 %6744 }
 0x43c   : > { %v6784_v57 = vmul.f32 %v12557_v46, %v6745_v48  ;;  %6822 = vrot.lane.b32.xlu1 %v6783_v12, %s9770_s30 }
 0x43d   : > { %v6747_v0 = vpop.permute.xlu1 %6746 }
 0x43e   : > { %6824 = vrot.lane.b32.xlu0 %v6784_v57, %s9770_s30  ;;  %v6785_v52 = vmul.f32 %v12569_v16, %v6747_v0 }
 0x43f   : > { %v6749_v54 = vpop.permute.xlu0 %6748 }
 0x440   : > { %v6786_v26 = vmul.f32 %v12565_v25, %v6749_v54  ;;  %6826 = vrot.lane.b32.xlu1 %v6785_v52, %s9770_s30 }
 0x441   : > { %v6751_v19 = vpop.permute.xlu1 %6750 }
 0x442   : > { %6828 = vrot.lane.b32.xlu0 %v6786_v26, %s9770_s30  ;;  %v6787_v43 = vmul.f32 %v12577_v32, %v6751_v19 }
 0x443   : > { %v6753_v17 = vpop.permute.xlu0 %6752 }
 0x444   : > { %v6788_v41 = vmul.f32 %v12573_v40, %v6753_v17  ;;  %6830 = vrot.lane.b32.xlu1 %v6787_v43, %s9770_s30 }
 0x445   : > { %v6755_v50 = vpop.permute.xlu1 %6754 }
 0x446   : > { %6832 = vrot.lane.b32.xlu0 %v6788_v41, %s9770_s30  ;;  %v6789_v61 = vmul.f32 %v12585_v63, %v6755_v50 }
 0x447   : > { %v6757_v62 = vpop.permute.xlu0 %6756 }
 0x448   : > { %v6790_v58 = vmul.f32 %v12581_v60, %v6757_v62  ;;  %6834 = vrot.lane.b32.xlu1 %v6789_v61, %s9770_s30 }
 0x449   : > { %v6759_v56 = vpop.permute.xlu1 %6758 }
 0x44a   : > { %6836 = vrot.lane.b32.xlu0 %v6790_v58, %s9770_s30  ;;  %v6791_v55 = vmul.f32 %v12590_v27, %v6759_v56 }
 0x44b   : > { %v6649_v36 = vpop.permute.xlu0 %6648 }
 0x44c   : > { %6838 = vrot.lane.b32.xlu1 %v6791_v55, %s9770_s30  ;;  %v6696_v37 = vmul.f32 %v12518_v22, %v6649_v36 }
 0x44d   : > { %v6651_v18 = vpop.permute.xlu1 %6650 }
 0x44e   : > { %v6697_v3 = vmul.f32 %v12527_v10, %v6651_v18 }
 0x44f   : > { %v6653_v51 = vpop.permute.xlu0 %6652 }
 0x450   : > { %v6698_v13 = vmul.f32 %v12523_v8, %v6653_v51 }
 0x451   : > { %v6655_v14 = vpop.permute.xlu1 %6654 }
 0x452   : > { %v6699_v47 = vmul.f32 %v12534_v1, %v6655_v14 }
 0x453   : > { %v12594_v21 = vpop.permute.xlu0 %6656 }
 0x455   : > { %v12596_v53 = vpop.permute.xlu1 %6658 }
 0x457   : > { %v6661_v38 = vpop.permute.xlu0 %6660 }
 0x458   : > { %v6702_v61 = vmul.f32 %v12550_v15, %v6661_v38 }
 0x459   : > { %v6663_v4 = vpop.permute.xlu1 %6662 }
 0x45b   : > { %v6665_v49 = vpop.permute.xlu0 %6664 }
 0x45c   : > { %v6704_v41 = vmul.f32 %v12557_v46, %v6665_v49 }
 0x45d   : > { %v6667_v39 = vpop.permute.xlu1 %6666 }
 0x45e   : > { %v6705_v56 = vmul.f32 %v12569_v16, %v6667_v39  ;;  %v6700_v39 = vmul.f32 %v12546_v28, %v12594_v21 }
 0x45f   : > { %v6669_v5 = vpop.permute.xlu0 %6668 }
 0x460   : > { %v6706_v26 = vmul.f32 %v12565_v25, %v6669_v5  ;;  %v6703_v5 = vmul.f32 %v12561_v35, %v6663_v4 }
 0x461   : > { %v6671_v45 = vpop.permute.xlu1 %6670 }
 0x462   : > { %v6707_v19 = vmul.f32 %v12577_v32, %v6671_v45 }
 0x463   : > { %v12598_v44 = vpop.permute.xlu0 %6672 }
 0x465   : > { %v12600_v30 = vpop.permute.xlu1 %6674 }
 0x467   : > { %v6677_v9 = vpop.permute.xlu0 %6676 }
 0x468   : > { %v6710_v14 = vmul.f32 %v12581_v60, %v6677_v9 }
 0x469   : > { %v6679_v33 = vpop.permute.xlu1 %6678 }
 0x46a   : > { %v6711_v9 = vmul.f32 %v12590_v27, %v6679_v33 }
 0x488   : > { %v6809_v42 = vpop.permute.xlu0 %6808 }
 0x489   : > { %v6856_v7 = vadd.f32 %v6809_v42, %v6696_v37 }
 0x48a   : > { %v6811_v6 = vpop.permute.xlu1 %6810 }
 0x48b   : > { %7065 = vrot.lane.b32.xlu0 %v6856_v7, %s9771_s15  ;;  %v6857_v31 = vadd.f32 %v6811_v6, %v6697_v3  ;;  %v6701_v6 = vmul.f32 %v12553_v2, %v12596_v53 }
 0x48c   : > { %v6813_v59 = vpop.permute.xlu0 %6812 }
 0x48d   : > { %v12606_v34 = vadd.f32 %v6813_v59, %v6698_v13  ;;  %7067 = vrot.lane.b32.xlu1 %v6857_v31, %s9771_s15  ;;  %v6708_v59 = vmul.f32 %v12573_v40, %v12598_v44 }
 0x48e   : > { %v6815_v11 = vpop.permute.xlu1 %6814 }
 0x48f   : > { %9484 = vtanh.f32 %v12606_v34  ;;  %v12611_v20 = vadd.f32 %v6815_v11, %v6699_v47  ;;  %v6709_v11 = vmul.f32 %v12585_v63, %v12600_v30 }
 0x491   : > { %9486 = vtanh.f32 %v12611_v20 }
 0x499   : > { %v9485_v48 = vpop.eup %9484 }
 0x49a   : > { %6908 = vrot.lane.b32.xlu0 %v9485_v48, %s9770_s30 }
 0x49b   : > { %v9487_v23 = vpop.eup %9486 }
 0x49c   : > { %6910 = vrot.lane.b32.xlu1 %v9487_v23, %s9770_s30 }
 0x4a8   : > { %v6817_v57 = vpop.permute.xlu0 %6816 }
 0x4a9   : > { %v6860_v13 = vadd.f32 %v6817_v57, %v6700_v39 }
 0x4aa   : > { %v6819_v12 = vpop.permute.xlu1 %6818 }
 0x4ab   : > { %v6861_v47 = vadd.f32 %v6819_v12, %v6701_v6 }
 0x4ac   : > { %v6821_v29 = vpop.permute.xlu0 %6820 }
 0x4ad   : > { %v6862_v55 = vadd.f32 %v6821_v29, %v6702_v61 }
 0x4ae   : > { %v6823_v54 = vpop.permute.xlu1 %6822 }
 0x4af   : > { %v6863_v37 = vadd.f32 %v6823_v54, %v6703_v5 }
 0x4b0   : > { %v6825_v24 = vpop.permute.xlu0 %6824 }
 0x4b1   : > { %v12622_v58 = vadd.f32 %v6825_v24, %v6704_v41 }
 0x4b2   : > { %v6827_v17 = vpop.permute.xlu1 %6826 }
 0x4b3   : > { %v6865_v49 = vadd.f32 %v6827_v17, %v6705_v56 }
 0x4b4   : > { %v6829_v0 = vpop.permute.xlu0 %6828 }
 0x4b5   : > { %v12617_v52 = vadd.f32 %v6829_v0, %v6706_v26 }
 0x4b6   : > { %v6831_v43 = vpop.permute.xlu1 %6830 }
 0x4b7   : > { %9488 = vtanh.f32 %v12617_v52  ;;  %v12624_v50 = vadd.f32 %v6831_v43, %v6707_v19 }
 0x4b8   : > { %v6833_v62 = vpop.permute.xlu0 %6832  ;;  %9490 = vtanh.f32 %v6856_v7 }
 0x4b9   : > { %9492 = vtanh.f32 %v12624_v50  ;;  %v6868_v33 = vadd.f32 %v6833_v62, %v6708_v59 }
 0x4ba   : > { %9494 = vtanh.f32 %v12622_v58  ;;  %v6835_v36 = vpop.permute.xlu1 %6834 }
 0x4bb   : > { %9496 = vtanh.f32 %v6857_v31  ;;  %v6869_v53 = vadd.f32 %v6835_v36, %v6709_v11 }
 0x4bc   : > { %v6837_v18 = vpop.permute.xlu0 %6836  ;;  %9498 = vtanh.f32 %v6862_v55 }
 0x4bd   : > { %v12633_v38 = vadd.f32 %v6837_v18, %v6710_v14  ;;  %9500 = vtanh.f32 %v6865_v49 }
 0x4be   : > { %v6839_v42 = vpop.permute.xlu1 %6838 }
 0x4bf   : > { %9502 = vtanh.f32 %v12633_v38  ;;  %v12643_v3 = vadd.f32 %v6839_v42, %v6711_v9 }
 0x4c0   : > { %9504 = vtanh.f32 %v6863_v37 }
 0x4c1   : > { %v9489_v51 = vpop.eup %9488  ;;  %9506 = vtanh.f32 %v6860_v13 }
 0x4c2   : > { %6924 = vrot.lane.b32.xlu0 %v9489_v51, %s9770_s30  ;;  %v9491_v45 = vpop.eup %9490  ;;  %9508 = vtanh.f32 %v12643_v3 }
 0x4c3   : > { %v9493_v7 = vpop.eup %9492  ;;  %9510 = vtanh.f32 %v6868_v33 }
 0x4c4   : > { %6926 = vrot.lane.b32.xlu1 %v9493_v7, %s9770_s30  ;;  %v9495_v4 = vpop.eup %9494  ;;  %9512 = vtanh.f32 %v6861_v47 }
 0x4c5   : > { %v9497_v21 = vpop.eup %9496  ;;  %9514 = vtanh.f32 %v6869_v53 }
 0x4c6   : > { %6904 = vrot.lane.b32.xlu0 %v9491_v45, %s9770_s30  ;;  %v9499_v31 = vpop.eup %9498 }
 0x4c7   : > { %v9501_v44 = vpop.eup %9500 }
 0x4c8   : > { %6906 = vrot.lane.b32.xlu1 %v9497_v21, %s9770_s30 }
 0x4c9   : > { %v9503_v48 = vpop.eup %9502 }
 0x4ca   : > { %6920 = vrot.lane.b32.xlu0 %v9495_v4, %s9770_s30  ;;  %v9505_v23 = vpop.eup %9504 }
 0x4cb   : > { %v9507_v57 = vpop.eup %9506 }
 0x4cc   : > { %6922 = vrot.lane.b32.xlu1 %v9501_v44, %s9770_s30  ;;  %v9509_v29 = vpop.eup %9508 }
 0x4cd   : > { %v9511_v12 = vpop.eup %9510 }
 0x4ce   : > { %6916 = vrot.lane.b32.xlu0 %v9499_v31, %s9770_s30  ;;  %v9513_v30 = vpop.eup %9512 }
 0x4cf   : > { %v9515_v24 = vpop.eup %9514 }
 0x4d0   : > { %6918 = vrot.lane.b32.xlu1 %v9505_v23, %s9770_s30 }
 0x4d2   : > { %6932 = vrot.lane.b32.xlu0 %v9503_v48, %s9770_s30 }
 0x4d4   : > { %6934 = vrot.lane.b32.xlu1 %v9509_v29, %s9770_s30 }
 0x4d6   : > { %6912 = vrot.lane.b32.xlu0 %v9507_v57, %s9770_s30 }
 0x4d8   : > { %6914 = vrot.lane.b32.xlu1 %v9513_v30, %s9770_s30 }
 0x4da   : > { %6928 = vrot.lane.b32.xlu0 %v9511_v12, %s9770_s30 }
 0x4dc   : > { %6930 = vrot.lane.b32.xlu1 %v9515_v24, %s9770_s30  ;;  %s12684_s30 = scalar_lea.vmem [#allocation5], %s7345_s27  ;;  %s7130_s27 = scalar_lea.sflag [#allocation4], %s12678_s26 }
 0x4de   : > { %7069 = vrot.lane.b32.xlu0 %v12606_v34, %s9771_s15 }
 0x4e0   : > { %7071 = vrot.lane.b32.xlu1 %v12611_v20, %s9771_s15 }
 0x4e2   : > { %7073 = vrot.lane.b32.xlu0 %v6860_v13, %s9771_s15 }
 0x4e4   : > { %7075 = vrot.lane.b32.xlu1 %v6861_v47, %s9771_s15 }
 0x4e6   : > { %7077 = vrot.lane.b32.xlu0 %v6862_v55, %s9771_s15 }
 0x4e8   : > { %7079 = vrot.lane.b32.xlu1 %v6863_v37, %s9771_s15 }
 0x4ea   : > { %7081 = vrot.lane.b32.xlu0 %v12622_v58, %s9771_s15 }
 0x4ec   : > { %7083 = vrot.lane.b32.xlu1 %v6865_v49, %s9771_s15 }
 0x4ee   : > { %7085 = vrot.lane.b32.xlu0 %v12617_v52, %s9771_s15 }
 0x4f0   : > { %7087 = vrot.lane.b32.xlu1 %v12624_v50, %s9771_s15 }
 0x4f2   : > { %7089 = vrot.lane.b32.xlu0 %v6868_v33, %s9771_s15 }
 0x4f4   : > { %7091 = vrot.lane.b32.xlu1 %v6869_v53, %s9771_s15 }
 0x4fd   : > { %v7066_v34 = vpop.permute.xlu0 %7065 }
 0x4fe   : > { %7113 = vst.msk [vmem:[%s12684_s30] sm:$0xff] %vm7032_vm4, %v7066_v34 }
 0x4ff   : > { %v7068_v20 = vpop.permute.xlu1 %7067 }
 0x500   : > { %7114 = vst.msk [vmem:[%s12684_s30 + $0x8] sm:$0xff] %vm7032_vm4, %v7068_v20 }
 0x50c   : > { %v6909_v54 = vpop.permute.xlu0 %6908 }
 0x50d   : > { %v6954_v26 = vmul.f32 %v12523_v8, %v6909_v54 }
 0x50e   : > { %v6911_v0 = vpop.permute.xlu1 %6910 }
 0x50f   : > { %6988 = vrot.lane.b32.xlu0 %v6954_v26, %s9772_s16  ;;  %v6955_v52 = vmul.f32 %v12534_v1, %v6911_v0 }
 0x511   : > { %6990 = vrot.lane.b32.xlu1 %v6955_v52, %s9772_s16 }
 0x534   : > { %v6925_v17 = vpop.permute.xlu0 %6924 }
 0x535   : > { %v6962_v41 = vmul.f32 %v12565_v25, %v6925_v17 }
 0x536   : > { %v6927_v62 = vpop.permute.xlu1 %6926 }
 0x537   : > { %7004 = vrot.lane.b32.xlu0 %v6962_v41, %s9772_s16  ;;  %v6963_v58 = vmul.f32 %v12577_v32, %v6927_v62 }
 0x538   : > { %v6905_v19 = vpop.permute.xlu0 %6904 }
 0x539   : > { %v6952_v43 = vmul.f32 %v12518_v22, %v6905_v19  ;;  %7006 = vrot.lane.b32.xlu1 %v6963_v58, %s9772_s16 }
 0x53a   : > { %v6907_v50 = vpop.permute.xlu1 %6906 }
 0x53b   : > { %6984 = vrot.lane.b32.xlu0 %v6952_v43, %s9772_s16  ;;  %v6953_v61 = vmul.f32 %v12527_v10, %v6907_v50 }
 0x53c   : > { %v6921_v8 = vpop.permute.xlu0 %6920 }
 0x53d   : > { %v6960_v1 = vmul.f32 %v12557_v46, %v6921_v8  ;;  %6986 = vrot.lane.b32.xlu1 %v6953_v61, %s9772_s16 }
 0x53e   : > { %v6923_v56 = vpop.permute.xlu1 %6922 }
 0x53f   : > { %7000 = vrot.lane.b32.xlu0 %v6960_v1, %s9772_s16  ;;  %v6961_v32 = vmul.f32 %v12569_v16, %v6923_v56 }
 0x540   : > { %v6917_v25 = vpop.permute.xlu0 %6916 }
 0x541   : > { %v6958_v22 = vmul.f32 %v12550_v15, %v6917_v25  ;;  %7002 = vrot.lane.b32.xlu1 %v6961_v32, %s9772_s16 }
 0x542   : > { %v6919_v36 = vpop.permute.xlu1 %6918 }
 0x543   : > { %6996 = vrot.lane.b32.xlu0 %v6958_v22, %s9772_s16  ;;  %v6959_v10 = vmul.f32 %v12561_v35, %v6919_v36 }
 0x544   : > { %v6933_v55 = vpop.permute.xlu0 %6932 }
 0x545   : > { %v6966_v46 = vmul.f32 %v12581_v60, %v6933_v55  ;;  %6998 = vrot.lane.b32.xlu1 %v6959_v10, %s9772_s16 }
 0x546   : > { %v6935_v51 = vpop.permute.xlu1 %6934 }
 0x547   : > { %7012 = vrot.lane.b32.xlu0 %v6966_v46, %s9772_s16  ;;  %v6967_v16 = vmul.f32 %v12590_v27, %v6935_v51 }
 0x548   : > { %v6913_v18 = vpop.permute.xlu0 %6912 }
 0x549   : > { %v6956_v15 = vmul.f32 %v12546_v28, %v6913_v18  ;;  %7014 = vrot.lane.b32.xlu1 %v6967_v16, %s9772_s16 }
 0x54a   : > { %v6915_v60 = vpop.permute.xlu1 %6914 }
 0x54b   : > { %6992 = vrot.lane.b32.xlu0 %v6956_v15, %s9772_s16  ;;  %v6957_v49 = vmul.f32 %v12553_v2, %v6915_v60 }
 0x54c   : > { %v6929_v14 = vpop.permute.xlu0 %6928 }
 0x54d   : > { %v6964_v35 = vmul.f32 %v12573_v40, %v6929_v14  ;;  %6994 = vrot.lane.b32.xlu1 %v6957_v49, %s9772_s16 }
 0x54e   : > { %v6931_v27 = vpop.permute.xlu1 %6930 }
 0x54f   : > { %7008 = vrot.lane.b32.xlu0 %v6964_v35, %s9772_s16  ;;  %v6965_v5 = vmul.f32 %v12585_v63, %v6931_v27 }
 0x550   : > { %v7070_v28 = vpop.permute.xlu0 %7069 }
 0x551   : > { %7115 = vst.msk [vmem:[%s12684_s30 + $0x10] sm:$0xff] %vm7032_vm4, %v7070_v28  ;;  %7010 = vrot.lane.b32.xlu1 %v6965_v5, %s9772_s16  ;;  %s9640_s16 = scalar_lea.vmem %s12797_s13, 2048 }
 0x552   : > { %v7072_v2 = vpop.permute.xlu1 %7071  ;;  %p9641_p0 = scmp.ne.s32.totalorder %s12797_s13, %s9640_s16  ;;  %p9648_p5 = scmp.lt.s32.totalorder %s9646_s22, %s9640_s16 }
 0x553   : > { %7093 = vrot.lane.b32.xlu0 %v12633_v38, %s9771_s15  ;;  %7116 = vst.msk [vmem:[%s12684_s30 + $0x18] sm:$0xff] %vm7032_vm4, %v7072_v2 }
 0x554   : > { %v7074_v40 = vpop.permute.xlu0 %7073  ;;  %p9642_p1 = pnand %p9641_p0, %p9858_p3  ;;  %p9649_p6 = por %p9648_p5, %p9647_p4 }
 0x555   : > { %7117 = vst.msk [vmem:[%s12684_s30 + $0x20] sm:$0xff] %vm7032_vm4, %v7074_v40  ;;  %7095 = vrot.lane.b32.xlu1 %v12643_v3, %s9771_s15 }
 0x556   : > { %v7076_v63 = vpop.permute.xlu1 %7075  ;;  %p9643_p2 = pneg %p9642_p1 }
 0x557   : > { %7118 = vst.msk [vmem:[%s12684_s30 + $0x28] sm:$0xff] %vm7032_vm4, %v7076_v63 }
 0x558   : > { %v7078_v45 = vpop.permute.xlu0 %7077  ;;  %p9650_p7 = pnand %p9649_p6, %p9643_p2 }
 0x559   : > { %7119 = vst.msk [vmem:[%s12684_s30 + $0x30] sm:$0xff] %vm7032_vm4, %v7078_v45 }
 0x55a   : > { %v7080_v39 = vpop.permute.xlu1 %7079 }
 0x55b   : > { %7120 = vst.msk [vmem:[%s12684_s30 + $0x38] sm:$0xff] %vm7032_vm4, %v7080_v39 }
 0x55c   : > { %v7082_v38 = vpop.permute.xlu0 %7081 }
 0x55d   : > { %7121 = vst.msk [vmem:[%s12684_s30 + $0x40] sm:$0xff] %vm7032_vm4, %v7082_v38 }
 0x55e   : > { %v7084_v42 = vpop.permute.xlu1 %7083 }
 0x55f   : > { %7122 = vst.msk [vmem:[%s12684_s30 + $0x48] sm:$0xff] %vm7032_vm4, %v7084_v42 }
 0x560   : > { %v7086_v37 = vpop.permute.xlu0 %7085 }
 0x561   : > { %7123 = vst.msk [vmem:[%s12684_s30 + $0x50] sm:$0xff] %vm7032_vm4, %v7086_v37 }
 0x562   : > { %v7088_v9 = vpop.permute.xlu1 %7087 }
 0x563   : > { %7124 = vst.msk [vmem:[%s12684_s30 + $0x58] sm:$0xff] %vm7032_vm4, %v7088_v9 }
 0x564   : > { %v7090_v7 = vpop.permute.xlu0 %7089 }
 0x565   : > { %7125 = vst.msk [vmem:[%s12684_s30 + $0x60] sm:$0xff] %vm7032_vm4, %v7090_v7 }
 0x566   : > { %v7092_v13 = vpop.permute.xlu1 %7091 }
 0x567   : > { %7126 = vst.msk [vmem:[%s12684_s30 + $0x68] sm:$0xff] %vm7032_vm4, %v7092_v13 }
 0x581   : > { %v6989_v4 = vpop.permute.xlu0 %6988 }
 0x582   : > { %7035 = vst.msk [vmem:[%s12752_s17 + $0x10] sm:$0xff] %vm7032_vm4, %v6989_v4 }
 0x583   : > { %v6991_v59 = vpop.permute.xlu1 %6990 }
 0x584   : > { %7036 = vst.msk [vmem:[%s12752_s17 + $0x18] sm:$0xff] %vm7032_vm4, %v6991_v59 }
 0x5a9   : > { %v7005_v3 = vpop.permute.xlu0 %7004 }
 0x5aa   : > { %7043 = vst.msk [vmem:[%s12752_s17 + $0x50] sm:$0xff] %vm7032_vm4, %v7005_v3 }
 0x5ab   : > { %v7007_v6 = vpop.permute.xlu1 %7006 }
 0x5ac   : > { %7044 = vst.msk [vmem:[%s12752_s17 + $0x58] sm:$0xff] %vm7032_vm4, %v7007_v6 }
 0x5ad   : > { %v6985_v21 = vpop.permute.xlu0 %6984 }
 0x5ae   : > { %7033 = vst.msk [vmem:[%s12752_s17] sm:$0xff] %vm7032_vm4, %v6985_v21 }
 0x5af   : > { %v6987_v31 = vpop.permute.xlu1 %6986 }
 0x5b0   : > { %7034 = vst.msk [vmem:[%s12752_s17 + $0x8] sm:$0xff] %vm7032_vm4, %v6987_v31 }
 0x5b1   : > { %v7001_v33 = vpop.permute.xlu0 %7000 }
 0x5b2   : > { %7041 = vst.msk [vmem:[%s12752_s17 + $0x40] sm:$0xff] %vm7032_vm4, %v7001_v33 }
 0x5b3   : > { %v7003_v44 = vpop.permute.xlu1 %7002 }
 0x5b4   : > { %7042 = vst.msk [vmem:[%s12752_s17 + $0x48] sm:$0xff] %vm7032_vm4, %v7003_v44 }
 0x5b5   : > { %v6997_v47 = vpop.permute.xlu0 %6996 }
 0x5b6   : > { %7039 = vst.msk [vmem:[%s12752_s17 + $0x30] sm:$0xff] %vm7032_vm4, %v6997_v47 }
 0x5b7   : > { %v6999_v48 = vpop.permute.xlu1 %6998 }
 0x5b8   : > { %7040 = vst.msk [vmem:[%s12752_s17 + $0x38] sm:$0xff] %vm7032_vm4, %v6999_v48 }
 0x5b9   : > { %v7013_v11 = vpop.permute.xlu0 %7012 }
 0x5ba   : > { %7047 = vst.msk [vmem:[%s12752_s17 + $0x70] sm:$0xff] %vm7032_vm4, %v7013_v11 }
 0x5bb   : > { %v7015_v23 = vpop.permute.xlu1 %7014 }
 0x5bc   : > { %7048 = vst.msk [vmem:[%s12752_s17 + $0x78] sm:$0xff] %vm7032_vm4, %v7015_v23 }
 0x5bd   : > { %v6993_v53 = vpop.permute.xlu0 %6992 }
 0x5be   : > { %7037 = vst.msk [vmem:[%s12752_s17 + $0x20] sm:$0xff] %vm7032_vm4, %v6993_v53 }
 0x5bf   : > { %v6995_v29 = vpop.permute.xlu1 %6994 }
 0x5c0   : > { %7038 = vst.msk [vmem:[%s12752_s17 + $0x28] sm:$0xff] %vm7032_vm4, %v6995_v29 }
 0x5c1   : > { %v7009_v57 = vpop.permute.xlu0 %7008 }
 0x5c2   : > { %7045 = vst.msk [vmem:[%s12752_s17 + $0x60] sm:$0xff] %vm7032_vm4, %v7009_v57 }
 0x5c3   : > { %v7011_v30 = vpop.permute.xlu1 %7010 }
 0x5c4   : > { %7046 = vst.msk [vmem:[%s12752_s17 + $0x68] sm:$0xff] %vm7032_vm4, %v7011_v30 }
 0x5c5   : > { %v7094_v12 = vpop.permute.xlu0 %7093 }
 0x5c6   : > { %7127 = vst.msk [vmem:[%s12684_s30 + $0x70] sm:$0xff] %vm7032_vm4, %v7094_v12 }
 0x5c7   : > { %9653 = shalt.err (!%p9650_p7)
}
 0x5c8   : > { %s9654_s17 = scalar_lea.hbm %s12795_s14, 2048  ;;  %s9658_s8 = scalar_lea.hbm %s12903_s4, 16384 }
 0x5c9   : > { %p9655_p9 = scmp.ne.s32.totalorder %s12795_s14, %s9654_s17  ;;  %p9659_p12 = scmp.lt.u32.totalorder %s12795_s14, %s12903_s4 }
 0x5ca   : > { %p9660_p13 = scmp.lt.u32.totalorder %s9658_s8, %s9654_s17  ;;  %p9662_p1 = scmp.lt.u32.totalorder %s9654_s17, %s12795_s14 }
 0x5cb   : > { %p9656_p10 = pnand %p9655_p9, %p9858_p3 }
 0x5cc   : > { %p9661_p0 = por %p9660_p13, %p9659_p12 }
 0x5cd   : > { %p9657_p11 = pneg %p9656_p10 }
 0x5ce   : > { %p9663_p2 = por %p9662_p1, %p9661_p0 }
 0x5d0   : > { %p9664_p4 = pnand %p9663_p2, %p9657_p11 }
 0x5d2   : > { %9667 = shalt.err (!%p9664_p4)
}
 0x5d3   : > { %s9774_s16 = smov 128   ;;  %s9775_s15 = smov 8   ;;  %v7096_v24 = vpop.permute.xlu1 %7095 }
 0x5d4   : > { %8954 = dma.vmem_to_hbm [thread:$0]  (%p9858_p3), %s12797_s13, 2048, %s12795_s14, %s7130_s27, %s9774_s16, %s9774_s16, %s9775_s15  }
 0x5d5   : > { %s12938_s21 = sshll.u32 %s12780_s10, 7  ;;  %s12939_s8 = sshll.u32 %s12684_s30, 4  ;;  %7128 = vst.msk [vmem:[%s12684_s30 + $0x78] sm:$0xff] %vm7032_vm4, %v7096_v24  ;;  %s12840_s8 = int_to_ptr.vmem [resolvable:$true] %s12939_s8 }
 0x5d6   : > { %s12836_s12 = scalar_lea.hbm %s12904_s5, %s12938_s21  ;;  %s7135_s9 = scalar_lea.sflag [#allocation6], %s12678_s26 }
 0x5d7   : > { %s9668_s0 = scalar_lea.vmem %s12840_s8, 2048  ;;  %s9776_s10 = smov [#allocation5]  }
 0x5d8   : > { %p9669_p5 = scmp.ne.s32.totalorder %s12840_s8, %s9668_s0  ;;  %s9672_s13 = sshll.u32 %s9776_s10, 4  ;;  %s9673_s13 = int_to_ptr.vmem [resolvable:$false] %s9672_s13 }
 0x5d9   : > { %s9674_s14 = scalar_lea.vmem %s9673_s13, 4096  ;;  %p9675_p9 = scmp.lt.s32.totalorder %s12840_s8, %s9673_s13 }
 0x5da   : > { %p9670_p6 = pnand %p9669_p5, %p9858_p3  ;;  %p9676_p10 = scmp.lt.s32.totalorder %s9674_s14, %s9668_s0 }
 0x5dc   : > { %p9671_p7 = pneg %p9670_p6  ;;  %p9677_p11 = por %p9676_p10, %p9675_p9 }
 0x5de   : > { %p9678_p12 = pnand %p9677_p11, %p9671_p7 }
 0x5e0   : > { %9681 = shalt.err (!%p9678_p12)
}
 0x5e1   : > { %s9682_s30 = scalar_lea.hbm %s12836_s12, 2048  ;;  %s9686_s22 = scalar_lea.hbm %s12904_s5, 16384 }
 0x5e2   : > { %p9683_p13 = scmp.ne.s32.totalorder %s12836_s12, %s9682_s30  ;;  %p9687_p2 = scmp.lt.u32.totalorder %s12836_s12, %s12904_s5 }
 0x5e3   : > { %p9688_p4 = scmp.lt.u32.totalorder %s9686_s22, %s9682_s30  ;;  %p9690_p6 = scmp.lt.u32.totalorder %s9682_s30, %s12836_s12 }
 0x5e4   : > { %p9684_p0 = pnand %p9683_p13, %p9858_p3 }
 0x5e5   : > { %p9689_p5 = por %p9688_p4, %p9687_p2 }
 0x5e6   : > { %p9685_p1 = pneg %p9684_p0 }
 0x5e7   : > { %p9691_p7 = por %p9690_p6, %p9689_p5 }
 0x5e9   : > { %p9692_p9 = pnand %p9691_p7, %p9685_p1 }
 0x5eb   : > { %9695 = shalt.err (!%p9692_p9)
}
 0x5ec   : > { %8955 = dma.vmem_to_hbm [thread:$0]  (%p9858_p3), %s12840_s8, 2048, %s12836_s12, %s7135_s9, %s9774_s16, %s9774_s16, %s9775_s15  }
 0x5ed PF: > { %p8965_p10 = scmp.ge.s32.totalorder %s9766_s25, 2  ;;  %s7185_s0 = sand.u32 1, %s9738_s18  }
 0x5ee   : > { %s7186_s13 = scalar_lea.sflag [#allocation4], %s7185_s0 }
 0x5ef   : > { %p8959_p11 = pnand %p8965_p10, %p9867_p8 }
 0x5f1   : > { %9729 = dma.done.wait (!%p8959_p11), %s7186_s13, 2048  }
 0x5f2   : > { %9731 = vsyncadd (!%p8959_p11), %s7186_s13, 4294965248  ;;  %s7195_s6 = scalar_lea.sflag [#allocation6], %s7185_s0 }
 0x5f3   : > { %9733 = dma.done.wait (!%p8959_p11), %s7195_s6, 2048  }
 0x5f4   : > { %9735 = vsyncadd (!%p8959_p11), %s7195_s6, 4294965248  ;;  %s22_s25 = sadd.s32 1, %s9766_s25   ;;  %s12940_s18 = smov %s9742_s19 }
 0x5f5   : > { %p19_p12 = scmp.ge.s32.totalorder %s22_s25, 10   ;;  %s12941_s19 = smov %s9746_s20 }
 0x5f6   : > { %s12942_s20 = smov %s9876_s11  ;;  %s12943_s21 = smov %s9758_s23 }
 0x5f7   : > { %s12944_s22 = smov %s9762_s24  ;;  %s12945_s23 = smov %s12948_s28 }
 0x5f8   : > { %s12946_s24 = smov %s12952_s29  ;;  %21 = sbr.rel (!%p19_p12) target bundleno = 9 (0x9), region = 108 }
 0x5ff   :  { %7200 = vsyncpa [#allocation4], 1 }
 0x600   :  { %7202 = vsyncpa [#allocation4 + $0x1], 1 }
 0x601   :  { %7203 = vsyncpa [#allocation6], 1 }
 0x602   :  { %7205 = vsyncpa [#allocation6 + $0x1], 1 }

</bundles_post_ra>
